<compile_context>
chip_gen: v6e
topology: v6e:2x2x1
jax: 0.10.0
libtpu: 0.0.40
codegen_flags: <defaults>
</compile_context>

<pallas_src>
import functools

import jax
import jax.numpy as jnp
from jax.experimental import pallas as pl
from jax.experimental.pallas import tpu as pltpu


# ----------------------------------------------------------------------------
# padding helpers (zero padding; see invariants in fused_matmul docstring)
# ----------------------------------------------------------------------------

def _round_up(x, m):
    return ((x + m - 1) // m) * m


def _pad_rows(m):
    # rows padded so either a single M tile (<=256) or 256-row tiles divide evenly
    return _round_up(m, 8) if m <= 256 else _round_up(m, 256)


def _pad2d(x, rows, cols):
    r, c = x.shape
    if r == rows and c == cols:
        return x
    return jnp.pad(x, ((0, rows - r), (0, cols - c)))


def _prep_weight(w):
    """(K,N) f32 -> (Kp,Np) bf16, zero-padded.  Done once, offline."""
    K, N = w.shape
    return _pad2d(w.astype(jnp.float32), _round_up(K, 128),
                  _round_up(N, 128)).astype(jnp.bfloat16)


def _prep_bias(b):
    """(N,) -> (1, Np) f32, zero-padded."""
    N = b.shape[-1]
    return _pad2d(b.reshape(1, N).astype(jnp.float32), 1, _round_up(N, 128))


def _prep_vec(v):
    """LN gamma/beta (K,) -> (1, Kp) f32, ZERO-padded (keeps padded cols at 0)."""
    K = v.shape[-1]
    return _pad2d(v.reshape(1, K).astype(jnp.float32), 1, _round_up(K, 128))


# ----------------------------------------------------------------------------
# Pallas kernels
# ----------------------------------------------------------------------------

def fused_matmul(a_p, b_p, *, true_k, bias_p=None, activation="none",
                 ln_g_p=None, ln_b_p=None, residual_p=None, ln_eps=1e-5,
                 out_dtype=jnp.bfloat16):
    """out = act( LayerNorm?(a) @ b + bias? ) + residual?   (padded layout)

      a_p        (Mp, Kp)  bf16 activation, zero-padded rows/cols
      b_p        (Kp, Np)  bf16 weight, zero-padded (pre-padded in prepare_params)
      bias_p     (1,  Np)  f32,  zero-padded, optional
      ln_g/b_p   (1,  Kp)  f32,  zero-padded, optional (LN fused onto A)
      residual_p (Mp, Np)  bf16, optional (fused epilogue add)
      returns    (Mp, Np)  out_dtype (bf16 by default) -- stays padded so the
                           next layer consumes it without a slice/re-pad.

    Zero-padding invariants: padded columns of a/b/bias/gamma/beta are zero,
    so padded OUTPUT columns stay exactly zero.  Padded ROWS may carry junk
    (bias) but are never consumed as data (per-row ops only, sliced at the end).
    """
    Mp, Kp = a_p.shape
    Kp2, Np = b_p.shape
    assert Kp == Kp2 and Mp % 8 == 0 and Kp % 128 == 0 and Np % 128 == 0
    has_ln = ln_g_p is not None
    has_bias = bias_p is not None
    has_res = residual_p is not None

    # ---- MXU-aligned tile selection; bounded VMEM on v5e/v6e/v7x ----
    tm = Mp if Mp <= 256 else 256
    assert Mp % tm == 0
    tn = Np if Np <= 512 else (512 if Np % 512 == 0 else
                               (256 if Np % 256 == 0 else 128))
    if has_ln:
        tk = Kp          # LN stats need the whole row in one tile (nk == 1)
    else:
        tk = Kp if Kp <= 1024 else (512 if Kp % 512 == 0 else
                                    (256 if Kp % 256 == 0 else 128))
    nk = Kp // tk
    single_k = (nk == 1)
    inv_k = 1.0 / float(true_k)

    inputs = [a_p]
    in_specs = [pl.BlockSpec((tm, tk), lambda i, j, k: (i, k))]
    if has_ln:
        inputs += [ln_g_p, ln_b_p]
        in_specs += [pl.BlockSpec((1, tk), lambda i, j, k: (0, k)),
                     pl.BlockSpec((1, tk), lambda i, j, k: (0, k))]
    inputs.append(b_p)
    in_specs.append(pl.BlockSpec((tk, tn), lambda i, j, k: (k, j)))
    if has_bias:
        inputs.append(bias_p)
        in_specs.append(pl.BlockSpec((1, tn), lambda i, j, k: (0, j)))
    if has_res:
        inputs.append(residual_p)
        in_specs.append(pl.BlockSpec((tm, tn), lambda i, j, k: (i, j)))

    def kernel(*refs):
        if single_k:
            o_ref = refs[-1]
            refs = refs[:-1]
        else:
            o_ref, acc_ref = refs[-2], refs[-1]
            refs = refs[:-2]
        it = iter(refs)
        a_ref = next(it)
        if has_ln:
            g_ref, be_ref = next(it), next(it)
        b_ref = next(it)
        bias_ref = next(it) if has_bias else None
        res_ref = next(it) if has_res else None

        if has_ln:
            # in-kernel LN stats (f32), centered + padded-column masked
            x = a_ref[...].astype(jnp.float32)
            mu = jnp.sum(x, axis=-1, keepdims=True) * inv_k
            xc = x - mu
            if true_k < tk:
                col = jax.lax.broadcasted_iota(jnp.int32, x.shape, 1)
                xc = jnp.where(col < true_k, xc, 0.0)
            var = jnp.sum(xc * xc, axis=-1, keepdims=True) * inv_k
            a_tile = (xc * jax.lax.rsqrt(var + ln_eps) * g_ref[...]
                      + be_ref[...]).astype(jnp.bfloat16)
        else:
            a_tile = a_ref[...]

        part = jnp.dot(a_tile, b_ref[...], preferred_element_type=jnp.float32)

        def epilogue(acc):
            out = acc
            if has_bias:
                out = out + bias_ref[...]
            if activation == "quick_gelu":            # CLIP QuickGELU
                out = out * jax.nn.sigmoid(1.702 * out)
            elif activation == "relu":
                out = jnp.maximum(out, 0.0)
            if has_res:
                out = out + res_ref[...].astype(jnp.float32)
            o_ref[...] = out.astype(o_ref.dtype)

        if single_k:
            epilogue(part)
        else:
            @pl.when(pl.program_id(2) == 0)
            def _():
                acc_ref[...] = jnp.zeros_like(acc_ref)
            acc_ref[...] += part

            @pl.when(pl.program_id(2) == nk - 1)
            def _():
                epilogue(acc_ref[...])

    scratch = [] if single_k else [pltpu.VMEM((tm, tn), jnp.float32)]
    return pl.pallas_call(
        kernel,
        out_shape=jax.ShapeDtypeStruct((Mp, Np), out_dtype),
        grid_spec=pltpu.PrefetchScalarGridSpec(
            num_scalar_prefetch=0,
            grid=(Mp // tm, Np // tn, nk),
            in_specs=in_specs,
            out_specs=pl.BlockSpec((tm, tn), lambda i, j, k: (i, j)),
            scratch_shapes=scratch),
        compiler_params=pltpu.CompilerParams(
            dimension_semantics=("parallel", "parallel", "arbitrary"),
            vmem_limit_bytes=32 * 1024 * 1024),
    )(*inputs)


def pallas_layernorm(x_p, g_p, b_p, *, true_k, eps=1e-5, out_dtype=jnp.bfloat16):
    """Standalone LayerNorm in the padded layout (only the visual ln_pre needs it)."""
    Mp, Kp = x_p.shape
    tm = Mp if Mp <= 256 else 256
    assert Mp % tm == 0
    inv_k = 1.0 / float(true_k)

    def kernel(x_ref, g_ref, b_ref, o_ref):
        x = x_ref[...].astype(jnp.float32)
        mu = jnp.sum(x, axis=-1, keepdims=True) * inv_k
        xc = x - mu
        if true_k < Kp:
            col = jax.lax.broadcasted_iota(jnp.int32, x.shape, 1)
            xc = jnp.where(col < true_k, xc, 0.0)
        var = jnp.sum(xc * xc, axis=-1, keepdims=True) * inv_k
        o_ref[...] = (xc * jax.lax.rsqrt(var + eps) * g_ref[...]
                      + b_ref[...]).astype(o_ref.dtype)

    return pl.pallas_call(
        kernel,
        out_shape=jax.ShapeDtypeStruct((Mp, Kp), out_dtype),
        grid=(Mp // tm,),
        in_specs=[pl.BlockSpec((tm, Kp), lambda i: (i, 0)),
                  pl.BlockSpec((1, Kp), lambda i: (0, 0)),
                  pl.BlockSpec((1, Kp), lambda i: (0, 0))],
        out_specs=pl.BlockSpec((tm, Kp), lambda i: (i, 0)),
        compiler_params=pltpu.CompilerParams(dimension_semantics=("parallel",)),
    )(x_p, g_p, b_p)


def pallas_attention(qkv, causal):
    """Multi-head attention with heads on the grid.

    qkv: (B*H, 3, S, Dh) bf16 -> (B*H, S, Dh) bf16.  Each grid step is one
    (batch, head) pair: Q/K/V carved by BlockSpec (pipelined DMA, bounded live
    ranges, both v7x TensorCores engaged); causal mask built with iota in-kernel.
    """
    BH, three, S, Dh = qkv.shape
    assert three == 3
    scale = 1.0 / float(Dh) ** 0.5

    def kernel(x_ref, o_ref):
        q = x_ref[0, 0]                                   # (S, Dh) bf16
        k = x_ref[0, 1]
        v = x_ref[0, 2]
        s = jax.lax.dot_general(q, k, (((1,), (1,)), ((), ())),
                                preferred_element_type=jnp.float32) * scale
        if causal:
            row = jax.lax.broadcasted_iota(jnp.int32, (S, S), 0)
            col = jax.lax.broadcasted_iota(jnp.int32, (S, S), 1)
            s = jnp.where(col > row, -1e30, s)
        s = s - jnp.max(s, axis=-1, keepdims=True)
        p = jnp.exp(s)
        p = p * pl.reciprocal(jnp.sum(p, axis=-1, keepdims=True), approx=True)
        o = jnp.dot(p.astype(jnp.bfloat16), v, preferred_element_type=jnp.float32)
        o_ref[...] = o[None].astype(o_ref.dtype)

    return pl.pallas_call(
        kernel,
        out_shape=jax.ShapeDtypeStruct((BH, S, Dh), jnp.bfloat16),
        grid=(BH,),
        in_specs=[pl.BlockSpec((1, 3, S, Dh), lambda b: (b, 0, 0, 0))],
        out_specs=pl.BlockSpec((1, S, Dh), lambda b: (b, 0, 0)),
        compiler_params=pltpu.CompilerParams(dimension_semantics=("parallel",)),
    )(qkv)


def pallas_clip_head(img_feats, txt_feats, txt_old, logit_scale):
    """Normalize features, logits = exp(ls) * img @ txt.T, score = 1 - mean cos."""
    B, E = img_feats.shape
    C, E2 = txt_feats.shape
    assert E == E2
    scale = jnp.exp(jnp.asarray(logit_scale, jnp.float32)).reshape(1)

    def kernel(img_ref, txt_ref, old_ref, ls_ref, logits_ref, score_ref):
        img = img_ref[...].astype(jnp.float32)
        txt = txt_ref[...].astype(jnp.float32)
        old = old_ref[...].astype(jnp.float32)
        img_n = img * jax.lax.rsqrt(jnp.sum(img * img, -1, keepdims=True) + 1e-12)
        txt_n = txt * jax.lax.rsqrt(jnp.sum(txt * txt, -1, keepdims=True) + 1e-12)
        old_n = old * jax.lax.rsqrt(jnp.sum(old * old, -1, keepdims=True) + 1e-12)
        logits_ref[...] = (ls_ref[0] * jnp.dot(
            img_n, txt_n.T, preferred_element_type=jnp.float32)
        ).astype(logits_ref.dtype)
        # torch.nn.CosineSimilarity(dim=1, eps=1e-7) on normalized features
        num = jnp.sum(txt_n * old_n, axis=-1, keepdims=True)           # (C,1)
        den = jnp.maximum(
            jnp.sqrt(jnp.sum(txt_n * txt_n, -1, keepdims=True)) *
            jnp.sqrt(jnp.sum(old_n * old_n, -1, keepdims=True)), 1e-7)
        cos = num / den
        score_ref[...] = 1.0 - jnp.sum(cos, axis=0, keepdims=True) * (1.0 / C)

    logits, score = pl.pallas_call(
        kernel,
        out_shape=(jax.ShapeDtypeStruct((B, C), jnp.float32),
                   jax.ShapeDtypeStruct((1, 1), jnp.float32)),
        grid=(1,),
        in_specs=[pl.BlockSpec((B, E), lambda i: (0, 0)),
                  pl.BlockSpec((C, E), lambda i: (0, 0)),
                  pl.BlockSpec((C, E), lambda i: (0, 0)),
                  pl.BlockSpec(memory_space=pltpu.MemorySpace.SMEM)],
        out_specs=(pl.BlockSpec((B, C), lambda i: (0, 0)),
                   pl.BlockSpec((1, 1), lambda i: (0, 0))),
        compiler_params=pltpu.CompilerParams(dimension_semantics=("arbitrary",)),
    )(img_feats.astype(jnp.float32), txt_feats.astype(jnp.float32),
      txt_old.astype(jnp.float32), scale)
    return logits, score[0, 0]


# ----------------------------------------------------------------------------
# Transformer building blocks (thin glue around the Pallas kernels)
# ----------------------------------------------------------------------------

def residual_block(x_p, blk, n_heads, causal, B, S, D):
    """x = x + attn(ln_1(x)); x = x + mlp(ln_2(x))  (CLIP ResidualAttentionBlock),
    computed entirely in the padded bf16 layout."""
    Mp, Dp = x_p.shape
    rows = B * S
    Dh = D // n_heads
    # LN1 fused into the fused qkv projection
    qkv_p = fused_matmul(x_p, blk["w_qkv"], true_k=D, bias_p=blk["b_qkv"],
                         ln_g_p=blk["ln1_g"], ln_b_p=blk["ln1_b"])
    # head-major layout for the attention grid (wrapper-side reshape only)
    qkv = qkv_p[:rows, :3 * D].reshape(B, S, 3, n_heads, Dh)
    qkv = qkv.transpose(0, 3, 2, 1, 4).reshape(B * n_heads, 3, S, Dh)
    attn = pallas_attention(qkv, causal)                       # (B*H, S, Dh)
    attn = attn.reshape(B, n_heads, S, Dh).transpose(0, 2, 1, 3).reshape(rows, D)
    attn_p = _pad2d(attn, Mp, Dp)
    # attn out-projection with the residual add fused in the epilogue
    x_p = fused_matmul(attn_p, blk["w_out"], true_k=D, bias_p=blk["b_out"],
                       residual_p=x_p)
    # LN2 fused into fc1, QuickGELU fused in the epilogue
    h_p = fused_matmul(x_p, blk["w_fc1"], true_k=D, bias_p=blk["b_fc1"],
                       ln_g_p=blk["ln2_g"], ln_b_p=blk["ln2_b"],
                       activation="quick_gelu")
    # fc2 with the residual add fused
    x_p = fused_matmul(h_p, blk["w_fc2"], true_k=4 * D, bias_p=blk["b_fc2"],
                       residual_p=x_p)
    return x_p


def text_encoder(prompts, tokenized_prompts, tp, n_heads, embed_dim):
    n_cls, S, D = prompts.shape
    Dp = _round_up(D, 128)
    rows = n_cls * S
    Mp = _pad_rows(rows)
    x = (prompts + tp["pos_emb"][None]).astype(jnp.bfloat16).reshape(rows, D)
    x_p = _pad2d(x, Mp, Dp)
    for blk in tp["blocks"]:
        x_p = residual_block(x_p, blk, n_heads, causal=True, B=n_cls, S=S, D=D)
    # gather EOT rows, then ln_final fused into the text projection
    eot = jnp.argmax(tokenized_prompts, axis=-1)
    feats = x_p[:rows].reshape(n_cls, S, Dp)[jnp.arange(n_cls), eot]
    feats_p = _pad2d(feats, _pad_rows(n_cls), Dp)
    out = fused_matmul(feats_p, tp["text_projection"], true_k=D,
                       ln_g_p=tp["ln_final_g"], ln_b_p=tp["ln_final_b"],
                       out_dtype=jnp.float32)
    return out[:n_cls, :embed_dim]


def image_encoder(image, vp, n_heads, patch, embed_dim):
    # NCHW input, patchified in glue (bit-equivalent to the stride-p Conv2d),
    # projections / transformer in Pallas kernels.
    B, C, H, W = image.shape
    gh, gw = H // patch, W // patch
    n_patches = gh * gw
    width = vp["cls_emb"].shape[-1]
    Kc = C * patch * patch
    x = image.reshape(B, C, gh, patch, gw, patch)
    x = x.transpose(0, 2, 4, 1, 3, 5).reshape(B * n_patches, Kc)
    x_p = _pad2d(x.astype(jnp.bfloat16), _pad_rows(B * n_patches),
                 _round_up(Kc, 128))
    emb_p = fused_matmul(x_p, vp["conv_w"], true_k=Kc)         # no bias
    Wp = emb_p.shape[1]
    emb = emb_p[:B * n_patches, :width].astype(jnp.float32)
    emb = emb.reshape(B, n_patches, width)
    cls = jnp.broadcast_to(vp["cls_emb"].astype(jnp.float32)[None, None, :],
                           (B, 1, width))
    x = jnp.concatenate([cls, emb], axis=1) + vp["pos_emb"][None]
    S = n_patches + 1
    rows = B * S
    Mp = _pad_rows(rows)
    x_p = _pad2d(x.astype(jnp.bfloat16).reshape(rows, width), Mp, Wp)
    x_p = pallas_layernorm(x_p, vp["ln_pre_g"], vp["ln_pre_b"], true_k=width)
    for blk in vp["blocks"]:
        x_p = residual_block(x_p, blk, n_heads, causal=False, B=B, S=S, D=width)
    # ln_post fused into the output projection; CLS token only
    cls_rows = x_p[:rows].reshape(B, S, Wp)[:, 0, :]
    cls_p = _pad2d(cls_rows, _pad_rows(B), Wp)
    out = fused_matmul(cls_p, vp["proj"], true_k=width,
                       ln_g_p=vp["ln_post_g"], ln_b_p=vp["ln_post_b"],
                       out_dtype=jnp.float32)
    return out[:B, :embed_dim]


@functools.partial(jax.jit, static_argnames=("patch", "txt_heads", "vis_heads"))
def custom_clip_forward(params, image, *, patch, txt_heads, vis_heads):
    embed_dim = params["ori_embedding"].shape[1]
    # --- PromptLearner.forward: cat([prefix, ctx, suffix], dim=1) ---
    ctx = params["ctx"]
    n_cls = params["token_prefix"].shape[0]
    ctx = jnp.broadcast_to(ctx[None], (n_cls,) + ctx.shape)
    prompts = jnp.concatenate(
        [params["token_prefix"], ctx, params["token_suffix"]], axis=1)

    img_feats = image_encoder(image, params["visual"], vis_heads, patch, embed_dim)
    txt_feats = text_encoder(prompts, params["tokenized_prompts"],
                             params["text"], txt_heads, embed_dim)

    logits, score = pallas_clip_head(img_feats, txt_feats,
                                     params["ori_embedding"],
                                     params["logit_scale"])
    return logits, score


# ----------------------------------------------------------------------------
# Deterministic synthetic parameter construction + one-time prep (pad + bf16)
# ----------------------------------------------------------------------------

def init_block(key, d):
    ks = jax.random.split(key, 4)
    s = 0.02
    return dict(
        ln1_g=jnp.ones((d,), jnp.float32), ln1_b=jnp.zeros((d,), jnp.float32),
        w_qkv=s * jax.random.normal(ks[0], (d, 3 * d), jnp.float32),
        b_qkv=jnp.zeros((3 * d,), jnp.float32),
        w_out=s * jax.random.normal(ks[1], (d, d), jnp.float32),
        b_out=jnp.zeros((d,), jnp.float32),
        ln2_g=jnp.ones((d,), jnp.float32), ln2_b=jnp.zeros((d,), jnp.float32),
        w_fc1=s * jax.random.normal(ks[2], (d, 4 * d), jnp.float32),
        b_fc1=jnp.zeros((4 * d,), jnp.float32),
        w_fc2=s * jax.random.normal(ks[3], (4 * d, d), jnp.float32),
        b_fc2=jnp.zeros((d,), jnp.float32),
    )


def prep_block(blk):
    return dict(
        ln1_g=_prep_vec(blk["ln1_g"]), ln1_b=_prep_vec(blk["ln1_b"]),
        w_qkv=_prep_weight(blk["w_qkv"]), b_qkv=_prep_bias(blk["b_qkv"]),
        w_out=_prep_weight(blk["w_out"]), b_out=_prep_bias(blk["b_out"]),
        ln2_g=_prep_vec(blk["ln2_g"]), ln2_b=_prep_vec(blk["ln2_b"]),
        w_fc1=_prep_weight(blk["w_fc1"]), b_fc1=_prep_bias(blk["b_fc1"]),
        w_fc2=_prep_weight(blk["w_fc2"]), b_fc2=_prep_bias(blk["b_fc2"]),
    )


def prepare_params(raw):
    """One-time offline pre-cast (bf16) + pre-pad of every matmul weight/bias/LN
    vector to the lane-aligned layout consumed by fused_matmul."""
    tp, vp = raw["text"], raw["visual"]
    p = dict(raw)
    p["text"] = dict(
        pos_emb=tp["pos_emb"],
        blocks=[prep_block(b) for b in tp["blocks"]],
        ln_final_g=_prep_vec(tp["ln_final_g"]),
        ln_final_b=_prep_vec(tp["ln_final_b"]),
        text_projection=_prep_weight(tp["text_projection"]),
    )
    p["visual"] = dict(
        conv_w=_prep_weight(vp["conv_w"]),
        cls_emb=vp["cls_emb"], pos_emb=vp["pos_emb"],
        ln_pre_g=_prep_vec(vp["ln_pre_g"]), ln_pre_b=_prep_vec(vp["ln_pre_b"]),
        blocks=[prep_block(b) for b in vp["blocks"]],
        ln_post_g=_prep_vec(vp["ln_post_g"]), ln_post_b=_prep_vec(vp["ln_post_b"]),
        proj=_prep_weight(vp["proj"]),
    )
    return p


def build_params(key):
    # Small shapes consistent with the module structure.
    n_cls, n_ctx, ctx_dim, seq = 4, 4, 32, 16
    embed_dim = 64
    txt_layers = 2
    img_size, patch, C = 16, 8, 3
    vis_width, vis_layers = 32, 2
    n_patches = (img_size // patch) ** 2
    s = 0.02

    keys = jax.random.split(key, 16)
    txt_blocks = [init_block(k, ctx_dim)
                  for k in jax.random.split(keys[0], txt_layers)]
    vis_blocks = [init_block(k, vis_width)
                  for k in jax.random.split(keys[1], vis_layers)]

    # tokenized prompts: argmax marks the EOT position per class.
    eot_pos = jnp.array([7, 8, 9, 10], jnp.int32)
    tokenized = jnp.where(
        jax.lax.broadcasted_iota(jnp.int32, (n_cls, seq), 1) == eot_pos[:, None],
        1000, 1).astype(jnp.int32)

    params = dict(
        # PromptLearner
        ctx=s * jax.random.normal(keys[2], (n_ctx, ctx_dim), jnp.float32),
        token_prefix=s * jax.random.normal(keys[3], (n_cls, 1, ctx_dim), jnp.float32),
        token_suffix=s * jax.random.normal(
            keys[4], (n_cls, seq - 1 - n_ctx, ctx_dim), jnp.float32),
        tokenized_prompts=tokenized,
        ori_embedding=jax.random.normal(keys[5], (n_cls, embed_dim), jnp.float32),
        logit_scale=jnp.float32(4.6052),   # ln(1/0.07), CLIP init
        # Text transformer
        text=dict(
            pos_emb=s * jax.random.normal(keys[6], (seq, ctx_dim), jnp.float32),
            blocks=txt_blocks,
            ln_final_g=jnp.ones((ctx_dim,), jnp.float32),
            ln_final_b=jnp.zeros((ctx_dim,), jnp.float32),
            text_projection=s * jax.random.normal(
                keys[7], (ctx_dim, embed_dim), jnp.float32),
        ),
        # Vision transformer
        visual=dict(
            conv_w=s * jax.random.normal(
                keys[8], (C * patch * patch, vis_width), jnp.float32),
            cls_emb=s * jax.random.normal(keys[9], (vis_width,), jnp.float32),
            pos_emb=s * jax.random.normal(
                keys[10], (n_patches + 1, vis_width), jnp.float32),
            ln_pre_g=jnp.ones((vis_width,), jnp.float32),
            ln_pre_b=jnp.zeros((vis_width,), jnp.float32),
            blocks=vis_blocks,
            ln_post_g=jnp.ones((vis_width,), jnp.float32),
            ln_post_b=jnp.zeros((vis_width,), jnp.float32),
            proj=s * jax.random.normal(
                keys[11], (vis_width, embed_dim), jnp.float32),
        ),
    )
    # TODO(synk): meta_net / Adapter / bias_vectors exist in __init__ but are
    # never used in CustomCLIP.forward, so they are not instantiated here.
    return params


if __name__ == "__main__":
    key = jax.random.PRNGKey(0)
    pkey, ikey = jax.random.split(key)
    params = prepare_params(build_params(pkey))
    image = jax.random.normal(ikey, (2, 3, 16, 16), jnp.float32)  # NCHW

    logits, score = custom_clip_forward(params, image,
                                        patch=8, txt_heads=4, vis_heads=4)
    jax.block_until_ready((logits, score))
    assert logits.shape == (2, 4) and score.shape == ()
    print("KERNEL_OK")
</pallas_src>

<mosaic_0001>
module attributes {stable_mosaic.version = 11 : i64} {
  func.func @kernel(%arg0: i32, %arg1: i32, %arg2: i32, %arg3: memref<64x128xbf16, #tpu.memory_space<vmem>>, %arg4: memref<1x128xf32, #tpu.memory_space<vmem>>, %arg5: memref<1x128xf32, #tpu.memory_space<vmem>>, %arg6: memref<128x128xbf16, #tpu.memory_space<vmem>>, %arg7: memref<1x128xf32, #tpu.memory_space<vmem>>, %arg8: memref<64x128xbf16, #tpu.memory_space<vmem>>) attributes {dimension_semantics = [#tpu.dimension_semantics<parallel>, #tpu.dimension_semantics<parallel>, #tpu.dimension_semantics<arbitrary>], iteration_bounds = array<i64: 1, 1, 1>, scalar_prefetch = 0 : i64, scratch_operands = 0 : i64, tpu.core_type = #tpu.core_type<tc>, window_params = [{transform_indices = @transform_0, window_bounds = array<i64: 64, 128>}, {transform_indices = @transform_1, window_bounds = array<i64: 1, 128>}, {transform_indices = @transform_2, window_bounds = array<i64: 1, 128>}, {transform_indices = @transform_3, window_bounds = array<i64: 128, 128>}, {transform_indices = @transform_4, window_bounds = array<i64: 1, 128>}, {transform_indices = @transform_5, window_bounds = array<i64: 64, 128>}]} {
    %c0 = arith.constant 0 : index
    %c0_0 = arith.constant 0 : index
    %0 = vector.load %arg3[%c0, %c0_0] : memref<64x128xbf16, #tpu.memory_space<vmem>>, vector<64x128xbf16>
    %1 = arith.extf %0 : vector<64x128xbf16> to vector<64x128xf32>
    %cst = arith.constant dense<0.000000e+00> : vector<64xf32>
    %2 = vector.multi_reduction <add>, %1, %cst [1] : vector<64x128xf32> to vector<64xf32>
    %3 = vector.shape_cast %2 : vector<64xf32> to vector<64x1xf32>
    %cst_1 = arith.constant 3.125000e-02 : f32
    %4 = vector.broadcast %cst_1 : f32 to vector<64x1xf32>
    %5 = arith.mulf %3, %4 : vector<64x1xf32>
    %6 = vector.broadcast %5 : vector<64x1xf32> to vector<64x128xf32>
    %7 = arith.subf %1, %6 : vector<64x128xf32>
    %8 = tpu.iota {dimensions = array<i32: 1>} : vector<64x128xi32>
    %c32_i32 = arith.constant 32 : i32
    %9 = vector.broadcast %c32_i32 : i32 to vector<64x128xi32>
    %10 = arith.cmpi slt, %8, %9 : vector<64x128xi32>
    %cst_2 = arith.constant 0.000000e+00 : f32
    %11 = vector.broadcast %cst_2 : f32 to vector<64x128xf32>
    %12 = arith.select %10, %7, %11 : vector<64x128xi1>, vector<64x128xf32>
    %13 = arith.mulf %12, %12 : vector<64x128xf32>
    %cst_3 = arith.constant dense<0.000000e+00> : vector<64xf32>
    %14 = vector.multi_reduction <add>, %13, %cst_3 [1] : vector<64x128xf32> to vector<64xf32>
    %15 = vector.shape_cast %14 : vector<64xf32> to vector<64x1xf32>
    %cst_4 = arith.constant 3.125000e-02 : f32
    %16 = vector.broadcast %cst_4 : f32 to vector<64x1xf32>
    %17 = arith.mulf %15, %16 : vector<64x1xf32>
    %cst_5 = arith.constant 9.99999974E-6 : f32
    %18 = vector.broadcast %cst_5 : f32 to vector<64x1xf32>
    %19 = arith.addf %17, %18 : vector<64x1xf32>
    %20 = math.rsqrt %19 : vector<64x1xf32>
    %21 = vector.broadcast %20 : vector<64x1xf32> to vector<64x128xf32>
    %22 = arith.mulf %12, %21 : vector<64x128xf32>
    %c0_6 = arith.constant 0 : index
    %c0_7 = arith.constant 0 : index
    %23 = vector.load %arg4[%c0_6, %c0_7] : memref<1x128xf32, #tpu.memory_space<vmem>>, vector<1x128xf32>
    %24 = vector.broadcast %23 : vector<1x128xf32> to vector<64x128xf32>
    %25 = arith.mulf %22, %24 : vector<64x128xf32>
    %c0_8 = arith.constant 0 : index
    %c0_9 = arith.constant 0 : index
    %26 = vector.load %arg5[%c0_8, %c0_9] : memref<1x128xf32, #tpu.memory_space<vmem>>, vector<1x128xf32>
    %27 = vector.broadcast %26 : vector<1x128xf32> to vector<64x128xf32>
    %28 = arith.addf %25, %27 : vector<64x128xf32>
    %29 = arith.truncf %28 : vector<64x128xf32> to vector<64x128xbf16>
    %c0_10 = arith.constant 0 : index
    %c0_11 = arith.constant 0 : index
    %30 = vector.load %arg6[%c0_10, %c0_11] : memref<128x128xbf16, #tpu.memory_space<vmem>>, vector<128x128xbf16>
    %cst_12 = arith.constant dense<0.000000e+00> : vector<64x128xf32>
    %31 = tpu.matmul %29, %30, %cst_12 {dimension_numbers = #tpu.dot_dimension_numbers<[1], [0], [0], [1], [0, 0, 1, 1], [], []>} : vector<64x128xbf16>, vector<128x128xbf16>, vector<64x128xf32> -> vector<64x128xf32>
    %c0_13 = arith.constant 0 : index
    %c0_14 = arith.constant 0 : index
    %32 = vector.load %arg7[%c0_13, %c0_14] : memref<1x128xf32, #tpu.memory_space<vmem>>, vector<1x128xf32>
    %33 = vector.broadcast %32 : vector<1x128xf32> to vector<64x128xf32>
    %34 = arith.addf %31, %33 : vector<64x128xf32>
    %35 = arith.truncf %34 : vector<64x128xf32> to vector<64x128xbf16>
    %c0_15 = arith.constant 0 : index
    %c0_16 = arith.constant 0 : index
    %36 = vector.load %arg8[%c0_15, %c0_16] : memref<64x128xbf16, #tpu.memory_space<vmem>>, vector<64x128xbf16>
    tpu.vector_store %arg8[%c0_15, %c0_16], %35 {strides = array<i32>} : memref<64x128xbf16, #tpu.memory_space<vmem>>, vector<64x128xbf16>,
    return
  }
  func.func @transform_0(%arg0: i32, %arg1: i32, %arg2: i32) -> (i32, i32) {
    %c0_i32 = arith.constant 0 : i32
    return %arg0, %arg2 : i32, i32
  }
  func.func @transform_1(%arg0: i32, %arg1: i32, %arg2: i32) -> (i32, i32) {
    %c0_i32 = arith.constant 0 : i32
    %c0_i32_0 = arith.constant 0 : i32
    return %c0_i32, %arg2 : i32, i32
  }
  func.func @transform_2(%arg0: i32, %arg1: i32, %arg2: i32) -> (i32, i32) {
    %c0_i32 = arith.constant 0 : i32
    %c0_i32_0 = arith.constant 0 : i32
    return %c0_i32, %arg2 : i32, i32
  }
  func.func @transform_3(%arg0: i32, %arg1: i32, %arg2: i32) -> (i32, i32) {
    %c0_i32 = arith.constant 0 : i32
    return %arg2, %arg1 : i32, i32
  }
  func.func @transform_4(%arg0: i32, %arg1: i32, %arg2: i32) -> (i32, i32) {
    %c0_i32 = arith.constant 0 : i32
    %c0_i32_0 = arith.constant 0 : i32
    return %c0_i32, %arg1 : i32, i32
  }
  func.func @transform_5(%arg0: i32, %arg1: i32, %arg2: i32) -> (i32, i32) {
    %c0_i32 = arith.constant 0 : i32
    return %arg0, %arg1 : i32, i32
  }
}

module attributes {stable_mosaic.version = 11 : i64} {
  func.func @kernel(%arg0: i32, %arg1: memref<1x3x16x8xbf16, #tpu.memory_space<vmem>>, %arg2: memref<1x16x8xbf16, #tpu.memory_space<vmem>>) attributes {dimension_semantics = [#tpu.dimension_semantics<parallel>], iteration_bounds = array<i64: 16>, scalar_prefetch = 0 : i64, scratch_operands = 0 : i64, tpu.core_type = #tpu.core_type<tc>, window_params = [{transform_indices = @transform_0, window_bounds = array<i64: 1, 3, 16, 8>}, {transform_indices = @transform_1, window_bounds = array<i64: 1, 16, 8>}]} {
    %c0 = arith.constant 0 : index
    %c0_0 = arith.constant 0 : index
    %c0_1 = arith.constant 0 : index
    %c0_2 = arith.constant 0 : index
    %0 = vector.load %arg1[%c0, %c0_0, %c0_1, %c0_2] : memref<1x3x16x8xbf16, #tpu.memory_space<vmem>>, vector<1x1x16x8xbf16>
    %1 = vector.shape_cast %0 : vector<1x1x16x8xbf16> to vector<16x8xbf16>
    %c0_3 = arith.constant 0 : index
    %c1 = arith.constant 1 : index
    %c0_4 = arith.constant 0 : index
    %c0_5 = arith.constant 0 : index
    %2 = vector.load %arg1[%c0_3, %c1, %c0_4, %c0_5] : memref<1x3x16x8xbf16, #tpu.memory_space<vmem>>, vector<1x1x16x8xbf16>
    %3 = vector.shape_cast %2 : vector<1x1x16x8xbf16> to vector<16x8xbf16>
    %c0_6 = arith.constant 0 : index
    %c2 = arith.constant 2 : index
    %c0_7 = arith.constant 0 : index
    %c0_8 = arith.constant 0 : index
    %4 = vector.load %arg1[%c0_6, %c2, %c0_7, %c0_8] : memref<1x3x16x8xbf16, #tpu.memory_space<vmem>>, vector<1x1x16x8xbf16>
    %5 = vector.shape_cast %4 : vector<1x1x16x8xbf16> to vector<16x8xbf16>
    %cst = arith.constant dense<0.000000e+00> : vector<16x16xf32>
    %6 = tpu.matmul %1, %3, %cst {dimension_numbers = #tpu.dot_dimension_numbers<[1], [1], [0], [0], [0, 0, 1, 0], [], []>} : vector<16x8xbf16>, vector<16x8xbf16>, vector<16x16xf32> -> vector<16x16xf32>
    %cst_9 = arith.constant 0.353553385 : f32
    %7 = vector.broadcast %cst_9 : f32 to vector<16x16xf32>
    %8 = arith.mulf %6, %7 : vector<16x16xf32>
    %9 = tpu.iota {dimensions = array<i32: 0>} : vector<16x16xi32>
    %10 = tpu.iota {dimensions = array<i32: 1>} : vector<16x16xi32>
    %11 = arith.cmpi sgt, %10, %9 : vector<16x16xi32>
    %cst_10 = arith.constant -1.000000e+30 : f32
    %12 = vector.broadcast %cst_10 : f32 to vector<16x16xf32>
    %13 = arith.select %11, %12, %8 : vector<16x16xi1>, vector<16x16xf32>
    %cst_11 = arith.constant dense<0xFF800000> : vector<16xf32>
    %14 = vector.multi_reduction <maximumf>, %13, %cst_11 [1] : vector<16x16xf32> to vector<16xf32>
    %15 = vector.shape_cast %14 : vector<16xf32> to vector<16x1xf32>
    %16 = vector.broadcast %15 : vector<16x1xf32> to vector<16x16xf32>
    %17 = arith.subf %13, %16 : vector<16x16xf32>
    %18 = math.exp %17 : vector<16x16xf32>
    %cst_12 = arith.constant dense<0.000000e+00> : vector<16xf32>
    %19 = vector.multi_reduction <add>, %18, %cst_12 [1] : vector<16x16xf32> to vector<16xf32>
    %20 = vector.shape_cast %19 : vector<16xf32> to vector<16x1xf32>
    %21 = tpu.reciprocal %20 {approx = true} : vector<16x1xf32> -> vector<16x1xf32>
    %22 = vector.broadcast %21 : vector<16x1xf32> to vector<16x16xf32>
    %23 = arith.mulf %18, %22 : vector<16x16xf32>
    %24 = arith.truncf %23 : vector<16x16xf32> to vector<16x16xbf16>
    %cst_13 = arith.constant dense<0.000000e+00> : vector<16x8xf32>
    %25 = tpu.matmul %24, %5, %cst_13 {dimension_numbers = #tpu.dot_dimension_numbers<[1], [0], [0], [1], [0, 0, 1, 1], [], []>} : vector<16x16xbf16>, vector<16x8xbf16>, vector<16x8xf32> -> vector<16x8xf32>
    %26 = vector.shape_cast %25 : vector<16x8xf32> to vector<1x16x8xf32>
    %27 = arith.truncf %26 : vector<1x16x8xf32> to vector<1x16x8xbf16>
    %c0_14 = arith.constant 0 : index
    %c0_15 = arith.constant 0 : index
    %c0_16 = arith.constant 0 : index
    %28 = vector.load %arg2[%c0_14, %c0_15, %c0_16] : memref<1x16x8xbf16, #tpu.memory_space<vmem>>, vector<1x16x8xbf16>
    tpu.vector_store %arg2[%c0_14, %c0_15, %c0_16], %27 {strides = array<i32>} : memref<1x16x8xbf16, #tpu.memory_space<vmem>>, vector<1x16x8xbf16>,
    return
  }
  func.func @transform_0(%arg0: i32) -> (i32, i32, i32, i32) {
    %c0_i32 = arith.constant 0 : i32
    %c0_i32_0 = arith.constant 0 : i32
    %c0_i32_1 = arith.constant 0 : i32
    %c0_i32_2 = arith.constant 0 : i32
    return %arg0, %c0_i32, %c0_i32_0, %c0_i32_1 : i32, i32, i32, i32
  }
  func.func @transform_1(%arg0: i32) -> (i32, i32, i32) {
    %c0_i32 = arith.constant 0 : i32
    %c0_i32_0 = arith.constant 0 : i32
    %c0_i32_1 = arith.constant 0 : i32
    return %arg0, %c0_i32, %c0_i32_0 : i32, i32, i32
  }
}

module attributes {stable_mosaic.version = 11 : i64} {
  func.func @kernel(%arg0: i32, %arg1: i32, %arg2: i32, %arg3: memref<64x128xbf16, #tpu.memory_space<vmem>>, %arg4: memref<128x128xbf16, #tpu.memory_space<vmem>>, %arg5: memref<1x128xf32, #tpu.memory_space<vmem>>, %arg6: memref<64x128xbf16, #tpu.memory_space<vmem>>, %arg7: memref<64x128xbf16, #tpu.memory_space<vmem>>) attributes {dimension_semantics = [#tpu.dimension_semantics<parallel>, #tpu.dimension_semantics<parallel>, #tpu.dimension_semantics<arbitrary>], iteration_bounds = array<i64: 1, 1, 1>, scalar_prefetch = 0 : i64, scratch_operands = 0 : i64, tpu.core_type = #tpu.core_type<tc>, window_params = [{transform_indices = @transform_0, window_bounds = array<i64: 64, 128>}, {transform_indices = @transform_1, window_bounds = array<i64: 128, 128>}, {transform_indices = @transform_2, window_bounds = array<i64: 1, 128>}, {transform_indices = @transform_3, window_bounds = array<i64: 64, 128>}, {transform_indices = @transform_4, window_bounds = array<i64: 64, 128>}]} {
    %c0 = arith.constant 0 : index
    %c0_0 = arith.constant 0 : index
    %0 = vector.load %arg3[%c0, %c0_0] : memref<64x128xbf16, #tpu.memory_space<vmem>>, vector<64x128xbf16>
    %c0_1 = arith.constant 0 : index
    %c0_2 = arith.constant 0 : index
    %1 = vector.load %arg4[%c0_1, %c0_2] : memref<128x128xbf16, #tpu.memory_space<vmem>>, vector<128x128xbf16>
    %cst = arith.constant dense<0.000000e+00> : vector<64x128xf32>
    %2 = tpu.matmul %0, %1, %cst {dimension_numbers = #tpu.dot_dimension_numbers<[1], [0], [0], [1], [0, 0, 1, 1], [], []>} : vector<64x128xbf16>, vector<128x128xbf16>, vector<64x128xf32> -> vector<64x128xf32>
    %c0_3 = arith.constant 0 : index
    %c0_4 = arith.constant 0 : index
    %3 = vector.load %arg5[%c0_3, %c0_4] : memref<1x128xf32, #tpu.memory_space<vmem>>, vector<1x128xf32>
    %4 = vector.broadcast %3 : vector<1x128xf32> to vector<64x128xf32>
    %5 = arith.addf %2, %4 : vector<64x128xf32>
    %c0_5 = arith.constant 0 : index
    %c0_6 = arith.constant 0 : index
    %6 = vector.load %arg6[%c0_5, %c0_6] : memref<64x128xbf16, #tpu.memory_space<vmem>>, vector<64x128xbf16>
    %7 = arith.extf %6 : vector<64x128xbf16> to vector<64x128xf32>
    %8 = arith.addf %5, %7 : vector<64x128xf32>
    %9 = arith.truncf %8 : vector<64x128xf32> to vector<64x128xbf16>
    %c0_7 = arith.constant 0 : index
    %c0_8 = arith.constant 0 : index
    %10 = vector.load %arg7[%c0_7, %c0_8] : memref<64x128xbf16, #tpu.memory_space<vmem>>, vector<64x128xbf16>
    tpu.vector_store %arg7[%c0_7, %c0_8], %9 {strides = array<i32>} : memref<64x128xbf16, #tpu.memory_space<vmem>>, vector<64x128xbf16>,
    return
  }
  func.func @transform_0(%arg0: i32, %arg1: i32, %arg2: i32) -> (i32, i32) {
    %c0_i32 = arith.constant 0 : i32
    return %arg0, %arg2 : i32, i32
  }
  func.func @transform_1(%arg0: i32, %arg1: i32, %arg2: i32) -> (i32, i32) {
    %c0_i32 = arith.constant 0 : i32
    return %arg2, %arg1 : i32, i32
  }
  func.func @transform_2(%arg0: i32, %arg1: i32, %arg2: i32) -> (i32, i32) {
    %c0_i32 = arith.constant 0 : i32
    %c0_i32_0 = arith.constant 0 : i32
    return %c0_i32, %arg1 : i32, i32
  }
  func.func @transform_3(%arg0: i32, %arg1: i32, %arg2: i32) -> (i32, i32) {
    %c0_i32 = arith.constant 0 : i32
    return %arg0, %arg1 : i32, i32
  }
  func.func @transform_4(%arg0: i32, %arg1: i32, %arg2: i32) -> (i32, i32) {
    %c0_i32 = arith.constant 0 : i32
    return %arg0, %arg1 : i32, i32
  }
}

module attributes {stable_mosaic.version = 11 : i64} {
  func.func @kernel(%arg0: i32, %arg1: i32, %arg2: i32, %arg3: memref<64x128xbf16, #tpu.memory_space<vmem>>, %arg4: memref<1x128xf32, #tpu.memory_space<vmem>>, %arg5: memref<1x128xf32, #tpu.memory_space<vmem>>, %arg6: memref<128x128xbf16, #tpu.memory_space<vmem>>, %arg7: memref<1x128xf32, #tpu.memory_space<vmem>>, %arg8: memref<64x128xbf16, #tpu.memory_space<vmem>>) attributes {dimension_semantics = [#tpu.dimension_semantics<parallel>, #tpu.dimension_semantics<parallel>, #tpu.dimension_semantics<arbitrary>], iteration_bounds = array<i64: 1, 1, 1>, scalar_prefetch = 0 : i64, scratch_operands = 0 : i64, tpu.core_type = #tpu.core_type<tc>, window_params = [{transform_indices = @transform_0, window_bounds = array<i64: 64, 128>}, {transform_indices = @transform_1, window_bounds = array<i64: 1, 128>}, {transform_indices = @transform_2, window_bounds = array<i64: 1, 128>}, {transform_indices = @transform_3, window_bounds = array<i64: 128, 128>}, {transform_indices = @transform_4, window_bounds = array<i64: 1, 128>}, {transform_indices = @transform_5, window_bounds = array<i64: 64, 128>}]} {
    %c0 = arith.constant 0 : index
    %c0_0 = arith.constant 0 : index
    %0 = vector.load %arg3[%c0, %c0_0] : memref<64x128xbf16, #tpu.memory_space<vmem>>, vector<64x128xbf16>
    %1 = arith.extf %0 : vector<64x128xbf16> to vector<64x128xf32>
    %cst = arith.constant dense<0.000000e+00> : vector<64xf32>
    %2 = vector.multi_reduction <add>, %1, %cst [1] : vector<64x128xf32> to vector<64xf32>
    %3 = vector.shape_cast %2 : vector<64xf32> to vector<64x1xf32>
    %cst_1 = arith.constant 3.125000e-02 : f32
    %4 = vector.broadcast %cst_1 : f32 to vector<64x1xf32>
    %5 = arith.mulf %3, %4 : vector<64x1xf32>
    %6 = vector.broadcast %5 : vector<64x1xf32> to vector<64x128xf32>
    %7 = arith.subf %1, %6 : vector<64x128xf32>
    %8 = tpu.iota {dimensions = array<i32: 1>} : vector<64x128xi32>
    %c32_i32 = arith.constant 32 : i32
    %9 = vector.broadcast %c32_i32 : i32 to vector<64x128xi32>
    %10 = arith.cmpi slt, %8, %9 : vector<64x128xi32>
    %cst_2 = arith.constant 0.000000e+00 : f32
    %11 = vector.broadcast %cst_2 : f32 to vector<64x128xf32>
    %12 = arith.select %10, %7, %11 : vector<64x128xi1>, vector<64x128xf32>
    %13 = arith.mulf %12, %12 : vector<64x128xf32>
    %cst_3 = arith.constant dense<0.000000e+00> : vector<64xf32>
    %14 = vector.multi_reduction <add>, %13, %cst_3 [1] : vector<64x128xf32> to vector<64xf32>
    %15 = vector.shape_cast %14 : vector<64xf32> to vector<64x1xf32>
    %cst_4 = arith.constant 3.125000e-02 : f32
    %16 = vector.broadcast %cst_4 : f32 to vector<64x1xf32>
    %17 = arith.mulf %15, %16 : vector<64x1xf32>
    %cst_5 = arith.constant 9.99999974E-6 : f32
    %18 = vector.broadcast %cst_5 : f32 to vector<64x1xf32>
    %19 = arith.addf %17, %18 : vector<64x1xf32>
    %20 = math.rsqrt %19 : vector<64x1xf32>
    %21 = vector.broadcast %20 : vector<64x1xf32> to vector<64x128xf32>
    %22 = arith.mulf %12, %21 : vector<64x128xf32>
    %c0_6 = arith.constant 0 : index
    %c0_7 = arith.constant 0 : index
    %23 = vector.load %arg4[%c0_6, %c0_7] : memref<1x128xf32, #tpu.memory_space<vmem>>, vector<1x128xf32>
    %24 = vector.broadcast %23 : vector<1x128xf32> to vector<64x128xf32>
    %25 = arith.mulf %22, %24 : vector<64x128xf32>
    %c0_8 = arith.constant 0 : index
    %c0_9 = arith.constant 0 : index
    %26 = vector.load %arg5[%c0_8, %c0_9] : memref<1x128xf32, #tpu.memory_space<vmem>>, vector<1x128xf32>
    %27 = vector.broadcast %26 : vector<1x128xf32> to vector<64x128xf32>
    %28 = arith.addf %25, %27 : vector<64x128xf32>
    %29 = arith.truncf %28 : vector<64x128xf32> to vector<64x128xbf16>
    %c0_10 = arith.constant 0 : index
    %c0_11 = arith.constant 0 : index
    %30 = vector.load %arg6[%c0_10, %c0_11] : memref<128x128xbf16, #tpu.memory_space<vmem>>, vector<128x128xbf16>
    %cst_12 = arith.constant dense<0.000000e+00> : vector<64x128xf32>
    %31 = tpu.matmul %29, %30, %cst_12 {dimension_numbers = #tpu.dot_dimension_numbers<[1], [0], [0], [1], [0, 0, 1, 1], [], []>} : vector<64x128xbf16>, vector<128x128xbf16>, vector<64x128xf32> -> vector<64x128xf32>
    %c0_13 = arith.constant 0 : index
    %c0_14 = arith.constant 0 : index
    %32 = vector.load %arg7[%c0_13, %c0_14] : memref<1x128xf32, #tpu.memory_space<vmem>>, vector<1x128xf32>
    %33 = vector.broadcast %32 : vector<1x128xf32> to vector<64x128xf32>
    %34 = arith.addf %31, %33 : vector<64x128xf32>
    %cst_15 = arith.constant 1.702000e+00 : f32
    %35 = vector.broadcast %cst_15 : f32 to vector<64x128xf32>
    %36 = arith.mulf %35, %34 : vector<64x128xf32>
    %37 = arith.negf %36 : vector<64x128xf32>
    %38 = math.exp %37 : vector<64x128xf32>
    %cst_16 = arith.constant 1.000000e+00 : f32
    %39 = vector.broadcast %cst_16 : f32 to vector<64x128xf32>
    %40 = arith.addf %39, %38 : vector<64x128xf32>
    %41 = arith.divf %39, %40 : vector<64x128xf32>
    %42 = arith.mulf %34, %41 : vector<64x128xf32>
    %43 = arith.truncf %42 : vector<64x128xf32> to vector<64x128xbf16>
    %c0_17 = arith.constant 0 : index
    %c0_18 = arith.constant 0 : index
    %44 = vector.load %arg8[%c0_17, %c0_18] : memref<64x128xbf16, #tpu.memory_space<vmem>>, vector<64x128xbf16>
    tpu.vector_store %arg8[%c0_17, %c0_18], %43 {strides = array<i32>} : memref<64x128xbf16, #tpu.memory_space<vmem>>, vector<64x128xbf16>,
    return
  }
  func.func @transform_0(%arg0: i32, %arg1: i32, %arg2: i32) -> (i32, i32) {
    %c0_i32 = arith.constant 0 : i32
    return %arg0, %arg2 : i32, i32
  }
  func.func @transform_1(%arg0: i32, %arg1: i32, %arg2: i32) -> (i32, i32) {
    %c0_i32 = arith.constant 0 : i32
    %c0_i32_0 = arith.constant 0 : i32
    return %c0_i32, %arg2 : i32, i32
  }
  func.func @transform_2(%arg0: i32, %arg1: i32, %arg2: i32) -> (i32, i32) {
    %c0_i32 = arith.constant 0 : i32
    %c0_i32_0 = arith.constant 0 : i32
    return %c0_i32, %arg2 : i32, i32
  }
  func.func @transform_3(%arg0: i32, %arg1: i32, %arg2: i32) -> (i32, i32) {
    %c0_i32 = arith.constant 0 : i32
    return %arg2, %arg1 : i32, i32
  }
  func.func @transform_4(%arg0: i32, %arg1: i32, %arg2: i32) -> (i32, i32) {
    %c0_i32 = arith.constant 0 : i32
    %c0_i32_0 = arith.constant 0 : i32
    return %c0_i32, %arg1 : i32, i32
  }
  func.func @transform_5(%arg0: i32, %arg1: i32, %arg2: i32) -> (i32, i32) {
    %c0_i32 = arith.constant 0 : i32
    return %arg0, %arg1 : i32, i32
  }
}

module attributes {stable_mosaic.version = 11 : i64} {
  func.func @kernel(%arg0: i32, %arg1: i32, %arg2: i32, %arg3: memref<8x128xbf16, #tpu.memory_space<vmem>>, %arg4: memref<1x128xf32, #tpu.memory_space<vmem>>, %arg5: memref<1x128xf32, #tpu.memory_space<vmem>>, %arg6: memref<128x128xbf16, #tpu.memory_space<vmem>>, %arg7: memref<8x128xf32, #tpu.memory_space<vmem>>) attributes {dimension_semantics = [#tpu.dimension_semantics<parallel>, #tpu.dimension_semantics<parallel>, #tpu.dimension_semantics<arbitrary>], iteration_bounds = array<i64: 1, 1, 1>, scalar_prefetch = 0 : i64, scratch_operands = 0 : i64, tpu.core_type = #tpu.core_type<tc>, window_params = [{transform_indices = @transform_0, window_bounds = array<i64: 8, 128>}, {transform_indices = @transform_1, window_bounds = array<i64: 1, 128>}, {transform_indices = @transform_2, window_bounds = array<i64: 1, 128>}, {transform_indices = @transform_3, window_bounds = array<i64: 128, 128>}, {transform_indices = @transform_4, window_bounds = array<i64: 8, 128>}]} {
    %c0 = arith.constant 0 : index
    %c0_0 = arith.constant 0 : index
    %0 = vector.load %arg3[%c0, %c0_0] : memref<8x128xbf16, #tpu.memory_space<vmem>>, vector<8x128xbf16>
    %1 = arith.extf %0 : vector<8x128xbf16> to vector<8x128xf32>
    %cst = arith.constant dense<0.000000e+00> : vector<8xf32>
    %2 = vector.multi_reduction <add>, %1, %cst [1] : vector<8x128xf32> to vector<8xf32>
    %3 = vector.shape_cast %2 : vector<8xf32> to vector<8x1xf32>
    %cst_1 = arith.constant 3.125000e-02 : f32
    %4 = vector.broadcast %cst_1 : f32 to vector<8x1xf32>
    %5 = arith.mulf %3, %4 : vector<8x1xf32>
    %6 = vector.broadcast %5 : vector<8x1xf32> to vector<8x128xf32>
    %7 = arith.subf %1, %6 : vector<8x128xf32>
    %8 = tpu.iota {dimensions = array<i32: 1>} : vector<8x128xi32>
    %c32_i32 = arith.constant 32 : i32
    %9 = vector.broadcast %c32_i32 : i32 to vector<8x128xi32>
    %10 = arith.cmpi slt, %8, %9 : vector<8x128xi32>
    %cst_2 = arith.constant 0.000000e+00 : f32
    %11 = vector.broadcast %cst_2 : f32 to vector<8x128xf32>
    %12 = arith.select %10, %7, %11 : vector<8x128xi1>, vector<8x128xf32>
    %13 = arith.mulf %12, %12 : vector<8x128xf32>
    %cst_3 = arith.constant dense<0.000000e+00> : vector<8xf32>
    %14 = vector.multi_reduction <add>, %13, %cst_3 [1] : vector<8x128xf32> to vector<8xf32>
    %15 = vector.shape_cast %14 : vector<8xf32> to vector<8x1xf32>
    %cst_4 = arith.constant 3.125000e-02 : f32
    %16 = vector.broadcast %cst_4 : f32 to vector<8x1xf32>
    %17 = arith.mulf %15, %16 : vector<8x1xf32>
    %cst_5 = arith.constant 9.99999974E-6 : f32
    %18 = vector.broadcast %cst_5 : f32 to vector<8x1xf32>
    %19 = arith.addf %17, %18 : vector<8x1xf32>
    %20 = math.rsqrt %19 : vector<8x1xf32>
    %21 = vector.broadcast %20 : vector<8x1xf32> to vector<8x128xf32>
    %22 = arith.mulf %12, %21 : vector<8x128xf32>
    %c0_6 = arith.constant 0 : index
    %c0_7 = arith.constant 0 : index
    %23 = vector.load %arg4[%c0_6, %c0_7] : memref<1x128xf32, #tpu.memory_space<vmem>>, vector<1x128xf32>
    %24 = vector.broadcast %23 : vector<1x128xf32> to vector<8x128xf32>
    %25 = arith.mulf %22, %24 : vector<8x128xf32>
    %c0_8 = arith.constant 0 : index
    %c0_9 = arith.constant 0 : index
    %26 = vector.load %arg5[%c0_8, %c0_9] : memref<1x128xf32, #tpu.memory_space<vmem>>, vector<1x128xf32>
    %27 = vector.broadcast %26 : vector<1x128xf32> to vector<8x128xf32>
    %28 = arith.addf %25, %27 : vector<8x128xf32>
    %29 = arith.truncf %28 : vector<8x128xf32> to vector<8x128xbf16>
    %c0_10 = arith.constant 0 : index
    %c0_11 = arith.constant 0 : index
    %30 = vector.load %arg6[%c0_10, %c0_11] : memref<128x128xbf16, #tpu.memory_space<vmem>>, vector<128x128xbf16>
    %cst_12 = arith.constant dense<0.000000e+00> : vector<8x128xf32>
    %31 = tpu.matmul %29, %30, %cst_12 {dimension_numbers = #tpu.dot_dimension_numbers<[1], [0], [0], [1], [0, 0, 1, 1], [], []>} : vector<8x128xbf16>, vector<128x128xbf16>, vector<8x128xf32> -> vector<8x128xf32>
    %c0_13 = arith.constant 0 : index
    %c0_14 = arith.constant 0 : index
    %32 = vector.load %arg7[%c0_13, %c0_14] : memref<8x128xf32, #tpu.memory_space<vmem>>, vector<8x128xf32>
    tpu.vector_store %arg7[%c0_13, %c0_14], %31 {strides = array<i32>} : memref<8x128xf32, #tpu.memory_space<vmem>>, vector<8x128xf32>,
    return
  }
  func.func @transform_0(%arg0: i32, %arg1: i32, %arg2: i32) -> (i32, i32) {
    %c0_i32 = arith.constant 0 : i32
    return %arg0, %arg2 : i32, i32
  }
  func.func @transform_1(%arg0: i32, %arg1: i32, %arg2: i32) -> (i32, i32) {
    %c0_i32 = arith.constant 0 : i32
    %c0_i32_0 = arith.constant 0 : i32
    return %c0_i32, %arg2 : i32, i32
  }
  func.func @transform_2(%arg0: i32, %arg1: i32, %arg2: i32) -> (i32, i32) {
    %c0_i32 = arith.constant 0 : i32
    %c0_i32_0 = arith.constant 0 : i32
    return %c0_i32, %arg2 : i32, i32
  }
  func.func @transform_3(%arg0: i32, %arg1: i32, %arg2: i32) -> (i32, i32) {
    %c0_i32 = arith.constant 0 : i32
    return %arg2, %arg1 : i32, i32
  }
  func.func @transform_4(%arg0: i32, %arg1: i32, %arg2: i32) -> (i32, i32) {
    %c0_i32 = arith.constant 0 : i32
    return %arg0, %arg1 : i32, i32
  }
}

module attributes {stable_mosaic.version = 11 : i64} {
  func.func @kernel(%arg0: i32, %arg1: i32, %arg2: i32, %arg3: memref<8x256xbf16, #tpu.memory_space<vmem>>, %arg4: memref<256x128xbf16, #tpu.memory_space<vmem>>, %arg5: memref<8x128xbf16, #tpu.memory_space<vmem>>) attributes {dimension_semantics = [#tpu.dimension_semantics<parallel>, #tpu.dimension_semantics<parallel>, #tpu.dimension_semantics<arbitrary>], iteration_bounds = array<i64: 1, 1, 1>, scalar_prefetch = 0 : i64, scratch_operands = 0 : i64, tpu.core_type = #tpu.core_type<tc>, window_params = [{transform_indices = @transform_0, window_bounds = array<i64: 8, 256>}, {transform_indices = @transform_1, window_bounds = array<i64: 256, 128>}, {transform_indices = @transform_2, window_bounds = array<i64: 8, 128>}]} {
    %c0 = arith.constant 0 : index
    %c0_0 = arith.constant 0 : index
    %0 = vector.load %arg3[%c0, %c0_0] : memref<8x256xbf16, #tpu.memory_space<vmem>>, vector<8x256xbf16>
    %c0_1 = arith.constant 0 : index
    %c0_2 = arith.constant 0 : index
    %1 = vector.load %arg4[%c0_1, %c0_2] : memref<256x128xbf16, #tpu.memory_space<vmem>>, vector<256x128xbf16>
    %cst = arith.constant dense<0.000000e+00> : vector<8x128xf32>
    %2 = tpu.matmul %0, %1, %cst {dimension_numbers = #tpu.dot_dimension_numbers<[1], [0], [0], [1], [0, 0, 1, 1], [], []>} : vector<8x256xbf16>, vector<256x128xbf16>, vector<8x128xf32> -> vector<8x128xf32>
    %3 = arith.truncf %2 : vector<8x128xf32> to vector<8x128xbf16>
    %c0_3 = arith.constant 0 : index
    %c0_4 = arith.constant 0 : index
    %4 = vector.load %arg5[%c0_3, %c0_4] : memref<8x128xbf16, #tpu.memory_space<vmem>>, vector<8x128xbf16>
    tpu.vector_store %arg5[%c0_3, %c0_4], %3 {strides = array<i32>} : memref<8x128xbf16, #tpu.memory_space<vmem>>, vector<8x128xbf16>,
    return
  }
  func.func @transform_0(%arg0: i32, %arg1: i32, %arg2: i32) -> (i32, i32) {
    %c0_i32 = arith.constant 0 : i32
    return %arg0, %arg2 : i32, i32
  }
  func.func @transform_1(%arg0: i32, %arg1: i32, %arg2: i32) -> (i32, i32) {
    %c0_i32 = arith.constant 0 : i32
    return %arg2, %arg1 : i32, i32
  }
  func.func @transform_2(%arg0: i32, %arg1: i32, %arg2: i32) -> (i32, i32) {
    %c0_i32 = arith.constant 0 : i32
    return %arg0, %arg1 : i32, i32
  }
}

module attributes {stable_mosaic.version = 11 : i64} {
  func.func @kernel(%arg0: i32, %arg1: memref<16x128xbf16, #tpu.memory_space<vmem>>, %arg2: memref<1x128xf32, #tpu.memory_space<vmem>>, %arg3: memref<1x128xf32, #tpu.memory_space<vmem>>, %arg4: memref<16x128xbf16, #tpu.memory_space<vmem>>) attributes {dimension_semantics = [#tpu.dimension_semantics<parallel>], iteration_bounds = array<i64: 1>, scalar_prefetch = 0 : i64, scratch_operands = 0 : i64, tpu.core_type = #tpu.core_type<tc>, window_params = [{transform_indices = @transform_0, window_bounds = array<i64: 16, 128>}, {pipeline_mode = #tpu.pipeline_mode<synchronous>, transform_indices = @transform_1, window_bounds = array<i64: 1, 128>}, {pipeline_mode = #tpu.pipeline_mode<synchronous>, transform_indices = @transform_2, window_bounds = array<i64: 1, 128>}, {transform_indices = @transform_3, window_bounds = array<i64: 16, 128>}]} {
    %c0 = arith.constant 0 : index
    %c0_0 = arith.constant 0 : index
    %0 = vector.load %arg1[%c0, %c0_0] : memref<16x128xbf16, #tpu.memory_space<vmem>>, vector<16x128xbf16>
    %1 = arith.extf %0 : vector<16x128xbf16> to vector<16x128xf32>
    %cst = arith.constant dense<0.000000e+00> : vector<16xf32>
    %2 = vector.multi_reduction <add>, %1, %cst [1] : vector<16x128xf32> to vector<16xf32>
    %3 = vector.shape_cast %2 : vector<16xf32> to vector<16x1xf32>
    %cst_1 = arith.constant 3.125000e-02 : f32
    %4 = vector.broadcast %cst_1 : f32 to vector<16x1xf32>
    %5 = arith.mulf %3, %4 : vector<16x1xf32>
    %6 = vector.broadcast %5 : vector<16x1xf32> to vector<16x128xf32>
    %7 = arith.subf %1, %6 : vector<16x128xf32>
    %8 = tpu.iota {dimensions = array<i32: 1>} : vector<16x128xi32>
    %c32_i32 = arith.constant 32 : i32
    %9 = vector.broadcast %c32_i32 : i32 to vector<16x128xi32>
    %10 = arith.cmpi slt, %8, %9 : vector<16x128xi32>
    %cst_2 = arith.constant 0.000000e+00 : f32
    %11 = vector.broadcast %cst_2 : f32 to vector<16x128xf32>
    %12 = arith.select %10, %7, %11 : vector<16x128xi1>, vector<16x128xf32>
    %13 = arith.mulf %12, %12 : vector<16x128xf32>
    %cst_3 = arith.constant dense<0.000000e+00> : vector<16xf32>
    %14 = vector.multi_reduction <add>, %13, %cst_3 [1] : vector<16x128xf32> to vector<16xf32>
    %15 = vector.shape_cast %14 : vector<16xf32> to vector<16x1xf32>
    %cst_4 = arith.constant 3.125000e-02 : f32
    %16 = vector.broadcast %cst_4 : f32 to vector<16x1xf32>
    %17 = arith.mulf %15, %16 : vector<16x1xf32>
    %cst_5 = arith.constant 9.99999974E-6 : f32
    %18 = vector.broadcast %cst_5 : f32 to vector<16x1xf32>
    %19 = arith.addf %17, %18 : vector<16x1xf32>
    %20 = math.rsqrt %19 : vector<16x1xf32>
    %21 = vector.broadcast %20 : vector<16x1xf32> to vector<16x128xf32>
    %22 = arith.mulf %12, %21 : vector<16x128xf32>
    %c0_6 = arith.constant 0 : index
    %c0_7 = arith.constant 0 : index
    %23 = vector.load %arg2[%c0_6, %c0_7] : memref<1x128xf32, #tpu.memory_space<vmem>>, vector<1x128xf32>
    %24 = vector.broadcast %23 : vector<1x128xf32> to vector<16x128xf32>
    %25 = arith.mulf %22, %24 : vector<16x128xf32>
    %c0_8 = arith.constant 0 : index
    %c0_9 = arith.constant 0 : index
    %26 = vector.load %arg3[%c0_8, %c0_9] : memref<1x128xf32, #tpu.memory_space<vmem>>, vector<1x128xf32>
    %27 = vector.broadcast %26 : vector<1x128xf32> to vector<16x128xf32>
    %28 = arith.addf %25, %27 : vector<16x128xf32>
    %29 = arith.truncf %28 : vector<16x128xf32> to vector<16x128xbf16>
    %c0_10 = arith.constant 0 : index
    %c0_11 = arith.constant 0 : index
    %30 = vector.load %arg4[%c0_10, %c0_11] : memref<16x128xbf16, #tpu.memory_space<vmem>>, vector<16x128xbf16>
    tpu.vector_store %arg4[%c0_10, %c0_11], %29 {strides = array<i32>} : memref<16x128xbf16, #tpu.memory_space<vmem>>, vector<16x128xbf16>,
    return
  }
  func.func @transform_0(%arg0: i32) -> (i32, i32) {
    %c0_i32 = arith.constant 0 : i32
    %c0_i32_0 = arith.constant 0 : i32
    return %arg0, %c0_i32 : i32, i32
  }
  func.func @transform_1(%arg0: i32) -> (i32, i32) {
    %c0_i32 = arith.constant 0 : i32
    %c0_i32_0 = arith.constant 0 : i32
    %c0_i32_1 = arith.constant 0 : i32
    return %c0_i32, %c0_i32_0 : i32, i32
  }
  func.func @transform_2(%arg0: i32) -> (i32, i32) {
    %c0_i32 = arith.constant 0 : i32
    %c0_i32_0 = arith.constant 0 : i32
    %c0_i32_1 = arith.constant 0 : i32
    return %c0_i32, %c0_i32_0 : i32, i32
  }
  func.func @transform_3(%arg0: i32) -> (i32, i32) {
    %c0_i32 = arith.constant 0 : i32
    %c0_i32_0 = arith.constant 0 : i32
    return %arg0, %c0_i32 : i32, i32
  }
}

module attributes {stable_mosaic.version = 11 : i64} {
  func.func @kernel(%arg0: i32, %arg1: i32, %arg2: i32, %arg3: memref<16x128xbf16, #tpu.memory_space<vmem>>, %arg4: memref<1x128xf32, #tpu.memory_space<vmem>>, %arg5: memref<1x128xf32, #tpu.memory_space<vmem>>, %arg6: memref<128x128xbf16, #tpu.memory_space<vmem>>, %arg7: memref<1x128xf32, #tpu.memory_space<vmem>>, %arg8: memref<16x128xbf16, #tpu.memory_space<vmem>>) attributes {dimension_semantics = [#tpu.dimension_semantics<parallel>, #tpu.dimension_semantics<parallel>, #tpu.dimension_semantics<arbitrary>], iteration_bounds = array<i64: 1, 1, 1>, scalar_prefetch = 0 : i64, scratch_operands = 0 : i64, tpu.core_type = #tpu.core_type<tc>, window_params = [{transform_indices = @transform_0, window_bounds = array<i64: 16, 128>}, {transform_indices = @transform_1, window_bounds = array<i64: 1, 128>}, {transform_indices = @transform_2, window_bounds = array<i64: 1, 128>}, {transform_indices = @transform_3, window_bounds = array<i64: 128, 128>}, {transform_indices = @transform_4, window_bounds = array<i64: 1, 128>}, {transform_indices = @transform_5, window_bounds = array<i64: 16, 128>}]} {
    %c0 = arith.constant 0 : index
    %c0_0 = arith.constant 0 : index
    %0 = vector.load %arg3[%c0, %c0_0] : memref<16x128xbf16, #tpu.memory_space<vmem>>, vector<16x128xbf16>
    %1 = arith.extf %0 : vector<16x128xbf16> to vector<16x128xf32>
    %cst = arith.constant dense<0.000000e+00> : vector<16xf32>
    %2 = vector.multi_reduction <add>, %1, %cst [1] : vector<16x128xf32> to vector<16xf32>
    %3 = vector.shape_cast %2 : vector<16xf32> to vector<16x1xf32>
    %cst_1 = arith.constant 3.125000e-02 : f32
    %4 = vector.broadcast %cst_1 : f32 to vector<16x1xf32>
    %5 = arith.mulf %3, %4 : vector<16x1xf32>
    %6 = vector.broadcast %5 : vector<16x1xf32> to vector<16x128xf32>
    %7 = arith.subf %1, %6 : vector<16x128xf32>
    %8 = tpu.iota {dimensions = array<i32: 1>} : vector<16x128xi32>
    %c32_i32 = arith.constant 32 : i32
    %9 = vector.broadcast %c32_i32 : i32 to vector<16x128xi32>
    %10 = arith.cmpi slt, %8, %9 : vector<16x128xi32>
    %cst_2 = arith.constant 0.000000e+00 : f32
    %11 = vector.broadcast %cst_2 : f32 to vector<16x128xf32>
    %12 = arith.select %10, %7, %11 : vector<16x128xi1>, vector<16x128xf32>
    %13 = arith.mulf %12, %12 : vector<16x128xf32>
    %cst_3 = arith.constant dense<0.000000e+00> : vector<16xf32>
    %14 = vector.multi_reduction <add>, %13, %cst_3 [1] : vector<16x128xf32> to vector<16xf32>
    %15 = vector.shape_cast %14 : vector<16xf32> to vector<16x1xf32>
    %cst_4 = arith.constant 3.125000e-02 : f32
    %16 = vector.broadcast %cst_4 : f32 to vector<16x1xf32>
    %17 = arith.mulf %15, %16 : vector<16x1xf32>
    %cst_5 = arith.constant 9.99999974E-6 : f32
    %18 = vector.broadcast %cst_5 : f32 to vector<16x1xf32>
    %19 = arith.addf %17, %18 : vector<16x1xf32>
    %20 = math.rsqrt %19 : vector<16x1xf32>
    %21 = vector.broadcast %20 : vector<16x1xf32> to vector<16x128xf32>
    %22 = arith.mulf %12, %21 : vector<16x128xf32>
    %c0_6 = arith.constant 0 : index
    %c0_7 = arith.constant 0 : index
    %23 = vector.load %arg4[%c0_6, %c0_7] : memref<1x128xf32, #tpu.memory_space<vmem>>, vector<1x128xf32>
    %24 = vector.broadcast %23 : vector<1x128xf32> to vector<16x128xf32>
    %25 = arith.mulf %22, %24 : vector<16x128xf32>
    %c0_8 = arith.constant 0 : index
    %c0_9 = arith.constant 0 : index
    %26 = vector.load %arg5[%c0_8, %c0_9] : memref<1x128xf32, #tpu.memory_space<vmem>>, vector<1x128xf32>
    %27 = vector.broadcast %26 : vector<1x128xf32> to vector<16x128xf32>
    %28 = arith.addf %25, %27 : vector<16x128xf32>
    %29 = arith.truncf %28 : vector<16x128xf32> to vector<16x128xbf16>
    %c0_10 = arith.constant 0 : index
    %c0_11 = arith.constant 0 : index
    %30 = vector.load %arg6[%c0_10, %c0_11] : memref<128x128xbf16, #tpu.memory_space<vmem>>, vector<128x128xbf16>
    %cst_12 = arith.constant dense<0.000000e+00> : vector<16x128xf32>
    %31 = tpu.matmul %29, %30, %cst_12 {dimension_numbers = #tpu.dot_dimension_numbers<[1], [0], [0], [1], [0, 0, 1, 1], [], []>} : vector<16x128xbf16>, vector<128x128xbf16>, vector<16x128xf32> -> vector<16x128xf32>
    %c0_13 = arith.constant 0 : index
    %c0_14 = arith.constant 0 : index
    %32 = vector.load %arg7[%c0_13, %c0_14] : memref<1x128xf32, #tpu.memory_space<vmem>>, vector<1x128xf32>
    %33 = vector.broadcast %32 : vector<1x128xf32> to vector<16x128xf32>
    %34 = arith.addf %31, %33 : vector<16x128xf32>
    %35 = arith.truncf %34 : vector<16x128xf32> to vector<16x128xbf16>
    %c0_15 = arith.constant 0 : index
    %c0_16 = arith.constant 0 : index
    %36 = vector.load %arg8[%c0_15, %c0_16] : memref<16x128xbf16, #tpu.memory_space<vmem>>, vector<16x128xbf16>
    tpu.vector_store %arg8[%c0_15, %c0_16], %35 {strides = array<i32>} : memref<16x128xbf16, #tpu.memory_space<vmem>>, vector<16x128xbf16>,
    return
  }
  func.func @transform_0(%arg0: i32, %arg1: i32, %arg2: i32) -> (i32, i32) {
    %c0_i32 = arith.constant 0 : i32
    return %arg0, %arg2 : i32, i32
  }
  func.func @transform_1(%arg0: i32, %arg1: i32, %arg2: i32) -> (i32, i32) {
    %c0_i32 = arith.constant 0 : i32
    %c0_i32_0 = arith.constant 0 : i32
    return %c0_i32, %arg2 : i32, i32
  }
  func.func @transform_2(%arg0: i32, %arg1: i32, %arg2: i32) -> (i32, i32) {
    %c0_i32 = arith.constant 0 : i32
    %c0_i32_0 = arith.constant 0 : i32
    return %c0_i32, %arg2 : i32, i32
  }
  func.func @transform_3(%arg0: i32, %arg1: i32, %arg2: i32) -> (i32, i32) {
    %c0_i32 = arith.constant 0 : i32
    return %arg2, %arg1 : i32, i32
  }
  func.func @transform_4(%arg0: i32, %arg1: i32, %arg2: i32) -> (i32, i32) {
    %c0_i32 = arith.constant 0 : i32
    %c0_i32_0 = arith.constant 0 : i32
    return %c0_i32, %arg1 : i32, i32
  }
  func.func @transform_5(%arg0: i32, %arg1: i32, %arg2: i32) -> (i32, i32) {
    %c0_i32 = arith.constant 0 : i32
    return %arg0, %arg1 : i32, i32
  }
}

module attributes {stable_mosaic.version = 11 : i64} {
  func.func @kernel(%arg0: i32, %arg1: memref<1x3x5x8xbf16, #tpu.memory_space<vmem>>, %arg2: memref<1x5x8xbf16, #tpu.memory_space<vmem>>) attributes {dimension_semantics = [#tpu.dimension_semantics<parallel>], iteration_bounds = array<i64: 8>, scalar_prefetch = 0 : i64, scratch_operands = 0 : i64, tpu.core_type = #tpu.core_type<tc>, window_params = [{transform_indices = @transform_0, window_bounds = array<i64: 1, 3, 5, 8>}, {transform_indices = @transform_1, window_bounds = array<i64: 1, 5, 8>}]} {
    %c0 = arith.constant 0 : index
    %c0_0 = arith.constant 0 : index
    %c0_1 = arith.constant 0 : index
    %c0_2 = arith.constant 0 : index
    %0 = vector.load %arg1[%c0, %c0_0, %c0_1, %c0_2] : memref<1x3x5x8xbf16, #tpu.memory_space<vmem>>, vector<1x1x5x8xbf16>
    %1 = vector.shape_cast %0 : vector<1x1x5x8xbf16> to vector<5x8xbf16>
    %c0_3 = arith.constant 0 : index
    %c1 = arith.constant 1 : index
    %c0_4 = arith.constant 0 : index
    %c0_5 = arith.constant 0 : index
    %2 = vector.load %arg1[%c0_3, %c1, %c0_4, %c0_5] : memref<1x3x5x8xbf16, #tpu.memory_space<vmem>>, vector<1x1x5x8xbf16>
    %3 = vector.shape_cast %2 : vector<1x1x5x8xbf16> to vector<5x8xbf16>
    %c0_6 = arith.constant 0 : index
    %c2 = arith.constant 2 : index
    %c0_7 = arith.constant 0 : index
    %c0_8 = arith.constant 0 : index
    %4 = vector.load %arg1[%c0_6, %c2, %c0_7, %c0_8] : memref<1x3x5x8xbf16, #tpu.memory_space<vmem>>, vector<1x1x5x8xbf16>
    %5 = vector.shape_cast %4 : vector<1x1x5x8xbf16> to vector<5x8xbf16>
    %cst = arith.constant dense<0.000000e+00> : vector<5x5xf32>
    %6 = tpu.matmul %1, %3, %cst {dimension_numbers = #tpu.dot_dimension_numbers<[1], [1], [0], [0], [0, 0, 1, 0], [], []>} : vector<5x8xbf16>, vector<5x8xbf16>, vector<5x5xf32> -> vector<5x5xf32>
    %cst_9 = arith.constant 0.353553385 : f32
    %7 = vector.broadcast %cst_9 : f32 to vector<5x5xf32>
    %8 = arith.mulf %6, %7 : vector<5x5xf32>
    %cst_10 = arith.constant dense<0xFF800000> : vector<5xf32>
    %9 = vector.multi_reduction <maximumf>, %8, %cst_10 [1] : vector<5x5xf32> to vector<5xf32>
    %10 = vector.shape_cast %9 : vector<5xf32> to vector<5x1xf32>
    %11 = vector.broadcast %10 : vector<5x1xf32> to vector<5x5xf32>
    %12 = arith.subf %8, %11 : vector<5x5xf32>
    %13 = math.exp %12 : vector<5x5xf32>
    %cst_11 = arith.constant dense<0.000000e+00> : vector<5xf32>
    %14 = vector.multi_reduction <add>, %13, %cst_11 [1] : vector<5x5xf32> to vector<5xf32>
    %15 = vector.shape_cast %14 : vector<5xf32> to vector<5x1xf32>
    %16 = tpu.reciprocal %15 {approx = true} : vector<5x1xf32> -> vector<5x1xf32>
    %17 = vector.broadcast %16 : vector<5x1xf32> to vector<5x5xf32>
    %18 = arith.mulf %13, %17 : vector<5x5xf32>
    %19 = arith.truncf %18 : vector<5x5xf32> to vector<5x5xbf16>
    %cst_12 = arith.constant dense<0.000000e+00> : vector<5x8xf32>
    %20 = tpu.matmul %19, %5, %cst_12 {dimension_numbers = #tpu.dot_dimension_numbers<[1], [0], [0], [1], [0, 0, 1, 1], [], []>} : vector<5x5xbf16>, vector<5x8xbf16>, vector<5x8xf32> -> vector<5x8xf32>
    %21 = vector.shape_cast %20 : vector<5x8xf32> to vector<1x5x8xf32>
    %22 = arith.truncf %21 : vector<1x5x8xf32> to vector<1x5x8xbf16>
    %c0_13 = arith.constant 0 : index
    %c0_14 = arith.constant 0 : index
    %c0_15 = arith.constant 0 : index
    %23 = vector.load %arg2[%c0_13, %c0_14, %c0_15] : memref<1x5x8xbf16, #tpu.memory_space<vmem>>, vector<1x5x8xbf16>
    tpu.vector_store %arg2[%c0_13, %c0_14, %c0_15], %22 {strides = array<i32>} : memref<1x5x8xbf16, #tpu.memory_space<vmem>>, vector<1x5x8xbf16>,
    return
  }
  func.func @transform_0(%arg0: i32) -> (i32, i32, i32, i32) {
    %c0_i32 = arith.constant 0 : i32
    %c0_i32_0 = arith.constant 0 : i32
    %c0_i32_1 = arith.constant 0 : i32
    %c0_i32_2 = arith.constant 0 : i32
    return %arg0, %c0_i32, %c0_i32_0, %c0_i32_1 : i32, i32, i32, i32
  }
  func.func @transform_1(%arg0: i32) -> (i32, i32, i32) {
    %c0_i32 = arith.constant 0 : i32
    %c0_i32_0 = arith.constant 0 : i32
    %c0_i32_1 = arith.constant 0 : i32
    return %arg0, %c0_i32, %c0_i32_0 : i32, i32, i32
  }
}

module attributes {stable_mosaic.version = 11 : i64} {
  func.func @kernel(%arg0: i32, %arg1: i32, %arg2: i32, %arg3: memref<16x128xbf16, #tpu.memory_space<vmem>>, %arg4: memref<128x128xbf16, #tpu.memory_space<vmem>>, %arg5: memref<1x128xf32, #tpu.memory_space<vmem>>, %arg6: memref<16x128xbf16, #tpu.memory_space<vmem>>, %arg7: memref<16x128xbf16, #tpu.memory_space<vmem>>) attributes {dimension_semantics = [#tpu.dimension_semantics<parallel>, #tpu.dimension_semantics<parallel>, #tpu.dimension_semantics<arbitrary>], iteration_bounds = array<i64: 1, 1, 1>, scalar_prefetch = 0 : i64, scratch_operands = 0 : i64, tpu.core_type = #tpu.core_type<tc>, window_params = [{transform_indices = @transform_0, window_bounds = array<i64: 16, 128>}, {transform_indices = @transform_1, window_bounds = array<i64: 128, 128>}, {transform_indices = @transform_2, window_bounds = array<i64: 1, 128>}, {transform_indices = @transform_3, window_bounds = array<i64: 16, 128>}, {transform_indices = @transform_4, window_bounds = array<i64: 16, 128>}]} {
    %c0 = arith.constant 0 : index
    %c0_0 = arith.constant 0 : index
    %0 = vector.load %arg3[%c0, %c0_0] : memref<16x128xbf16, #tpu.memory_space<vmem>>, vector<16x128xbf16>
    %c0_1 = arith.constant 0 : index
    %c0_2 = arith.constant 0 : index
    %1 = vector.load %arg4[%c0_1, %c0_2] : memref<128x128xbf16, #tpu.memory_space<vmem>>, vector<128x128xbf16>
    %cst = arith.constant dense<0.000000e+00> : vector<16x128xf32>
    %2 = tpu.matmul %0, %1, %cst {dimension_numbers = #tpu.dot_dimension_numbers<[1], [0], [0], [1], [0, 0, 1, 1], [], []>} : vector<16x128xbf16>, vector<128x128xbf16>, vector<16x128xf32> -> vector<16x128xf32>
    %c0_3 = arith.constant 0 : index
    %c0_4 = arith.constant 0 : index
    %3 = vector.load %arg5[%c0_3, %c0_4] : memref<1x128xf32, #tpu.memory_space<vmem>>, vector<1x128xf32>
    %4 = vector.broadcast %3 : vector<1x128xf32> to vector<16x128xf32>
    %5 = arith.addf %2, %4 : vector<16x128xf32>
    %c0_5 = arith.constant 0 : index
    %c0_6 = arith.constant 0 : index
    %6 = vector.load %arg6[%c0_5, %c0_6] : memref<16x128xbf16, #tpu.memory_space<vmem>>, vector<16x128xbf16>
    %7 = arith.extf %6 : vector<16x128xbf16> to vector<16x128xf32>
    %8 = arith.addf %5, %7 : vector<16x128xf32>
    %9 = arith.truncf %8 : vector<16x128xf32> to vector<16x128xbf16>
    %c0_7 = arith.constant 0 : index
    %c0_8 = arith.constant 0 : index
    %10 = vector.load %arg7[%c0_7, %c0_8] : memref<16x128xbf16, #tpu.memory_space<vmem>>, vector<16x128xbf16>
    tpu.vector_store %arg7[%c0_7, %c0_8], %9 {strides = array<i32>} : memref<16x128xbf16, #tpu.memory_space<vmem>>, vector<16x128xbf16>,
    return
  }
  func.func @transform_0(%arg0: i32, %arg1: i32, %arg2: i32) -> (i32, i32) {
    %c0_i32 = arith.constant 0 : i32
    return %arg0, %arg2 : i32, i32
  }
  func.func @transform_1(%arg0: i32, %arg1: i32, %arg2: i32) -> (i32, i32) {
    %c0_i32 = arith.constant 0 : i32
    return %arg2, %arg1 : i32, i32
  }
  func.func @transform_2(%arg0: i32, %arg1: i32, %arg2: i32) -> (i32, i32) {
    %c0_i32 = arith.constant 0 : i32
    %c0_i32_0 = arith.constant 0 : i32
    return %c0_i32, %arg1 : i32, i32
  }
  func.func @transform_3(%arg0: i32, %arg1: i32, %arg2: i32) -> (i32, i32) {
    %c0_i32 = arith.constant 0 : i32
    return %arg0, %arg1 : i32, i32
  }
  func.func @transform_4(%arg0: i32, %arg1: i32, %arg2: i32) -> (i32, i32) {
    %c0_i32 = arith.constant 0 : i32
    return %arg0, %arg1 : i32, i32
  }
}

module attributes {stable_mosaic.version = 11 : i64} {
  func.func @kernel(%arg0: i32, %arg1: i32, %arg2: i32, %arg3: memref<16x128xbf16, #tpu.memory_space<vmem>>, %arg4: memref<1x128xf32, #tpu.memory_space<vmem>>, %arg5: memref<1x128xf32, #tpu.memory_space<vmem>>, %arg6: memref<128x128xbf16, #tpu.memory_space<vmem>>, %arg7: memref<1x128xf32, #tpu.memory_space<vmem>>, %arg8: memref<16x128xbf16, #tpu.memory_space<vmem>>) attributes {dimension_semantics = [#tpu.dimension_semantics<parallel>, #tpu.dimension_semantics<parallel>, #tpu.dimension_semantics<arbitrary>], iteration_bounds = array<i64: 1, 1, 1>, scalar_prefetch = 0 : i64, scratch_operands = 0 : i64, tpu.core_type = #tpu.core_type<tc>, window_params = [{transform_indices = @transform_0, window_bounds = array<i64: 16, 128>}, {transform_indices = @transform_1, window_bounds = array<i64: 1, 128>}, {transform_indices = @transform_2, window_bounds = array<i64: 1, 128>}, {transform_indices = @transform_3, window_bounds = array<i64: 128, 128>}, {transform_indices = @transform_4, window_bounds = array<i64: 1, 128>}, {transform_indices = @transform_5, window_bounds = array<i64: 16, 128>}]} {
    %c0 = arith.constant 0 : index
    %c0_0 = arith.constant 0 : index
    %0 = vector.load %arg3[%c0, %c0_0] : memref<16x128xbf16, #tpu.memory_space<vmem>>, vector<16x128xbf16>
    %1 = arith.extf %0 : vector<16x128xbf16> to vector<16x128xf32>
    %cst = arith.constant dense<0.000000e+00> : vector<16xf32>
    %2 = vector.multi_reduction <add>, %1, %cst [1] : vector<16x128xf32> to vector<16xf32>
    %3 = vector.shape_cast %2 : vector<16xf32> to vector<16x1xf32>
    %cst_1 = arith.constant 3.125000e-02 : f32
    %4 = vector.broadcast %cst_1 : f32 to vector<16x1xf32>
    %5 = arith.mulf %3, %4 : vector<16x1xf32>
    %6 = vector.broadcast %5 : vector<16x1xf32> to vector<16x128xf32>
    %7 = arith.subf %1, %6 : vector<16x128xf32>
    %8 = tpu.iota {dimensions = array<i32: 1>} : vector<16x128xi32>
    %c32_i32 = arith.constant 32 : i32
    %9 = vector.broadcast %c32_i32 : i32 to vector<16x128xi32>
    %10 = arith.cmpi slt, %8, %9 : vector<16x128xi32>
    %cst_2 = arith.constant 0.000000e+00 : f32
    %11 = vector.broadcast %cst_2 : f32 to vector<16x128xf32>
    %12 = arith.select %10, %7, %11 : vector<16x128xi1>, vector<16x128xf32>
    %13 = arith.mulf %12, %12 : vector<16x128xf32>
    %cst_3 = arith.constant dense<0.000000e+00> : vector<16xf32>
    %14 = vector.multi_reduction <add>, %13, %cst_3 [1] : vector<16x128xf32> to vector<16xf32>
    %15 = vector.shape_cast %14 : vector<16xf32> to vector<16x1xf32>
    %cst_4 = arith.constant 3.125000e-02 : f32
    %16 = vector.broadcast %cst_4 : f32 to vector<16x1xf32>
    %17 = arith.mulf %15, %16 : vector<16x1xf32>
    %cst_5 = arith.constant 9.99999974E-6 : f32
    %18 = vector.broadcast %cst_5 : f32 to vector<16x1xf32>
    %19 = arith.addf %17, %18 : vector<16x1xf32>
    %20 = math.rsqrt %19 : vector<16x1xf32>
    %21 = vector.broadcast %20 : vector<16x1xf32> to vector<16x128xf32>
    %22 = arith.mulf %12, %21 : vector<16x128xf32>
    %c0_6 = arith.constant 0 : index
    %c0_7 = arith.constant 0 : index
    %23 = vector.load %arg4[%c0_6, %c0_7] : memref<1x128xf32, #tpu.memory_space<vmem>>, vector<1x128xf32>
    %24 = vector.broadcast %23 : vector<1x128xf32> to vector<16x128xf32>
    %25 = arith.mulf %22, %24 : vector<16x128xf32>
    %c0_8 = arith.constant 0 : index
    %c0_9 = arith.constant 0 : index
    %26 = vector.load %arg5[%c0_8, %c0_9] : memref<1x128xf32, #tpu.memory_space<vmem>>, vector<1x128xf32>
    %27 = vector.broadcast %26 : vector<1x128xf32> to vector<16x128xf32>
    %28 = arith.addf %25, %27 : vector<16x128xf32>
    %29 = arith.truncf %28 : vector<16x128xf32> to vector<16x128xbf16>
    %c0_10 = arith.constant 0 : index
    %c0_11 = arith.constant 0 : index
    %30 = vector.load %arg6[%c0_10, %c0_11] : memref<128x128xbf16, #tpu.memory_space<vmem>>, vector<128x128xbf16>
    %cst_12 = arith.constant dense<0.000000e+00> : vector<16x128xf32>
    %31 = tpu.matmul %29, %30, %cst_12 {dimension_numbers = #tpu.dot_dimension_numbers<[1], [0], [0], [1], [0, 0, 1, 1], [], []>} : vector<16x128xbf16>, vector<128x128xbf16>, vector<16x128xf32> -> vector<16x128xf32>
    %c0_13 = arith.constant 0 : index
    %c0_14 = arith.constant 0 : index
    %32 = vector.load %arg7[%c0_13, %c0_14] : memref<1x128xf32, #tpu.memory_space<vmem>>, vector<1x128xf32>
    %33 = vector.broadcast %32 : vector<1x128xf32> to vector<16x128xf32>
    %34 = arith.addf %31, %33 : vector<16x128xf32>
    %cst_15 = arith.constant 1.702000e+00 : f32
    %35 = vector.broadcast %cst_15 : f32 to vector<16x128xf32>
    %36 = arith.mulf %35, %34 : vector<16x128xf32>
    %37 = arith.negf %36 : vector<16x128xf32>
    %38 = math.exp %37 : vector<16x128xf32>
    %cst_16 = arith.constant 1.000000e+00 : f32
    %39 = vector.broadcast %cst_16 : f32 to vector<16x128xf32>
    %40 = arith.addf %39, %38 : vector<16x128xf32>
    %41 = arith.divf %39, %40 : vector<16x128xf32>
    %42 = arith.mulf %34, %41 : vector<16x128xf32>
    %43 = arith.truncf %42 : vector<16x128xf32> to vector<16x128xbf16>
    %c0_17 = arith.constant 0 : index
    %c0_18 = arith.constant 0 : index
    %44 = vector.load %arg8[%c0_17, %c0_18] : memref<16x128xbf16, #tpu.memory_space<vmem>>, vector<16x128xbf16>
    tpu.vector_store %arg8[%c0_17, %c0_18], %43 {strides = array<i32>} : memref<16x128xbf16, #tpu.memory_space<vmem>>, vector<16x128xbf16>,
    return
  }
  func.func @transform_0(%arg0: i32, %arg1: i32, %arg2: i32) -> (i32, i32) {
    %c0_i32 = arith.constant 0 : i32
    return %arg0, %arg2 : i32, i32
  }
  func.func @transform_1(%arg0: i32, %arg1: i32, %arg2: i32) -> (i32, i32) {
    %c0_i32 = arith.constant 0 : i32
    %c0_i32_0 = arith.constant 0 : i32
    return %c0_i32, %arg2 : i32, i32
  }
  func.func @transform_2(%arg0: i32, %arg1: i32, %arg2: i32) -> (i32, i32) {
    %c0_i32 = arith.constant 0 : i32
    %c0_i32_0 = arith.constant 0 : i32
    return %c0_i32, %arg2 : i32, i32
  }
  func.func @transform_3(%arg0: i32, %arg1: i32, %arg2: i32) -> (i32, i32) {
    %c0_i32 = arith.constant 0 : i32
    return %arg2, %arg1 : i32, i32
  }
  func.func @transform_4(%arg0: i32, %arg1: i32, %arg2: i32) -> (i32, i32) {
    %c0_i32 = arith.constant 0 : i32
    %c0_i32_0 = arith.constant 0 : i32
    return %c0_i32, %arg1 : i32, i32
  }
  func.func @transform_5(%arg0: i32, %arg1: i32, %arg2: i32) -> (i32, i32) {
    %c0_i32 = arith.constant 0 : i32
    return %arg0, %arg1 : i32, i32
  }
}

module attributes {stable_mosaic.version = 11 : i64} {
  func.func @kernel(%arg0: i32, %arg1: memref<2x64xf32, #tpu.memory_space<vmem>>, %arg2: memref<4x64xf32, #tpu.memory_space<vmem>>, %arg3: memref<4x64xf32, #tpu.memory_space<vmem>>, %arg4: memref<1xf32, #tpu.memory_space<smem>>, %arg5: memref<2x4xf32, #tpu.memory_space<vmem>>, %arg6: memref<1x1xf32, #tpu.memory_space<vmem>>) attributes {dimension_semantics = [#tpu.dimension_semantics<arbitrary>], iteration_bounds = array<i64: 1>, scalar_prefetch = 0 : i64, scratch_operands = 0 : i64, tpu.core_type = #tpu.core_type<tc>, window_params = [{pipeline_mode = #tpu.pipeline_mode<synchronous>, transform_indices = @transform_0, window_bounds = array<i64: 2, 64>}, {pipeline_mode = #tpu.pipeline_mode<synchronous>, transform_indices = @transform_1, window_bounds = array<i64: 4, 64>}, {pipeline_mode = #tpu.pipeline_mode<synchronous>, transform_indices = @transform_2, window_bounds = array<i64: 4, 64>}, {transform_indices = @transform_3, window_bounds = array<i64: 1>}, {pipeline_mode = #tpu.pipeline_mode<synchronous>, transform_indices = @transform_4, window_bounds = array<i64: 2, 4>}, {pipeline_mode = #tpu.pipeline_mode<synchronous>, transform_indices = @transform_5, window_bounds = array<i64: 1, 1>}]} {
    %c0 = arith.constant 0 : index
    %c0_0 = arith.constant 0 : index
    %0 = vector.load %arg1[%c0, %c0_0] : memref<2x64xf32, #tpu.memory_space<vmem>>, vector<2x64xf32>
    %c0_1 = arith.constant 0 : index
    %c0_2 = arith.constant 0 : index
    %1 = vector.load %arg2[%c0_1, %c0_2] : memref<4x64xf32, #tpu.memory_space<vmem>>, vector<4x64xf32>
    %c0_3 = arith.constant 0 : index
    %c0_4 = arith.constant 0 : index
    %2 = vector.load %arg3[%c0_3, %c0_4] : memref<4x64xf32, #tpu.memory_space<vmem>>, vector<4x64xf32>
    %3 = arith.mulf %0, %0 : vector<2x64xf32>
    %cst = arith.constant dense<0.000000e+00> : vector<2xf32>
    %4 = vector.multi_reduction <add>, %3, %cst [1] : vector<2x64xf32> to vector<2xf32>
    %5 = vector.shape_cast %4 : vector<2xf32> to vector<2x1xf32>
    %cst_5 = arith.constant 9.99999996E-13 : f32
    %6 = vector.broadcast %cst_5 : f32 to vector<2x1xf32>
    %7 = arith.addf %5, %6 : vector<2x1xf32>
    %8 = math.rsqrt %7 : vector<2x1xf32>
    %9 = vector.broadcast %8 : vector<2x1xf32> to vector<2x64xf32>
    %10 = arith.mulf %0, %9 : vector<2x64xf32>
    %11 = arith.mulf %1, %1 : vector<4x64xf32>
    %cst_6 = arith.constant dense<0.000000e+00> : vector<4xf32>
    %12 = vector.multi_reduction <add>, %11, %cst_6 [1] : vector<4x64xf32> to vector<4xf32>
    %13 = vector.shape_cast %12 : vector<4xf32> to vector<4x1xf32>
    %cst_7 = arith.constant 9.99999996E-13 : f32
    %14 = vector.broadcast %cst_7 : f32 to vector<4x1xf32>
    %15 = arith.addf %13, %14 : vector<4x1xf32>
    %16 = math.rsqrt %15 : vector<4x1xf32>
    %17 = vector.broadcast %16 : vector<4x1xf32> to vector<4x64xf32>
    %18 = arith.mulf %1, %17 : vector<4x64xf32>
    %19 = arith.mulf %2, %2 : vector<4x64xf32>
    %cst_8 = arith.constant dense<0.000000e+00> : vector<4xf32>
    %20 = vector.multi_reduction <add>, %19, %cst_8 [1] : vector<4x64xf32> to vector<4xf32>
    %21 = vector.shape_cast %20 : vector<4xf32> to vector<4x1xf32>
    %cst_9 = arith.constant 9.99999996E-13 : f32
    %22 = vector.broadcast %cst_9 : f32 to vector<4x1xf32>
    %23 = arith.addf %21, %22 : vector<4x1xf32>
    %24 = math.rsqrt %23 : vector<4x1xf32>
    %25 = vector.broadcast %24 : vector<4x1xf32> to vector<4x64xf32>
    %26 = arith.mulf %2, %25 : vector<4x64xf32>
    %c0_10 = arith.constant 0 : index
    %27 = memref.load %arg4[%c0_10] : memref<1xf32, #tpu.memory_space<smem>>
    %28 = tpu.transpose %18, [1, 0] : vector<4x64xf32> -> vector<64x4xf32>
    %cst_11 = arith.constant dense<0.000000e+00> : vector<2x4xf32>
    %29 = tpu.matmul %10, %28, %cst_11 {dimension_numbers = #tpu.dot_dimension_numbers<[1], [0], [0], [1], [0, 0, 1, 1], [], []>} : vector<2x64xf32>, vector<64x4xf32>, vector<2x4xf32> -> vector<2x4xf32>
    %30 = vector.broadcast %27 : f32 to vector<2x4xf32>
    %31 = arith.mulf %30, %29 : vector<2x4xf32>
    %c0_12 = arith.constant 0 : index
    %c0_13 = arith.constant 0 : index
    %32 = vector.load %arg5[%c0_12, %c0_13] : memref<2x4xf32, #tpu.memory_space<vmem>>, vector<2x4xf32>
    tpu.vector_store %arg5[%c0_12, %c0_13], %31 {strides = array<i32>} : memref<2x4xf32, #tpu.memory_space<vmem>>, vector<2x4xf32>,
    %33 = arith.mulf %18, %26 : vector<4x64xf32>
    %cst_14 = arith.constant dense<0.000000e+00> : vector<4xf32>
    %34 = vector.multi_reduction <add>, %33, %cst_14 [1] : vector<4x64xf32> to vector<4xf32>
    %35 = vector.shape_cast %34 : vector<4xf32> to vector<4x1xf32>
    %36 = arith.mulf %18, %18 : vector<4x64xf32>
    %cst_15 = arith.constant dense<0.000000e+00> : vector<4xf32>
    %37 = vector.multi_reduction <add>, %36, %cst_15 [1] : vector<4x64xf32> to vector<4xf32>
    %38 = vector.shape_cast %37 : vector<4xf32> to vector<4x1xf32>
    %39 = math.sqrt %38 : vector<4x1xf32>
    %40 = arith.mulf %26, %26 : vector<4x64xf32>
    %cst_16 = arith.constant dense<0.000000e+00> : vector<4xf32>
    %41 = vector.multi_reduction <add>, %40, %cst_16 [1] : vector<4x64xf32> to vector<4xf32>
    %42 = vector.shape_cast %41 : vector<4xf32> to vector<4x1xf32>
    %43 = math.sqrt %42 : vector<4x1xf32>
    %44 = arith.mulf %39, %43 : vector<4x1xf32>
    %cst_17 = arith.constant 1.000000e-07 : f32
    %45 = vector.broadcast %cst_17 : f32 to vector<4x1xf32>
    %46 = arith.maximumf %44, %45 : vector<4x1xf32>
    %47 = arith.divf %35, %46 : vector<4x1xf32>
    %cst_18 = arith.constant dense<0.000000e+00> : vector<1xf32>
    %48 = vector.multi_reduction <add>, %47, %cst_18 [0] : vector<4x1xf32> to vector<1xf32>
    %49 = vector.shape_cast %48 : vector<1xf32> to vector<1x1xf32>
    %cst_19 = arith.constant 2.500000e-01 : f32
    %50 = vector.broadcast %cst_19 : f32 to vector<1x1xf32>
    %51 = arith.mulf %49, %50 : vector<1x1xf32>
    %cst_20 = arith.constant 1.000000e+00 : f32
    %52 = vector.broadcast %cst_20 : f32 to vector<1x1xf32>
    %53 = arith.subf %52, %51 : vector<1x1xf32>
    %c0_21 = arith.constant 0 : index
    %c0_22 = arith.constant 0 : index
    %54 = vector.load %arg6[%c0_21, %c0_22] : memref<1x1xf32, #tpu.memory_space<vmem>>, vector<1x1xf32>
    tpu.vector_store %arg6[%c0_21, %c0_22], %53 {strides = array<i32>} : memref<1x1xf32, #tpu.memory_space<vmem>>, vector<1x1xf32>,
    return
  }
  func.func @transform_0(%arg0: i32) -> (i32, i32) {
    %c0_i32 = arith.constant 0 : i32
    %c0_i32_0 = arith.constant 0 : i32
    %c0_i32_1 = arith.constant 0 : i32
    return %c0_i32, %c0_i32_0 : i32, i32
  }
  func.func @transform_1(%arg0: i32) -> (i32, i32) {
    %c0_i32 = arith.constant 0 : i32
    %c0_i32_0 = arith.constant 0 : i32
    %c0_i32_1 = arith.constant 0 : i32
    return %c0_i32, %c0_i32_0 : i32, i32
  }
  func.func @transform_2(%arg0: i32) -> (i32, i32) {
    %c0_i32 = arith.constant 0 : i32
    %c0_i32_0 = arith.constant 0 : i32
    %c0_i32_1 = arith.constant 0 : i32
    return %c0_i32, %c0_i32_0 : i32, i32
  }
  func.func @transform_3(%arg0: i32) -> i32 {
    %c0_i32 = arith.constant 0 : i32
    %c0_i32_0 = arith.constant 0 : i32
    return %c0_i32 : i32
  }
  func.func @transform_4(%arg0: i32) -> (i32, i32) {
    %c0_i32 = arith.constant 0 : i32
    %c0_i32_0 = arith.constant 0 : i32
    %c0_i32_1 = arith.constant 0 : i32
    return %c0_i32, %c0_i32_0 : i32, i32
  }
  func.func @transform_5(%arg0: i32) -> (i32, i32) {
    %c0_i32 = arith.constant 0 : i32
    %c0_i32_0 = arith.constant 0 : i32
    %c0_i32_1 = arith.constant 0 : i32
    return %c0_i32, %c0_i32_0 : i32, i32
  }
}

</mosaic_0001>

<bundles_post_ra>
// kernel: custom_clip_forward.38
= control target key start
LH: loop header
LB: loop body
LE: loop exit
PB: predicated region body
PF: predicated region fallthrough
CT: control target
= control target key end

     0   :  { %v69_v12 = vlaneseq  ;;  %s630_s0 = inlined_call_operand.vmem [shape: bf16[64,128], index: 0, kind: input, shape index: {}]   ;;  %s631_s3 = inlined_call_operand.vmem [shape: bf16[128,128], index: 3, kind: input, shape index: {}]   ;;  %s632_s1 = inlined_call_operand.vmem [shape: f32[1,128], index: 1, kind: input, shape index: {}]   ;;  %s633_s2 = inlined_call_operand.vmem [shape: f32[1,128], index: 2, kind: input, shape index: {}]   ;;  %s634_s4 = inlined_call_operand.vmem [shape: f32[1,128], index: 4, kind: input, shape index: {}]   ;;  %s635_s5 = inlined_call_operand.vmem [shape: bf16[64,128], index: 5, kind: output, shape index: {}]  }
   0x1   :  { %v378_v0 = vld [vmem:[%s630_s0] sm:$0xff]   ;;  %v414_v1 = vld [vmem:[%s630_s0 + $0x10] sm:$0xff]   ;;  %v413_v6 = vld [vmem:[%s630_s0 + $0x8] sm:$0xff]  }
   0x2   :  { %v379_v2 = vunpack.c.l.bf16 %v378_v0  ;;  %v387_v3 = vunpack.c.l.bf16 %v414_v1  ;;  %v380_v4 = vunpack.c.h.bf16 %v378_v0  ;;  %v388_v5 = vunpack.c.h.bf16 %v414_v1  ;;  %v415_v9 = vld [vmem:[%s630_s0 + $0x18] sm:$0xff]   ;;  %v472_v55 = vld [vmem:[%s631_s3 + $0x30] sm:$0xff]   ;;  %v473_v56 = vld [vmem:[%s631_s3 + $0x28] sm:$0xff]  }
   0x3   :  { %v383_v7 = vunpack.c.l.bf16 %v413_v6  ;;  %v384_v8 = vunpack.c.h.bf16 %v413_v6  ;;  %v391_v10 = vunpack.c.l.bf16 %v415_v9  ;;  %v392_v11 = vunpack.c.h.bf16 %v415_v9  ;;  %v471_v54 = vld [vmem:[%s631_s3 + $0x38] sm:$0xff]   ;;  %v474_v57 = vld [vmem:[%s631_s3 + $0x20] sm:$0xff]   ;;  %v476_v59 = vld [vmem:[%s631_s3 + $0x10] sm:$0xff]  }
   0x4   :  { %37 = vadd.xlane.f32.xlu0 %v379_v2  ;;  %45 = vadd.xlane.f32.xlu1 %v387_v3  ;;  %v70_v13 = vand.u32 127, %v69_v12  ;;  %v475_v58 = vld [vmem:[%s631_s3 + $0x18] sm:$0xff]   ;;  %v477_v60 = vld [vmem:[%s631_s3 + $0x8] sm:$0xff]   ;;  %v478_v61 = vld [vmem:[%s631_s3] sm:$0xff]  }
   0x5   :  { %431 = vmatprep.subr.bf16.mxu0 %v471_v54  ;;  %455 = vmatprep.subr.bf16.mxu1 %v471_v54 }
   0x6   :  { %vm71_vm0 = vcmp.lt.s32.totalorder %v70_v13, 32  ;;  %432 = vmatpush3.bf16.msra.mxu0 %v471_v54  ;;  %463 = vmatpush3.bf16.msra.mxu1 %v471_v54 }
   0x7   :  { %433 = vmatprep.subr.bf16.mxu0 %v472_v55  ;;  %456 = vmatprep.subr.bf16.mxu1 %v472_v55 }
   0x8   :  { %39 = vadd.xlane.f32.xlu0 %v380_v4  ;;  %47 = vadd.xlane.f32.xlu1 %v388_v5 }
   0xa   :  { %434 = vmatpush3.bf16.msra.mxu0 %v472_v55  ;;  %464 = vmatpush3.bf16.msra.mxu1 %v472_v55 }
   0xb   :  { %435 = vmatprep.subr.bf16.mxu0 %v473_v56  ;;  %457 = vmatprep.subr.bf16.mxu1 %v473_v56 }
   0xc   :  { %41 = vadd.xlane.f32.xlu0 %v383_v7  ;;  %43 = vadd.xlane.f32.xlu1 %v384_v8 }
   0xe   :  { %436 = vmatpush3.bf16.msra.mxu0 %v473_v56  ;;  %465 = vmatpush3.bf16.msra.mxu1 %v473_v56 }
   0xf   :  { %437 = vmatprep.subr.bf16.mxu0 %v474_v57  ;;  %458 = vmatprep.subr.bf16.mxu1 %v474_v57 }
  0x10   :  { %49 = vadd.xlane.f32.xlu0 %v391_v10  ;;  %51 = vadd.xlane.f32.xlu1 %v392_v11 }
  0x12   :  { %438 = vmatpush3.bf16.msra.mxu0 %v474_v57  ;;  %466 = vmatpush3.bf16.msra.mxu1 %v474_v57 }
  0x13   :  { %439 = vmatprep.subr.bf16.mxu0 %v475_v58  ;;  %459 = vmatprep.subr.bf16.mxu1 %v475_v58 }
  0x16   :  { %440 = vmatpush3.bf16.msra.mxu0 %v475_v58  ;;  %467 = vmatpush3.bf16.msra.mxu1 %v475_v58 }
  0x17   :  { %441 = vmatprep.subr.bf16.mxu0 %v476_v59  ;;  %460 = vmatprep.subr.bf16.mxu1 %v476_v59 }
  0x1a   :  { %442 = vmatpush3.bf16.msra.mxu0 %v476_v59  ;;  %468 = vmatpush3.bf16.msra.mxu1 %v476_v59 }
  0x1b   :  { %443 = vmatprep.subr.bf16.mxu0 %v477_v60  ;;  %461 = vmatprep.subr.bf16.mxu1 %v477_v60 }
  0x1e   :  { %444 = vmatpush3.bf16.msra.mxu0 %v477_v60  ;;  %469 = vmatpush3.bf16.msra.mxu1 %v477_v60 }
  0x1f   :  { %445 = vmatprep.subr.bf16.mxu0 %v478_v61  ;;  %462 = vmatprep.subr.bf16.mxu1 %v478_v61 }
  0x22   :  { %446 = vmatpush3.bf16.msra.mxu0 %v478_v61  ;;  %470 = vmatpush3.bf16.msra.mxu1 %v478_v61 }
  0x8d   :  { %v38_v14 = vpop.xlane.xlu0 %37  ;;  %v46_v15 = vpop.xlane.xlu1 %45 }
  0x8e   :  { %v53_v16 = vmul.f32 0.03125, %v38_v14  ;;  %v57_v17 = vmul.f32 0.03125, %v46_v15 }
  0x90   :  { %v61_v18 = vsub.f32 %v379_v2, %v53_v16  ;;  %v65_v19 = vsub.f32 %v387_v3, %v57_v17 }
  0x91   :  { %v40_v20 = vpop.xlane.xlu0 %39  ;;  %v48_v21 = vpop.xlane.xlu1 %47 }
  0x92   :  { %v54_v22 = vmul.f32 0.03125, %v40_v20  ;;  %v58_v23 = vmul.f32 0.03125, %v48_v21  ;;  %v538_v24 = vsel %vm71_vm0, %v61_v18, 0.0  ;;  %v541_v25 = vsel %vm71_vm0, %v65_v19, 0.0 }
  0x93   :  { %v80_v26 = vmul.f32 %v538_v24, %v538_v24  ;;  %v84_v31 = vmul.f32 %v541_v25, %v541_v25 }
  0x94   :  { %v62_v27 = vsub.f32 %v380_v4, %v54_v22  ;;  %v66_v28 = vsub.f32 %v388_v5, %v58_v23 }
  0x95   :  { %88 = vadd.xlane.f32.xlu0 %v80_v26  ;;  %v42_v29 = vpop.xlane.xlu0 %41  ;;  %v44_v30 = vpop.xlane.xlu1 %43  ;;  %v350_v26 = vld [vmem:[%s632_s1] ss:$0 sm:$0xff] }
  0x96   :  { %v55_v32 = vmul.f32 0.03125, %v42_v29  ;;  %v56_v33 = vmul.f32 0.03125, %v44_v30  ;;  %v548_v34 = vsel %vm71_vm0, %v62_v27, 0.0  ;;  %v551_v35 = vsel %vm71_vm0, %v66_v28, 0.0 }
  0x97   :  { %v81_v36 = vmul.f32 %v548_v34, %v548_v34  ;;  %v85_v41 = vmul.f32 %v551_v35, %v551_v35 }
  0x98   :  { %v63_v37 = vsub.f32 %v383_v7, %v55_v32  ;;  %v64_v38 = vsub.f32 %v384_v8, %v56_v33 }
  0x99   :  { %96 = vadd.xlane.f32.xlu0 %v84_v31  ;;  %90 = vadd.xlane.f32.xlu1 %v81_v36  ;;  %v50_v39 = vpop.xlane.xlu0 %49  ;;  %v52_v40 = vpop.xlane.xlu1 %51  ;;  %v351_v31 = vld [vmem:[%s633_s2] ss:$0 sm:$0xff] }
  0x9a   :  { %v59_v42 = vmul.f32 0.03125, %v50_v39  ;;  %v60_v43 = vmul.f32 0.03125, %v52_v40  ;;  %v558_v44 = vsel %vm71_vm0, %v63_v37, 0.0  ;;  %v561_v45 = vsel %vm71_vm0, %v64_v38, 0.0 }
  0x9b   :  { %v82_v46 = vmul.f32 %v558_v44, %v558_v44  ;;  %v83_v49 = vmul.f32 %v561_v45, %v561_v45 }
  0x9c   :  { %v67_v47 = vsub.f32 %v391_v10, %v59_v42  ;;  %v68_v48 = vsub.f32 %v392_v11, %v60_v43 }
  0x9d   :  { %98 = vadd.xlane.f32.xlu1 %v85_v41  ;;  %92 = vadd.xlane.f32.xlu0 %v82_v46 }
  0x9e   :  { %v568_v50 = vsel %vm71_vm0, %v67_v47, 0.0  ;;  %v571_v51 = vsel %vm71_vm0, %v68_v48, 0.0 }
  0x9f   :  { %v86_v52 = vmul.f32 %v568_v50, %v568_v50  ;;  %v87_v53 = vmul.f32 %v571_v51, %v571_v51 }
  0xa1   :  { %94 = vadd.xlane.f32.xlu1 %v83_v49  ;;  %100 = vadd.xlane.f32.xlu0 %v86_v52 }
  0xa5   :  { %102 = vadd.xlane.f32.xlu1 %v87_v53 }
 0x11e   :  { %v89_v62 = vpop.xlane.xlu0 %88 }
 0x11f   :  { %v104_v63 = vmul.f32 0.03125, %v89_v62 }
 0x121   :  { %v112_v0 = vadd.f32 1e-05, %v104_v63 }
 0x122   :  { %v91_v1 = vpop.xlane.xlu1 %90  ;;  %v97_v2 = vpop.xlane.xlu0 %96 }
 0x123   :  { %479 = vrsqrt.f32 %v112_v0  ;;  %v105_v3 = vmul.f32 0.03125, %v91_v1  ;;  %v108_v4 = vmul.f32 0.03125, %v97_v2 }
 0x125   :  { %v113_v5 = vadd.f32 1e-05, %v105_v3  ;;  %v116_v6 = vadd.f32 1e-05, %v108_v4 }
 0x126   :  { %v99_v7 = vpop.xlane.xlu1 %98  ;;  %v93_v8 = vpop.xlane.xlu0 %92 }
 0x127   :  { %481 = vrsqrt.f32 %v113_v5  ;;  %v109_v9 = vmul.f32 0.03125, %v99_v7  ;;  %v106_v10 = vmul.f32 0.03125, %v93_v8 }
 0x128   :  { %483 = vrsqrt.f32 %v116_v6 }
 0x129   :  { %v117_v11 = vadd.f32 1e-05, %v109_v9  ;;  %v114_v12 = vadd.f32 1e-05, %v106_v10 }
 0x12a   :  { %v95_v13 = vpop.xlane.xlu1 %94  ;;  %v101_v14 = vpop.xlane.xlu0 %100 }
 0x12b   :  { %485 = vrsqrt.f32 %v117_v11  ;;  %v107_v15 = vmul.f32 0.03125, %v95_v13  ;;  %v110_v16 = vmul.f32 0.03125, %v101_v14 }
 0x12c   :  { %487 = vrsqrt.f32 %v114_v12 }
 0x12d   :  { %v115_v17 = vadd.f32 1e-05, %v107_v15  ;;  %v118_v18 = vadd.f32 1e-05, %v110_v16 }
 0x12e   :  { %v103_v19 = vpop.xlane.xlu1 %102 }
 0x12f   :  { %489 = vrsqrt.f32 %v115_v17  ;;  %v111_v20 = vmul.f32 0.03125, %v103_v19 }
 0x130   :  { %v480_v21 = vpop.eup %479  ;;  %491 = vrsqrt.f32 %v118_v18 }
 0x131   :  { %v119_v22 = vadd.f32 1e-05, %v111_v20  ;;  %v128_v23 = vmul.f32 %v480_v21, %v538_v24 }
 0x133   :  { %493 = vrsqrt.f32 %v119_v22  ;;  %v143_v30 = vmul.f32 %v350_v26, %v128_v23 }
 0x134   :  { %v482_v27 = vpop.eup %481 }
 0x135   :  { %v484_v28 = vpop.eup %483  ;;  %v129_v29 = vmul.f32 %v482_v27, %v548_v34  ;;  %v158_v24 = vadd.f32 %v351_v31, %v143_v30 }
 0x136   :  { %v132_v32 = vmul.f32 %v484_v28, %v541_v25 }
 0x137   :  { %v144_v33 = vmul.f32 %v350_v26, %v129_v29 }
 0x138   :  { %v486_v36 = vpop.eup %485  ;;  %v147_v40 = vmul.f32 %v350_v26, %v132_v32 }
 0x139   :  { %v488_v37 = vpop.eup %487  ;;  %v159_v38 = vadd.f32 %v351_v31, %v144_v33  ;;  %v133_v39 = vmul.f32 %v486_v36, %v551_v35 }
 0x13a   :  { %v130_v41 = vmul.f32 %v488_v37, %v558_v44  ;;  %v162_v47 = vadd.f32 %v351_v31, %v147_v40 }
 0x13b   :  { %v166_v42 = vpack.c.bf16 %v159_v38, %v158_v24  ;;  %v148_v43 = vmul.f32 %v350_v26, %v133_v39 }
 0x13c   :  { %v490_v34 = vpop.eup %489  ;;  %v145_v25 = vmul.f32 %v350_v26, %v130_v41 }
 0x13d   :  { %v492_v46 = vpop.eup %491  ;;  %447 = vmatprep.mubr.bf16.mxu0 %v166_v42  ;;  %v163_v48 = vadd.f32 %v351_v31, %v148_v43  ;;  %v131_v49 = vmul.f32 %v490_v34, %v561_v45 }
 0x13e   :  { %v134_v52 = vmul.f32 %v492_v46, %v568_v50  ;;  %v160_v35 = vadd.f32 %v351_v31, %v145_v25  ;;  %v352_v50 = vld [vmem:[%s634_s4] ss:$0 sm:$0xff] }
 0x13f   :  { %v168_v53 = vpack.c.bf16 %v163_v48, %v162_v47  ;;  %v146_v54 = vmul.f32 %v350_v26, %v131_v49 }
 0x140   :  { %v494_v55 = vpop.eup %493  ;;  %v149_v57 = vmul.f32 %v350_v26, %v134_v52 }
 0x141   :  { %451 = vmatprep.mubr.bf16.mxu1 %v168_v53  ;;  %v161_v56 = vadd.f32 %v351_v31, %v146_v54  ;;  %v135_v44 = vmul.f32 %v494_v55, %v571_v51 }
 0x142   :  { %v164_v60 = vadd.f32 %v351_v31, %v149_v57 }
 0x143   :  { %v167_v58 = vpack.c.bf16 %v161_v56, %v160_v35  ;;  %v150_v59 = vmul.f32 %v350_v26, %v135_v44 }
 0x145   :  { %448 = vmatmul.mubr.bf16.vlgmr.msra.gmra.mxu0 %v167_v58  ;;  %v165_v61 = vadd.f32 %v351_v31, %v150_v59 }
 0x147   :  { %v169_v62 = vpack.c.bf16 %v165_v61, %v164_v60 }
 0x149   :  { %452 = vmatmul.mubr.bf16.vlgmr.msra.gmra.mxu1 %v169_v62 }
 0x205   :  { %v449_v45 = vpop.f32.mrf.mxu0 }
 0x206   :  { %v284_v2 = vadd.f32 %v449_v45, %v352_v50 }
 0x207   :  { %v275_v63 = vpop.f32.mrf.mxu0 }
 0x208   :  { %v276_v5 = vadd.f32 %v352_v50, %v275_v63 }
 0x209   :  { %v450_v0 = vpop.f32.mrf.mxu0  ;;  %v453_v1 = vpop.f32.mrf.mxu1 }
 0x20a   :  { %v287_v3 = vadd.f32 %v450_v0, %v352_v50  ;;  %v300_v9 = vadd.f32 %v453_v1, %v352_v50 }
 0x20b   :  { %v278_v4 = vpop.f32.mrf.mxu0  ;;  %v291_v51 = vpop.f32.mrf.mxu1 }
 0x20c   :  { %v401_v6 = vpack.c.bf16 %v287_v3, %v284_v2  ;;  %v279_v7 = vadd.f32 %v352_v50, %v278_v4  ;;  %v292_v13 = vadd.f32 %v352_v50, %v291_v51 }
 0x20d   :  { %v454_v8 = vpop.f32.mrf.mxu1 }
 0x20e   :  { %416 = vst [vmem:[%s635_s5 + $0x8] sm:$0xff] %v401_v6   ;;  %v396_v10 = vpack.c.bf16 %v279_v7, %v276_v5  ;;  %v303_v11 = vadd.f32 %v454_v8, %v352_v50 }
 0x20f   :  { %v294_v12 = vpop.f32.mrf.mxu1 }
 0x210   :  { %397 = vst [vmem:[%s635_s5] sm:$0xff] %v396_v10   ;;  %v411_v14 = vpack.c.bf16 %v303_v11, %v300_v9  ;;  %v295_v15 = vadd.f32 %v352_v50, %v294_v12 }
 0x212   :  { %418 = vst [vmem:[%s635_s5 + $0x18] sm:$0xff] %v411_v14   ;;  %v406_v16 = vpack.c.bf16 %v295_v15, %v292_v13 }
 0x214   :  { %417 = vst [vmem:[%s635_s5 + $0x10] sm:$0xff] %v406_v16  }

// kernel: custom_clip_forward.39
= control target key start
LH: loop header
LB: loop body
LE: loop exit
PB: predicated region body
PF: predicated region fallthrough
CT: control target
= control target key end

     0   :  { %s417_s6 = smov 0   ;;  %s448_s0 = inlined_call_operand.vmem [shape: bf16[16,3,16,8], index: 0, kind: input, shape index: {}]   ;;  %s449_s1 = inlined_call_operand.vmem [shape: bf16[16,16,8], index: 1, kind: output, shape index: {}]  }
   0x1 LB: > { %s335_s7 = sadd.s32 4294967295, %s403_s6   ;;  %p339_p0 = scmp.ge.s32.totalorder %s403_s6, 1  ;;  %s403_s6 = sphi %s417_s6, %s11_s6  }
   0x2   : > { %p87_p1 = scmp.lt.s32.totalorder %s403_s6, 17 }
   0x4   : > { %p88_p2 = pnand %p339_p0, %p87_p1 }
   0x5   : > { %p107_p3 = scmp.lt.s32.totalorder (!%p88_p2), %s335_s7, 15 }
   0x6   : > { %91 = sbr.rel (%p88_p2) target bundleno = 738 (0x2e2), region = 24 }
   0xb   : > { %v405_v0 = vmov 0.0   ;;  %vm406_vm0 = vmmov 0   ;;  %s451_s7 = smov (!%p107_p3, %s335_s7), 15  ;;  %vm136_vm1 = vcmask 64512   ;;  %v186_v4 = vlaneseq }
   0xc   : > { %363 = vmatprep.subr.bf16.mxu0 %v405_v0  ;;  %365 = vmatprep.mubr.msk.bf16.mxu0 %vm406_vm0, %v405_v0  ;;  %s375_s8 = smul.u32 24, %s451_s7  ;;  %vm195_vm3 = vcmask 130048   ;;  %s356_s12 = sshll.u32 %s451_s7, 3  ;;  %vm277_vm5 = vcmask 60416  }
   0xd   : > { %369 = vmatprep.subr.bf16.mxu1 %v405_v0  ;;  %371 = vmatprep.mubr.msk.bf16.mxu1 %vm406_vm0, %v405_v0  ;;  %v187_v5 = vshrl.u32 %v186_v4, 7  ;;  %v190_v6 = vand.u32 127, %v186_v4  ;;  %s116_s15 = scalar_lea.vmem %s449_s1, %s356_s12 }
   0xe   : > { %s431_s11 = scalar_lea.vmem %s448_s0, %s375_s8 }
   0xf   : > { %v386_v1 = vld [vmem:[%s431_s11 + $0x8] sm:$0xff]   ;;  %v387_v3 = vld [vmem:[%s431_s11] sm:$0xff]   ;;  %vm191_vm2 = vcmp.gt.s32.totalorder %v190_v6, %v187_v5  ;;  %v188_v8 = vadd.s32 8, %v187_v5  ;;  %v388_v28 = vld [vmem:[%s431_s11 + $0x10] sm:$0xff]  }
  0x10   : > { %v141_v2 = vsel %vm136_vm1, %v386_v1, 0  ;;  %370 = vmatpush3.bf16.msra.mxu1 %v388_v28 }
  0x11   : > { %364 = vmatpush3.bf16.xpose.msra.mxu0 %v141_v2  ;;  %vm192_vm4 = vcmp.gt.s32.totalorder %v190_v6, %v188_v8 }
  0x18   : > { %366 = vmatmul.mubr.msk.bf16.vlgmr.msra.gmra.mxu0 %vm136_vm1, %v387_v3 }
  0xd8   : > { %v177_v7 = vpop.f32.mrf.mxu0 }
  0xd9   : > { %v184_v9 = vmul.f32 0.35355338, %v177_v7 }
  0xda   : > { %v367_v10 = vpop.f32.mrf.mxu0 }
  0xdb   : > { %v193_v11 = vsel %vm191_vm2, -1e+30, %v184_v9 }
  0xdc   : > { %v180_v12 = vpop.f32.mrf.mxu0  ;;  %v196_v13 = vsel %vm195_vm3, %v193_v11, -inf }
  0xdd   : > { %v185_v14 = vmul.f32 0.35355338, %v180_v12  ;;  %197 = vmax.xlane.f32.xlu0 %v196_v13 }
  0xde   : > { %v368_v15 = vpop.f32.mrf.mxu0 }
  0xdf   : > { %v194_v16 = vsel %vm192_vm4, -1e+30, %v185_v14 }
  0xe0   : > { %v199_v17 = vsel %vm195_vm3, %v194_v16, -inf }
  0xe1   : > { %200 = vmax.xlane.f32.xlu0 %v199_v17 }
 0x166   : > { %v198_v18 = vpop.xlane.xlu0 %197 }
 0x167   : > { %v202_v19 = vsub.f32 %v193_v11, %v198_v18 }
 0x169   : > { %v204_v20 = vmul.f32 1.442695, %v202_v19 }
 0x16a   : > { %v201_v21 = vpop.xlane.xlu0 %200 }
 0x16b   : > { %389 = vpow2.f32 %v204_v20  ;;  %v203_v22 = vsub.f32 %v194_v16, %v201_v21 }
 0x16d   : > { %v206_v23 = vmul.f32 1.442695, %v203_v22 }
 0x16f   : > { %391 = vpow2.f32 %v206_v23 }
 0x178   : > { %v390_v24 = vpop.eup %389 }
 0x179   : > { %v208_v25 = vsel %vm195_vm3, %v390_v24, 0.0 }
 0x17a   : > { %209 = vadd.xlane.f32.xlu1 %v208_v25 }
 0x17c   : > { %v392_v26 = vpop.eup %391 }
 0x17d   : > { %v211_v27 = vsel %vm195_vm3, %v392_v26, 0.0 }
 0x17e   : > { %212 = vadd.xlane.f32.xlu1 %v211_v27 }
 0x203   : > { %v210_v29 = vpop.xlane.xlu1 %209 }
 0x204   : > { %393 = vrcp.f32 %v210_v29 }
 0x207   : > { %v213_v30 = vpop.xlane.xlu1 %212 }
 0x208   : > { %395 = vrcp.f32 %v213_v30 }
 0x211   : > { %v394_v31 = vpop.eup %393 }
 0x212   : > { %v216_v33 = vmul.f32 %v394_v31, %v390_v24 }
 0x215   : > { %v396_v32 = vpop.eup %395 }
 0x216   : > { %v217_v34 = vmul.f32 %v396_v32, %v392_v26 }
 0x218   : > { %v218_v35 = vpack.c.bf16 %v217_v34, %v216_v33 }
 0x21a   : > { %372 = vmatmul.mubr.msk.bf16.vlgmr.msra.gmra.mxu1 %vm195_vm3, %v218_v35 }
 0x2da   : > { %v262_v36 = vpop.f32.mrf.mxu1 }
 0x2db   : > { %v357_v37 = vpack.c.bf16 %v262_v36, %v262_v36 }
 0x2dc   : > { %v373_v38 = vpop.f32.mrf.mxu1 }
 0x2dd   : > { %278 = vst.msk [vmem:[%s116_s15] sm:$0xf] %vm277_vm5, %v357_v37 }
 0x2de   : > { %v265_v39 = vpop.f32.mrf.mxu1 }
 0x2df   : > { %v358_v40 = vpack.c.bf16 %v265_v39, %v265_v39 }
 0x2e0   : > { %v374_v41 = vpop.f32.mrf.mxu1 }
 0x2e1   : > { %279 = vst.msk [vmem:[%s116_s15 + $0x4] sm:$0xf] %vm277_vm5, %v358_v40 }
 0x2e2 PF: > { %s11_s6 = sadd.s32 1, %s403_s6  }
 0x2e3   : > { %p8_p4 = scmp.ge.s32.totalorder %s11_s6, 18  }
 0x2e5   :  { %10 = sbr.rel (!%p8_p4) target bundleno = 1 (0x1), region = 56 }

// kernel: custom_clip_forward.40
= control target key start
LH: loop header
LB: loop body
LE: loop exit
PB: predicated region body
PF: predicated region fallthrough
CT: control target
= control target key end

     0   :  { %s477_s1 = inlined_call_operand.vmem [shape: bf16[128,128], index: 1, kind: input, shape index: {}]   ;;  %s478_s0 = inlined_call_operand.vmem [shape: bf16[64,128], index: 0, kind: input, shape index: {}]   ;;  %s479_s2 = inlined_call_operand.vmem [shape: f32[1,128], index: 2, kind: input, shape index: {}]   ;;  %s480_s3 = inlined_call_operand.vmem [shape: bf16[64,128], index: 3, kind: input, shape index: {}]   ;;  %s481_s4 = inlined_call_operand.vmem [shape: bf16[64,128], index: 4, kind: output, shape index: {}]  }
   0x1   :  { %v377_v0 = vld [vmem:[%s477_s1 + $0x38] sm:$0xff]   ;;  %v378_v1 = vld [vmem:[%s477_s1 + $0x30] sm:$0xff]   ;;  %v379_v2 = vld [vmem:[%s477_s1 + $0x28] sm:$0xff]  }
   0x2   :  { %337 = vmatprep.subr.bf16.mxu0 %v377_v0  ;;  %361 = vmatprep.subr.bf16.mxu1 %v377_v0  ;;  %v380_v3 = vld [vmem:[%s477_s1 + $0x20] sm:$0xff]   ;;  %v386_v5 = vld [vmem:[%s478_s0 + $0x10] sm:$0xff]   ;;  %v381_v6 = vld [vmem:[%s477_s1 + $0x18] sm:$0xff]  }
   0x3   :  { %338 = vmatpush3.bf16.msra.mxu0 %v377_v0  ;;  %369 = vmatpush3.bf16.msra.mxu1 %v377_v0  ;;  %v385_v4 = vld [vmem:[%s478_s0] sm:$0xff]   ;;  %v382_v7 = vld [vmem:[%s477_s1 + $0x10] sm:$0xff]   ;;  %v383_v8 = vld [vmem:[%s477_s1 + $0x8] sm:$0xff]  }
   0x4   :  { %339 = vmatprep.subr.bf16.mxu0 %v378_v1  ;;  %362 = vmatprep.subr.bf16.mxu1 %v378_v1  ;;  %v384_v9 = vld [vmem:[%s477_s1] sm:$0xff]   ;;  %v387_v10 = vld [vmem:[%s478_s0 + $0x8] sm:$0xff]   ;;  %v388_v11 = vld [vmem:[%s478_s0 + $0x18] sm:$0xff]  }
   0x5   :  { %353 = vmatprep.mubr.bf16.mxu0 %v385_v4  ;;  %357 = vmatprep.mubr.bf16.mxu1 %v386_v5  ;;  %v254_v12 = vld [vmem:[%s479_s2] ss:$0 sm:$0xff]  ;;  %v319_v13 = vld [vmem:[%s480_s3 + $0x8] sm:$0xff]   ;;  %v321_v14 = vld [vmem:[%s480_s3 + $0x18] sm:$0xff]  }
   0x6   :  { %v284_v17 = vld [vmem:[%s480_s3] sm:$0xff]   ;;  %v320_v18 = vld [vmem:[%s480_s3 + $0x10] sm:$0xff]   ;;  %v289_v20 = vunpack.c.l.bf16 %v319_v13  ;;  %v297_v22 = vunpack.c.l.bf16 %v321_v14  ;;  %v290_v25 = vunpack.c.h.bf16 %v319_v13  ;;  %v298_v26 = vunpack.c.h.bf16 %v321_v14 }
   0x7   :  { %340 = vmatpush3.bf16.msra.mxu0 %v378_v1  ;;  %370 = vmatpush3.bf16.msra.mxu1 %v378_v1  ;;  %v285_v28 = vunpack.c.l.bf16 %v284_v17  ;;  %v293_v30 = vunpack.c.l.bf16 %v320_v18  ;;  %v286_v35 = vunpack.c.h.bf16 %v284_v17  ;;  %v294_v36 = vunpack.c.h.bf16 %v320_v18 }
   0x8   :  { %341 = vmatprep.subr.bf16.mxu0 %v379_v2  ;;  %363 = vmatprep.subr.bf16.mxu1 %v379_v2 }
   0xb   :  { %342 = vmatpush3.bf16.msra.mxu0 %v379_v2  ;;  %371 = vmatpush3.bf16.msra.mxu1 %v379_v2 }
   0xc   :  { %343 = vmatprep.subr.bf16.mxu0 %v380_v3  ;;  %364 = vmatprep.subr.bf16.mxu1 %v380_v3 }
   0xf   :  { %344 = vmatpush3.bf16.msra.mxu0 %v380_v3  ;;  %372 = vmatpush3.bf16.msra.mxu1 %v380_v3 }
  0x10   :  { %345 = vmatprep.subr.bf16.mxu0 %v381_v6  ;;  %365 = vmatprep.subr.bf16.mxu1 %v381_v6 }
  0x13   :  { %346 = vmatpush3.bf16.msra.mxu0 %v381_v6  ;;  %373 = vmatpush3.bf16.msra.mxu1 %v381_v6 }
  0x14   :  { %347 = vmatprep.subr.bf16.mxu0 %v382_v7  ;;  %366 = vmatprep.subr.bf16.mxu1 %v382_v7 }
  0x17   :  { %348 = vmatpush3.bf16.msra.mxu0 %v382_v7  ;;  %374 = vmatpush3.bf16.msra.mxu1 %v382_v7 }
  0x18   :  { %349 = vmatprep.subr.bf16.mxu0 %v383_v8  ;;  %367 = vmatprep.subr.bf16.mxu1 %v383_v8 }
  0x1b   :  { %350 = vmatpush3.bf16.msra.mxu0 %v383_v8  ;;  %375 = vmatpush3.bf16.msra.mxu1 %v383_v8 }
  0x1c   :  { %351 = vmatprep.subr.bf16.mxu0 %v384_v9  ;;  %368 = vmatprep.subr.bf16.mxu1 %v384_v9 }
  0x1f   :  { %352 = vmatpush3.bf16.msra.mxu0 %v384_v9  ;;  %376 = vmatpush3.bf16.msra.mxu1 %v384_v9 }
  0x22   :  { %354 = vmatmul.mubr.bf16.vlgmr.msra.gmra.mxu0 %v387_v10  ;;  %358 = vmatmul.mubr.bf16.vlgmr.msra.gmra.mxu1 %v388_v11 }
  0xe2   :  { %v355_v15 = vpop.f32.mrf.mxu0  ;;  %v359_v16 = vpop.f32.mrf.mxu1 }
  0xe3   :  { %v164_v19 = vadd.f32 %v355_v15, %v254_v12  ;;  %v180_v21 = vadd.f32 %v359_v16, %v254_v12 }
  0xe4   :  { %v155_v23 = vpop.f32.mrf.mxu0  ;;  %v171_v24 = vpop.f32.mrf.mxu1 }
  0xe5   :  { %v156_v27 = vadd.f32 %v254_v12, %v155_v23  ;;  %v172_v29 = vadd.f32 %v254_v12, %v171_v24  ;;  %v204_v37 = vadd.f32 %v289_v20, %v164_v19  ;;  %v208_v38 = vadd.f32 %v297_v22, %v180_v21 }
  0xe6   :  { %v356_v31 = vpop.f32.mrf.mxu0  ;;  %v360_v32 = vpop.f32.mrf.mxu1 }
  0xe7   :  { %v167_v33 = vadd.f32 %v356_v31, %v254_v12  ;;  %v183_v34 = vadd.f32 %v360_v32, %v254_v12  ;;  %v202_v45 = vadd.f32 %v285_v28, %v156_v27  ;;  %v206_v46 = vadd.f32 %v293_v30, %v172_v29 }
  0xe8   :  { %v158_v39 = vpop.f32.mrf.mxu0  ;;  %v174_v40 = vpop.f32.mrf.mxu1 }
  0xe9   :  { %v205_v41 = vadd.f32 %v290_v25, %v167_v33  ;;  %v209_v42 = vadd.f32 %v298_v26, %v183_v34  ;;  %v159_v43 = vadd.f32 %v254_v12, %v158_v39  ;;  %v175_v44 = vadd.f32 %v254_v12, %v174_v40 }
  0xeb   :  { %v307_v47 = vpack.c.bf16 %v205_v41, %v204_v37  ;;  %v317_v48 = vpack.c.bf16 %v209_v42, %v208_v38  ;;  %v203_v49 = vadd.f32 %v286_v35, %v159_v43  ;;  %v207_v50 = vadd.f32 %v294_v36, %v175_v44 }
  0xed   :  { %322 = vst [vmem:[%s481_s4 + $0x8] sm:$0xff] %v307_v47   ;;  %324 = vst [vmem:[%s481_s4 + $0x18] sm:$0xff] %v317_v48   ;;  %v302_v51 = vpack.c.bf16 %v203_v49, %v202_v45  ;;  %v312_v52 = vpack.c.bf16 %v207_v50, %v206_v46 }
  0xef   :  { %303 = vst [vmem:[%s481_s4] sm:$0xff] %v302_v51   ;;  %323 = vst [vmem:[%s481_s4 + $0x10] sm:$0xff] %v312_v52  }

// kernel: custom_clip_forward.41
= control target key start
LH: loop header
LB: loop body
LE: loop exit
PB: predicated region body
PF: predicated region fallthrough
CT: control target
= control target key end

     0   :  { %v69_v12 = vlaneseq  ;;  %s750_s0 = inlined_call_operand.vmem [shape: bf16[64,128], index: 0, kind: input, shape index: {}]   ;;  %s751_s3 = inlined_call_operand.vmem [shape: bf16[128,128], index: 3, kind: input, shape index: {}]   ;;  %s752_s1 = inlined_call_operand.vmem [shape: f32[1,128], index: 1, kind: input, shape index: {}]   ;;  %s753_s2 = inlined_call_operand.vmem [shape: f32[1,128], index: 2, kind: input, shape index: {}]   ;;  %s754_s4 = inlined_call_operand.vmem [shape: f32[1,128], index: 4, kind: input, shape index: {}]   ;;  %s755_s5 = inlined_call_operand.vmem [shape: bf16[64,128], index: 5, kind: output, shape index: {}]  }
   0x1   :  { %v450_v0 = vld [vmem:[%s750_s0] sm:$0xff]   ;;  %v486_v1 = vld [vmem:[%s750_s0 + $0x10] sm:$0xff]   ;;  %v485_v6 = vld [vmem:[%s750_s0 + $0x8] sm:$0xff]  }
   0x2   :  { %v451_v2 = vunpack.c.l.bf16 %v450_v0  ;;  %v459_v3 = vunpack.c.l.bf16 %v486_v1  ;;  %v452_v4 = vunpack.c.h.bf16 %v450_v0  ;;  %v460_v5 = vunpack.c.h.bf16 %v486_v1  ;;  %v487_v9 = vld [vmem:[%s750_s0 + $0x18] sm:$0xff]   ;;  %v544_v55 = vld [vmem:[%s751_s3 + $0x30] sm:$0xff]   ;;  %v545_v56 = vld [vmem:[%s751_s3 + $0x28] sm:$0xff]  }
   0x3   :  { %v455_v7 = vunpack.c.l.bf16 %v485_v6  ;;  %v456_v8 = vunpack.c.h.bf16 %v485_v6  ;;  %v463_v10 = vunpack.c.l.bf16 %v487_v9  ;;  %v464_v11 = vunpack.c.h.bf16 %v487_v9  ;;  %v543_v54 = vld [vmem:[%s751_s3 + $0x38] sm:$0xff]   ;;  %v546_v57 = vld [vmem:[%s751_s3 + $0x20] sm:$0xff]   ;;  %v548_v59 = vld [vmem:[%s751_s3 + $0x10] sm:$0xff]  }
   0x4   :  { %37 = vadd.xlane.f32.xlu0 %v451_v2  ;;  %45 = vadd.xlane.f32.xlu1 %v459_v3  ;;  %v70_v13 = vand.u32 127, %v69_v12  ;;  %v547_v58 = vld [vmem:[%s751_s3 + $0x18] sm:$0xff]   ;;  %v549_v60 = vld [vmem:[%s751_s3 + $0x8] sm:$0xff]   ;;  %v550_v61 = vld [vmem:[%s751_s3] sm:$0xff]  }
   0x5   :  { %503 = vmatprep.subr.bf16.mxu0 %v543_v54  ;;  %527 = vmatprep.subr.bf16.mxu1 %v543_v54 }
   0x6   :  { %vm71_vm0 = vcmp.lt.s32.totalorder %v70_v13, 32  ;;  %504 = vmatpush3.bf16.msra.mxu0 %v543_v54  ;;  %535 = vmatpush3.bf16.msra.mxu1 %v543_v54 }
   0x7   :  { %505 = vmatprep.subr.bf16.mxu0 %v544_v55  ;;  %528 = vmatprep.subr.bf16.mxu1 %v544_v55 }
   0x8   :  { %39 = vadd.xlane.f32.xlu0 %v452_v4  ;;  %47 = vadd.xlane.f32.xlu1 %v460_v5 }
   0xa   :  { %506 = vmatpush3.bf16.msra.mxu0 %v544_v55  ;;  %536 = vmatpush3.bf16.msra.mxu1 %v544_v55 }
   0xb   :  { %507 = vmatprep.subr.bf16.mxu0 %v545_v56  ;;  %529 = vmatprep.subr.bf16.mxu1 %v545_v56 }
   0xc   :  { %41 = vadd.xlane.f32.xlu0 %v455_v7  ;;  %43 = vadd.xlane.f32.xlu1 %v456_v8 }
   0xe   :  { %508 = vmatpush3.bf16.msra.mxu0 %v545_v56  ;;  %537 = vmatpush3.bf16.msra.mxu1 %v545_v56 }
   0xf   :  { %509 = vmatprep.subr.bf16.mxu0 %v546_v57  ;;  %530 = vmatprep.subr.bf16.mxu1 %v546_v57 }
  0x10   :  { %49 = vadd.xlane.f32.xlu0 %v463_v10  ;;  %51 = vadd.xlane.f32.xlu1 %v464_v11 }
  0x12   :  { %510 = vmatpush3.bf16.msra.mxu0 %v546_v57  ;;  %538 = vmatpush3.bf16.msra.mxu1 %v546_v57 }
  0x13   :  { %511 = vmatprep.subr.bf16.mxu0 %v547_v58  ;;  %531 = vmatprep.subr.bf16.mxu1 %v547_v58 }
  0x16   :  { %512 = vmatpush3.bf16.msra.mxu0 %v547_v58  ;;  %539 = vmatpush3.bf16.msra.mxu1 %v547_v58 }
  0x17   :  { %513 = vmatprep.subr.bf16.mxu0 %v548_v59  ;;  %532 = vmatprep.subr.bf16.mxu1 %v548_v59 }
  0x1a   :  { %514 = vmatpush3.bf16.msra.mxu0 %v548_v59  ;;  %540 = vmatpush3.bf16.msra.mxu1 %v548_v59 }
  0x1b   :  { %515 = vmatprep.subr.bf16.mxu0 %v549_v60  ;;  %533 = vmatprep.subr.bf16.mxu1 %v549_v60 }
  0x1e   :  { %516 = vmatpush3.bf16.msra.mxu0 %v549_v60  ;;  %541 = vmatpush3.bf16.msra.mxu1 %v549_v60 }
  0x1f   :  { %517 = vmatprep.subr.bf16.mxu0 %v550_v61  ;;  %534 = vmatprep.subr.bf16.mxu1 %v550_v61 }
  0x22   :  { %518 = vmatpush3.bf16.msra.mxu0 %v550_v61  ;;  %542 = vmatpush3.bf16.msra.mxu1 %v550_v61 }
  0x8d   :  { %v38_v14 = vpop.xlane.xlu0 %37  ;;  %v46_v15 = vpop.xlane.xlu1 %45 }
  0x8e   :  { %v53_v16 = vmul.f32 0.03125, %v38_v14  ;;  %v57_v17 = vmul.f32 0.03125, %v46_v15 }
  0x90   :  { %v61_v18 = vsub.f32 %v451_v2, %v53_v16  ;;  %v65_v19 = vsub.f32 %v459_v3, %v57_v17 }
  0x91   :  { %v40_v20 = vpop.xlane.xlu0 %39  ;;  %v48_v21 = vpop.xlane.xlu1 %47 }
  0x92   :  { %v54_v22 = vmul.f32 0.03125, %v40_v20  ;;  %v58_v23 = vmul.f32 0.03125, %v48_v21  ;;  %v642_v24 = vsel %vm71_vm0, %v61_v18, 0.0  ;;  %v645_v25 = vsel %vm71_vm0, %v65_v19, 0.0 }
  0x93   :  { %v80_v26 = vmul.f32 %v642_v24, %v642_v24  ;;  %v84_v31 = vmul.f32 %v645_v25, %v645_v25 }
  0x94   :  { %v62_v27 = vsub.f32 %v452_v4, %v54_v22  ;;  %v66_v28 = vsub.f32 %v460_v5, %v58_v23 }
  0x95   :  { %88 = vadd.xlane.f32.xlu0 %v80_v26  ;;  %v42_v29 = vpop.xlane.xlu0 %41  ;;  %v44_v30 = vpop.xlane.xlu1 %43  ;;  %v414_v26 = vld [vmem:[%s752_s1] ss:$0 sm:$0xff] }
  0x96   :  { %v55_v32 = vmul.f32 0.03125, %v42_v29  ;;  %v56_v33 = vmul.f32 0.03125, %v44_v30  ;;  %v652_v34 = vsel %vm71_vm0, %v62_v27, 0.0  ;;  %v655_v35 = vsel %vm71_vm0, %v66_v28, 0.0 }
  0x97   :  { %v81_v36 = vmul.f32 %v652_v34, %v652_v34  ;;  %v85_v41 = vmul.f32 %v655_v35, %v655_v35 }
  0x98   :  { %v63_v37 = vsub.f32 %v455_v7, %v55_v32  ;;  %v64_v38 = vsub.f32 %v456_v8, %v56_v33 }
  0x99   :  { %96 = vadd.xlane.f32.xlu0 %v84_v31  ;;  %90 = vadd.xlane.f32.xlu1 %v81_v36  ;;  %v50_v39 = vpop.xlane.xlu0 %49  ;;  %v52_v40 = vpop.xlane.xlu1 %51  ;;  %v415_v31 = vld [vmem:[%s753_s2] ss:$0 sm:$0xff] }
  0x9a   :  { %v59_v42 = vmul.f32 0.03125, %v50_v39  ;;  %v60_v43 = vmul.f32 0.03125, %v52_v40  ;;  %v662_v44 = vsel %vm71_vm0, %v63_v37, 0.0  ;;  %v665_v45 = vsel %vm71_vm0, %v64_v38, 0.0 }
  0x9b   :  { %v82_v46 = vmul.f32 %v662_v44, %v662_v44  ;;  %v83_v49 = vmul.f32 %v665_v45, %v665_v45 }
  0x9c   :  { %v67_v47 = vsub.f32 %v463_v10, %v59_v42  ;;  %v68_v48 = vsub.f32 %v464_v11, %v60_v43 }
  0x9d   :  { %98 = vadd.xlane.f32.xlu1 %v85_v41  ;;  %92 = vadd.xlane.f32.xlu0 %v82_v46 }
  0x9e   :  { %v672_v50 = vsel %vm71_vm0, %v67_v47, 0.0  ;;  %v675_v51 = vsel %vm71_vm0, %v68_v48, 0.0 }
  0x9f   :  { %v86_v52 = vmul.f32 %v672_v50, %v672_v50  ;;  %v87_v53 = vmul.f32 %v675_v51, %v675_v51 }
  0xa1   :  { %94 = vadd.xlane.f32.xlu1 %v83_v49  ;;  %100 = vadd.xlane.f32.xlu0 %v86_v52 }
  0xa5   :  { %102 = vadd.xlane.f32.xlu1 %v87_v53 }
 0x11e   :  { %v89_v62 = vpop.xlane.xlu0 %88 }
 0x11f   :  { %v104_v63 = vmul.f32 0.03125, %v89_v62 }
 0x121   :  { %v112_v0 = vadd.f32 1e-05, %v104_v63 }
 0x122   :  { %v91_v1 = vpop.xlane.xlu1 %90  ;;  %v97_v2 = vpop.xlane.xlu0 %96 }
 0x123   :  { %551 = vrsqrt.f32 %v112_v0  ;;  %v105_v3 = vmul.f32 0.03125, %v91_v1  ;;  %v108_v4 = vmul.f32 0.03125, %v97_v2 }
 0x125   :  { %v113_v5 = vadd.f32 1e-05, %v105_v3  ;;  %v116_v6 = vadd.f32 1e-05, %v108_v4 }
 0x126   :  { %v99_v7 = vpop.xlane.xlu1 %98  ;;  %v93_v8 = vpop.xlane.xlu0 %92 }
 0x127   :  { %553 = vrsqrt.f32 %v113_v5  ;;  %v109_v9 = vmul.f32 0.03125, %v99_v7  ;;  %v106_v10 = vmul.f32 0.03125, %v93_v8 }
 0x128   :  { %555 = vrsqrt.f32 %v116_v6 }
 0x129   :  { %v117_v11 = vadd.f32 1e-05, %v109_v9  ;;  %v114_v12 = vadd.f32 1e-05, %v106_v10 }
 0x12a   :  { %v95_v13 = vpop.xlane.xlu1 %94  ;;  %v101_v14 = vpop.xlane.xlu0 %100 }
 0x12b   :  { %557 = vrsqrt.f32 %v117_v11  ;;  %v107_v15 = vmul.f32 0.03125, %v95_v13  ;;  %v110_v16 = vmul.f32 0.03125, %v101_v14 }
 0x12c   :  { %559 = vrsqrt.f32 %v114_v12 }
 0x12d   :  { %v115_v17 = vadd.f32 1e-05, %v107_v15  ;;  %v118_v18 = vadd.f32 1e-05, %v110_v16 }
 0x12e   :  { %v103_v19 = vpop.xlane.xlu1 %102 }
 0x12f   :  { %561 = vrsqrt.f32 %v115_v17  ;;  %v111_v20 = vmul.f32 0.03125, %v103_v19 }
 0x130   :  { %v552_v21 = vpop.eup %551  ;;  %563 = vrsqrt.f32 %v118_v18 }
 0x131   :  { %v119_v22 = vadd.f32 1e-05, %v111_v20  ;;  %v128_v23 = vmul.f32 %v552_v21, %v642_v24 }
 0x133   :  { %565 = vrsqrt.f32 %v119_v22  ;;  %v143_v30 = vmul.f32 %v414_v26, %v128_v23 }
 0x134   :  { %v554_v27 = vpop.eup %553 }
 0x135   :  { %v556_v28 = vpop.eup %555  ;;  %v129_v29 = vmul.f32 %v554_v27, %v652_v34  ;;  %v158_v24 = vadd.f32 %v415_v31, %v143_v30 }
 0x136   :  { %v132_v32 = vmul.f32 %v556_v28, %v645_v25 }
 0x137   :  { %v144_v33 = vmul.f32 %v414_v26, %v129_v29 }
 0x138   :  { %v558_v36 = vpop.eup %557  ;;  %v147_v40 = vmul.f32 %v414_v26, %v132_v32 }
 0x139   :  { %v560_v37 = vpop.eup %559  ;;  %v159_v38 = vadd.f32 %v415_v31, %v144_v33  ;;  %v133_v39 = vmul.f32 %v558_v36, %v655_v35 }
 0x13a   :  { %v130_v41 = vmul.f32 %v560_v37, %v662_v44  ;;  %v162_v47 = vadd.f32 %v415_v31, %v147_v40 }
 0x13b   :  { %v166_v42 = vpack.c.bf16 %v159_v38, %v158_v24  ;;  %v148_v43 = vmul.f32 %v414_v26, %v133_v39 }
 0x13c   :  { %v562_v34 = vpop.eup %561  ;;  %v145_v25 = vmul.f32 %v414_v26, %v130_v41 }
 0x13d   :  { %v564_v46 = vpop.eup %563  ;;  %519 = vmatprep.mubr.bf16.mxu0 %v166_v42  ;;  %v163_v48 = vadd.f32 %v415_v31, %v148_v43  ;;  %v131_v49 = vmul.f32 %v562_v34, %v665_v45  ;;  %v416_v45 = vld [vmem:[%s754_s4] ss:$0 sm:$0xff] }
 0x13e   :  { %v134_v52 = vmul.f32 %v564_v46, %v672_v50  ;;  %v160_v35 = vadd.f32 %v415_v31, %v145_v25 }
 0x13f   :  { %v168_v53 = vpack.c.bf16 %v163_v48, %v162_v47  ;;  %v146_v54 = vmul.f32 %v414_v26, %v131_v49 }
 0x140   :  { %v566_v55 = vpop.eup %565  ;;  %v149_v57 = vmul.f32 %v414_v26, %v134_v52 }
 0x141   :  { %523 = vmatprep.mubr.bf16.mxu1 %v168_v53  ;;  %v161_v56 = vadd.f32 %v415_v31, %v146_v54  ;;  %v135_v44 = vmul.f32 %v566_v55, %v675_v51 }
 0x142   :  { %v164_v60 = vadd.f32 %v415_v31, %v149_v57 }
 0x143   :  { %v167_v58 = vpack.c.bf16 %v161_v56, %v160_v35  ;;  %v150_v59 = vmul.f32 %v414_v26, %v135_v44 }
 0x145   :  { %520 = vmatmul.mubr.bf16.vlgmr.msra.gmra.mxu0 %v167_v58  ;;  %v165_v61 = vadd.f32 %v415_v31, %v150_v59 }
 0x147   :  { %v169_v62 = vpack.c.bf16 %v165_v61, %v164_v60 }
 0x149   :  { %524 = vmatmul.mubr.bf16.vlgmr.msra.gmra.mxu1 %v169_v62 }
 0x205   :  { %v521_v50 = vpop.f32.mrf.mxu0 }
 0x206   :  { %v722_v63 = vadd.f32 %v521_v50, %v416_v45 }
 0x207   :  { %v275_v0 = vpop.f32.mrf.mxu0 }
 0x208   :  { %v427_v1 = vmul.f32 -1.702, %v722_v63  ;;  %v725_v2 = vadd.f32 %v416_v45, %v275_v0 }
 0x209   :  { %v522_v51 = vpop.f32.mrf.mxu0  ;;  %v525_v3 = vpop.f32.mrf.mxu1 }
 0x20a   :  { %v326_v4 = vmul.f32 1.442695, %v427_v1  ;;  %v425_v5 = vmul.f32 -1.702, %v725_v2  ;;  %v287_v6 = vadd.f32 %v522_v51, %v416_v45  ;;  %v728_v7 = vadd.f32 %v525_v3, %v416_v45 }
 0x20b   :  { %v278_v8 = vpop.f32.mrf.mxu0  ;;  %v291_v9 = vpop.f32.mrf.mxu1 }
 0x20c   :  { %567 = vpow2.f32 %v326_v4  ;;  %v322_v10 = vmul.f32 1.442695, %v425_v5  ;;  %v428_v11 = vmul.f32 -1.702, %v287_v6  ;;  %v431_v12 = vmul.f32 -1.702, %v728_v7 }
 0x20d   :  { %v279_v13 = vadd.f32 %v416_v45, %v278_v8  ;;  %v731_v14 = vadd.f32 %v416_v45, %v291_v9  ;;  %v526_v15 = vpop.f32.mrf.mxu1 }
 0x20e   :  { %569 = vpow2.f32 %v322_v10  ;;  %v328_v16 = vmul.f32 1.442695, %v428_v11  ;;  %v334_v17 = vmul.f32 1.442695, %v431_v12  ;;  %v303_v18 = vadd.f32 %v526_v15, %v416_v45 }
 0x20f   :  { %v426_v19 = vmul.f32 -1.702, %v279_v13  ;;  %v429_v20 = vmul.f32 -1.702, %v731_v14  ;;  %v294_v21 = vpop.f32.mrf.mxu1 }
 0x210   :  { %571 = vpow2.f32 %v328_v16  ;;  %v432_v22 = vmul.f32 -1.702, %v303_v18  ;;  %v295_v23 = vadd.f32 %v416_v45, %v294_v21 }
 0x211   :  { %573 = vpow2.f32 %v334_v17  ;;  %v324_v26 = vmul.f32 1.442695, %v426_v19  ;;  %v330_v27 = vmul.f32 1.442695, %v429_v20 }
 0x212   :  { %v336_v28 = vmul.f32 1.442695, %v432_v22  ;;  %v430_v29 = vmul.f32 -1.702, %v295_v23 }
 0x213   :  { %575 = vpow2.f32 %v324_v26 }
 0x214   :  { %577 = vpow2.f32 %v330_v27  ;;  %v332_v30 = vmul.f32 1.442695, %v430_v29 }
 0x215   :  { %579 = vpow2.f32 %v336_v28 }
 0x216   :  { %581 = vpow2.f32 %v332_v30 }
 0x219   :  { %v568_v31 = vpop.eup %567 }
 0x21a   :  { %v340_v32 = vadd.f32 1.0, %v568_v31 }
 0x21b   :  { %v570_v33 = vpop.eup %569 }
 0x21c   :  { %v338_v37 = vadd.f32 1.0, %v570_v33  ;;  %583 = vrcp.f32 %v340_v32 }
 0x21d   :  { %v572_v36 = vpop.eup %571 }
 0x21e   :  { %v574_v24 = vpop.eup %573  ;;  %v341_v38 = vadd.f32 1.0, %v572_v36 }
 0x21f   :  { %v344_v39 = vadd.f32 1.0, %v574_v24 }
 0x220   :  { %v576_v40 = vpop.eup %575  ;;  %585 = vrcp.f32 %v341_v38 }
 0x221   :  { %v578_v41 = vpop.eup %577  ;;  %587 = vrcp.f32 %v338_v37  ;;  %v339_v42 = vadd.f32 1.0, %v576_v40 }
 0x222   :  { %v580_v43 = vpop.eup %579  ;;  %589 = vrcp.f32 %v344_v39  ;;  %v342_v34 = vadd.f32 1.0, %v578_v41 }
 0x223   :  { %v582_v46 = vpop.eup %581  ;;  %591 = vrcp.f32 %v339_v42  ;;  %v345_v47 = vadd.f32 1.0, %v580_v43 }
 0x224   :  { %593 = vrcp.f32 %v342_v34  ;;  %v343_v48 = vadd.f32 1.0, %v582_v46 }
 0x225   :  { %595 = vrcp.f32 %v345_v47 }
 0x226   :  { %597 = vrcp.f32 %v343_v48 }
 0x229   :  { %v584_v49 = vpop.eup %583 }
 0x22a   :  { %v364_v53 = vmul.f32 %v584_v49, %v722_v63 }
 0x22d   :  { %v586_v25 = vpop.eup %585 }
 0x22e   :  { %v588_v52 = vpop.eup %587  ;;  %v365_v54 = vmul.f32 %v586_v25, %v287_v6 }
 0x22f   :  { %v590_v55 = vpop.eup %589  ;;  %v362_v57 = vmul.f32 %v588_v52, %v725_v2 }
 0x230   :  { %v592_v35 = vpop.eup %591  ;;  %v473_v56 = vpack.c.bf16 %v365_v54, %v364_v53  ;;  %v368_v61 = vmul.f32 %v590_v55, %v728_v7 }
 0x231   :  { %v594_v44 = vpop.eup %593  ;;  %v363_v58 = vmul.f32 %v592_v35, %v279_v13 }
 0x232   :  { %v596_v59 = vpop.eup %595  ;;  %488 = vst [vmem:[%s755_s5 + $0x8] sm:$0xff] %v473_v56   ;;  %v366_v50 = vmul.f32 %v594_v44, %v731_v14 }
 0x233   :  { %v598_v60 = vpop.eup %597  ;;  %v468_v62 = vpack.c.bf16 %v363_v58, %v362_v57  ;;  %v369_v45 = vmul.f32 %v596_v59, %v303_v18 }
 0x234   :  { %v367_v63 = vmul.f32 %v598_v60, %v295_v23 }
 0x235   :  { %469 = vst [vmem:[%s755_s5] sm:$0xff] %v468_v62   ;;  %v483_v0 = vpack.c.bf16 %v369_v45, %v368_v61 }
 0x236   :  { %v478_v1 = vpack.c.bf16 %v367_v63, %v366_v50 }
 0x237   :  { %490 = vst [vmem:[%s755_s5 + $0x18] sm:$0xff] %v483_v0  }
 0x238   :  { %489 = vst [vmem:[%s755_s5 + $0x10] sm:$0xff] %v478_v1  }

// kernel: custom_clip_forward.48
= control target key start
LH: loop header
LB: loop body
LE: loop exit
PB: predicated region body
PF: predicated region fallthrough
CT: control target
= control target key end

     0   :  { %v212_v2 = vmov 0.0   ;;  %v24_v5 = vlaneseq  ;;  %vm213_vm1 = vmmov 0   ;;  %s275_s0 = inlined_call_operand.vmem [shape: bf16[8,128], index: 0, kind: input, shape index: {}]   ;;  %s276_s3 = inlined_call_operand.vmem [shape: bf16[128,128], index: 3, kind: input, shape index: {}]   ;;  %s277_s1 = inlined_call_operand.vmem [shape: f32[1,128], index: 1, kind: input, shape index: {}]   ;;  %s278_s2 = inlined_call_operand.vmem [shape: f32[1,128], index: 2, kind: input, shape index: {}]   ;;  %s279_s4 = inlined_call_operand.vmem [shape: f32[8,128], index: 4, kind: output, shape index: {}]  }
   0x1   :  { %v18_v0 = vld [vmem:[%s275_s0] sm:$0xf]  ;;  %180 = vmatprep.subr.bf16.mxu0 %v212_v2  ;;  %v202_v3 = vld [vmem:[%s276_s3 + $0x38] sm:$0xff]   ;;  %v203_v4 = vld [vmem:[%s276_s3 + $0x30] sm:$0xff]   ;;  %196 = vmatprep.mubr.msk.bf16.mxu0 %vm213_vm1, %v212_v2 }
   0x2   :  { %v19_v1 = vunpack.c.l.bf16 %v18_v0  ;;  %181 = vmatpush3.bf16.msra.mxu0 %v202_v3  ;;  %v25_v6 = vand.u32 127, %v24_v5  ;;  %v204_v12 = vld [vmem:[%s276_s3 + $0x28] sm:$0xff]   ;;  %v205_v13 = vld [vmem:[%s276_s3 + $0x20] sm:$0xff]   ;;  %v206_v14 = vld [vmem:[%s276_s3 + $0x18] sm:$0xff]  }
   0x3   :  { %182 = vmatprep.subr.bf16.mxu0 %v212_v2  ;;  %v207_v15 = vld [vmem:[%s276_s3 + $0x10] sm:$0xff]   ;;  %v208_v16 = vld [vmem:[%s276_s3 + $0x8] sm:$0xff]   ;;  %v209_v17 = vld [vmem:[%s276_s3] sm:$0xff]  }
   0x4   :  { %20 = vadd.xlane.f32.xlu0 %v19_v1  ;;  %vm26_vm0 = vcmp.lt.s32.totalorder %v25_v6, 32  ;;  %v161_v22 = vld [vmem:[%s277_s1] ss:$0 sm:$0xff] }
   0x5   :  { %v162_v24 = vld [vmem:[%s278_s2] ss:$0 sm:$0xff] }
   0x6   :  { %183 = vmatpush3.bf16.msra.mxu0 %v203_v4 }
   0x7   :  { %184 = vmatprep.subr.bf16.mxu0 %v212_v2 }
   0xa   :  { %185 = vmatpush3.bf16.msra.mxu0 %v204_v12 }
   0xb   :  { %186 = vmatprep.subr.bf16.mxu0 %v212_v2 }
   0xe   :  { %187 = vmatpush3.bf16.msra.mxu0 %v205_v13 }
   0xf   :  { %188 = vmatprep.subr.bf16.mxu0 %v212_v2 }
  0x12   :  { %189 = vmatpush3.bf16.msra.mxu0 %v206_v14 }
  0x13   :  { %190 = vmatprep.subr.bf16.mxu0 %v212_v2 }
  0x16   :  { %191 = vmatpush3.bf16.msra.mxu0 %v207_v15 }
  0x17   :  { %192 = vmatprep.subr.bf16.mxu0 %v212_v2 }
  0x1a   :  { %193 = vmatpush3.bf16.msra.mxu0 %v208_v16 }
  0x1b   :  { %194 = vmatprep.subr.bf16.mxu0 %v212_v2 }
  0x1e   :  { %195 = vmatpush3.bf16.msra.mxu0 %v209_v17 }
  0x8d   :  { %v21_v7 = vpop.xlane.xlu0 %20 }
  0x8e   :  { %v22_v8 = vmul.f32 0.03125, %v21_v7 }
  0x90   :  { %v23_v9 = vsub.f32 %v19_v1, %v22_v8 }
  0x92   :  { %v27_v10 = vsel %vm26_vm0, %v23_v9, 0.0 }
  0x93   :  { %v28_v11 = vmul.f32 %v27_v10, %v27_v10 }
  0x95   :  { %29 = vadd.xlane.f32.xlu0 %v28_v11 }
 0x11e   :  { %v30_v18 = vpop.xlane.xlu0 %29 }
 0x11f   :  { %v31_v19 = vmul.f32 0.03125, %v30_v18 }
 0x121   :  { %v32_v20 = vadd.f32 1e-05, %v31_v19 }
 0x123   :  { %210 = vrsqrt.f32 %v32_v20 }
 0x130   :  { %v211_v21 = vpop.eup %210 }
 0x131   :  { %v34_v23 = vmul.f32 %v211_v21, %v27_v10 }
 0x133   :  { %v42_v25 = vmul.f32 %v161_v22, %v34_v23 }
 0x135   :  { %v50_v26 = vadd.f32 %v162_v24, %v42_v25 }
 0x137   :  { %v51_v27 = vpack.c.bf16 %v50_v26, %v50_v26 }
 0x139   :  { %197 = vmatmul.mubr.bf16.vlgmr.msra.gmra.mxu0 %v51_v27 }
 0x1f9   :  { %v150_v28 = vpop.f32.mrf.mxu0 }
 0x1fa   :  { %156 = vst [vmem:[%s279_s4] sm:$0xff] %v150_v28 }
 0x1fb   :  { %v198_v29 = vpop.f32.mrf.mxu0 }
 0x1fd   :  { %v153_v30 = vpop.f32.mrf.mxu0 }
 0x1ff   :  { %v199_v31 = vpop.f32.mrf.mxu0 }

// kernel: custom_clip_forward.25
= control target key start
LH: loop header
LB: loop body
LE: loop exit
PB: predicated region body
PF: predicated region fallthrough
CT: control target
= control target key end

     0   :  { %s321_s1 = inlined_call_operand.vmem [shape: bf16[256,128], index: 1, kind: input, shape index: {}]   ;;  %s322_s0 = inlined_call_operand.vmem [shape: bf16[8,256], index: 0, kind: input, shape index: {}]   ;;  %s323_s2 = inlined_call_operand.vmem [shape: bf16[8,128], index: 2, kind: output, shape index: {}]  }
   0x1   :  { %v234_v0 = vld [vmem:[%s321_s1 + $0x78] sm:$0xff]   ;;  %v236_v2 = vld [vmem:[%s321_s1 + $0x70] sm:$0xff]   ;;  %v238_v4 = vld [vmem:[%s321_s1 + $0x68] sm:$0xff]  }
   0x2   :  { %v235_v1 = vld [vmem:[%s321_s1 + $0x38] sm:$0xff]   ;;  %212 = vmatprep.subr.bf16.mxu0 %v234_v0  ;;  %v237_v3 = vld [vmem:[%s321_s1 + $0x30] sm:$0xff]   ;;  %v239_v5 = vld [vmem:[%s321_s1 + $0x28] sm:$0xff]  }
   0x3   :  { %213 = vmatpush3.bf16.msra.mxu0 %v235_v1  ;;  %v240_v6 = vld [vmem:[%s321_s1 + $0x60] sm:$0xff]   ;;  %v242_v8 = vld [vmem:[%s321_s1 + $0x58] sm:$0xff]   ;;  %v244_v10 = vld [vmem:[%s321_s1 + $0x50] sm:$0xff]  }
   0x4   :  { %214 = vmatprep.subr.bf16.mxu0 %v236_v2  ;;  %v241_v7 = vld [vmem:[%s321_s1 + $0x20] sm:$0xff]   ;;  %v243_v9 = vld [vmem:[%s321_s1 + $0x18] sm:$0xff]   ;;  %v245_v13 = vld [vmem:[%s321_s1 + $0x10] sm:$0xff]  }
   0x5   :  { %v12_v11 = vld [vmem:[%s322_s0] sm:$0xff]  ;;  %v246_v14 = vld [vmem:[%s321_s1 + $0x48] sm:$0xff]  }
   0x6   :  { %v195_v12 = vcombine.high %v12_v11, %v12_v11  ;;  %v247_v15 = vld [vmem:[%s321_s1 + $0x8] sm:$0xff]   ;;  %v248_v16 = vld [vmem:[%s321_s1 + $0x40] sm:$0xff]   ;;  %v194_v18 = vcombine.low %v12_v11, %v12_v11 }
   0x7   :  { %215 = vmatpush3.bf16.msra.mxu0 %v237_v3  ;;  %v249_v17 = vld [vmem:[%s321_s1] sm:$0xff]  }
   0x8   :  { %216 = vmatprep.subr.bf16.mxu0 %v238_v4  ;;  %180 = vmatprep.mubr.bf16.mxu0 %v195_v12 }
   0xb   :  { %217 = vmatpush3.bf16.msra.mxu0 %v239_v5 }
   0xc   :  { %218 = vmatprep.subr.bf16.mxu0 %v240_v6 }
   0xf   :  { %219 = vmatpush3.bf16.msra.mxu0 %v241_v7 }
  0x10   :  { %220 = vmatprep.subr.bf16.mxu0 %v242_v8 }
  0x13   :  { %221 = vmatpush3.bf16.msra.mxu0 %v243_v9 }
  0x14   :  { %222 = vmatprep.subr.bf16.mxu0 %v244_v10 }
  0x17   :  { %223 = vmatpush3.bf16.msra.mxu0 %v245_v13 }
  0x18   :  { %224 = vmatprep.subr.bf16.mxu0 %v246_v14 }
  0x1b   :  { %225 = vmatpush3.bf16.msra.mxu0 %v247_v15 }
  0x1c   :  { %226 = vmatprep.subr.bf16.mxu0 %v248_v16 }
  0x1f   :  { %227 = vmatpush3.bf16.msra.mxu0 %v249_v17 }
  0x22   :  { %181 = vmatmul.mubr.bf16.vlgmr.msra.gmra.mxu0 %v194_v18 }
  0xe2   :  { %v228_v19 = vpop.f32.mrf.mxu0 }
  0xe4   :  { %v229_v20 = vpop.f32.mrf.mxu0 }
  0xe5   :  { %v230_v21 = vadd.f32 %v229_v20, %v228_v19 }
  0xe6   :  { %v231_v22 = vpop.f32.mrf.mxu0 }
  0xe7   :  { %v188_v23 = vpack.c.bf16 %v230_v21, %v230_v21 }
  0xe8   :  { %v232_v24 = vpop.f32.mrf.mxu0 }
  0xe9   :  { %189 = vst [vmem:[%s323_s2] sm:$0xf] %v188_v23 }

// kernel: custom_clip_forward.26
= control target key start
LH: loop header
LB: loop body
LE: loop exit
PB: predicated region body
PF: predicated region fallthrough
CT: control target
= control target key end

     0   :  { %v26_v3 = vlaneseq  ;;  %s128_s0 = inlined_call_operand.vmem [shape: bf16[16,128], index: 0, kind: input, shape index: {}]   ;;  %s129_s1 = inlined_call_operand.vmem [shape: f32[1,128], index: 1, kind: input, shape index: {}]   ;;  %s130_s2 = inlined_call_operand.vmem [shape: f32[1,128], index: 2, kind: input, shape index: {}]   ;;  %s131_s3 = inlined_call_operand.vmem [shape: bf16[16,128], index: 3, kind: output, shape index: {}]  }
   0x1   :  { %v84_v0 = vld [vmem:[%s128_s0] sm:$0xff]  }
   0x2   :  { %v85_v1 = vunpack.c.l.bf16 %v84_v0  ;;  %v86_v2 = vunpack.c.h.bf16 %v84_v0  ;;  %v27_v4 = vand.u32 127, %v26_v3  ;;  %v77_v23 = vld [vmem:[%s129_s1] ss:$0 sm:$0xff] }
   0x3   :  { %v78_v27 = vld [vmem:[%s130_s2] ss:$0 sm:$0xff] }
   0x4   :  { %18 = vadd.xlane.f32.xlu0 %v85_v1  ;;  %vm28_vm0 = vcmp.lt.s32.totalorder %v27_v4, 32 }
   0x8   :  { %20 = vadd.xlane.f32.xlu0 %v86_v2 }
  0x8d   :  { %v19_v5 = vpop.xlane.xlu0 %18 }
  0x8e   :  { %v22_v6 = vmul.f32 0.03125, %v19_v5 }
  0x90   :  { %v24_v7 = vsub.f32 %v85_v1, %v22_v6 }
  0x91   :  { %v21_v8 = vpop.xlane.xlu0 %20 }
  0x92   :  { %v23_v9 = vmul.f32 0.03125, %v21_v8  ;;  %v29_v10 = vsel %vm28_vm0, %v24_v7, 0.0 }
  0x93   :  { %v31_v11 = vmul.f32 %v29_v10, %v29_v10 }
  0x94   :  { %v25_v12 = vsub.f32 %v86_v2, %v23_v9 }
  0x95   :  { %33 = vadd.xlane.f32.xlu1 %v31_v11 }
  0x96   :  { %v30_v13 = vsel %vm28_vm0, %v25_v12, 0.0 }
  0x97   :  { %v32_v14 = vmul.f32 %v30_v13, %v30_v13 }
  0x99   :  { %35 = vadd.xlane.f32.xlu1 %v32_v14 }
 0x11e   :  { %v34_v15 = vpop.xlane.xlu1 %33 }
 0x11f   :  { %v37_v16 = vmul.f32 0.03125, %v34_v15 }
 0x121   :  { %v39_v17 = vadd.f32 1e-05, %v37_v16 }
 0x122   :  { %v36_v18 = vpop.xlane.xlu1 %35 }
 0x123   :  { %92 = vrsqrt.f32 %v39_v17  ;;  %v38_v19 = vmul.f32 0.03125, %v36_v18 }
 0x125   :  { %v40_v20 = vadd.f32 1e-05, %v38_v19 }
 0x127   :  { %94 = vrsqrt.f32 %v40_v20 }
 0x130   :  { %v93_v21 = vpop.eup %92 }
 0x131   :  { %v43_v22 = vmul.f32 %v93_v21, %v29_v10 }
 0x133   :  { %v52_v25 = vmul.f32 %v77_v23, %v43_v22 }
 0x134   :  { %v95_v24 = vpop.eup %94 }
 0x135   :  { %v44_v26 = vmul.f32 %v95_v24, %v30_v13  ;;  %v61_v29 = vadd.f32 %v78_v27, %v52_v25 }
 0x137   :  { %v53_v28 = vmul.f32 %v77_v23, %v44_v26 }
 0x139   :  { %v62_v30 = vadd.f32 %v78_v27, %v53_v28 }
 0x13b   :  { %v90_v31 = vpack.c.bf16 %v62_v30, %v61_v29 }
 0x13d   :  { %91 = vst [vmem:[%s131_s3] sm:$0xff] %v90_v31  }

// kernel: custom_clip_forward.27
= control target key start
LH: loop header
LB: loop body
LE: loop exit
PB: predicated region body
PF: predicated region fallthrough
CT: control target
= control target key end

     0   :  { %v264_v3 = vmov 0.0   ;;  %v33_v5 = vlaneseq  ;;  %vm265_vm1 = vmmov 0   ;;  %s335_s0 = inlined_call_operand.vmem [shape: bf16[16,128], index: 0, kind: input, shape index: {}]   ;;  %s336_s3 = inlined_call_operand.vmem [shape: bf16[128,128], index: 3, kind: input, shape index: {}]   ;;  %s337_s1 = inlined_call_operand.vmem [shape: f32[1,128], index: 1, kind: input, shape index: {}]   ;;  %s338_s2 = inlined_call_operand.vmem [shape: f32[1,128], index: 2, kind: input, shape index: {}]   ;;  %s339_s4 = inlined_call_operand.vmem [shape: f32[1,128], index: 4, kind: input, shape index: {}]   ;;  %s340_s5 = inlined_call_operand.vmem [shape: bf16[16,128], index: 5, kind: output, shape index: {}]  }
   0x1   :  { %v213_v0 = vld [vmem:[%s335_s0] sm:$0xff]   ;;  %230 = vmatprep.subr.bf16.mxu0 %v264_v3  ;;  %v252_v4 = vld [vmem:[%s336_s3 + $0x38] sm:$0xff]   ;;  %v253_v17 = vld [vmem:[%s336_s3 + $0x30] sm:$0xff]   ;;  %246 = vmatprep.mubr.msk.bf16.mxu0 %vm265_vm1, %v264_v3 }
   0x2   :  { %v214_v1 = vunpack.c.l.bf16 %v213_v0  ;;  %v215_v2 = vunpack.c.h.bf16 %v213_v0  ;;  %231 = vmatpush3.bf16.msra.mxu0 %v252_v4  ;;  %v34_v6 = vand.u32 127, %v33_v5  ;;  %v254_v18 = vld [vmem:[%s336_s3 + $0x28] sm:$0xff]   ;;  %v255_v19 = vld [vmem:[%s336_s3 + $0x20] sm:$0xff]   ;;  %v256_v20 = vld [vmem:[%s336_s3 + $0x18] sm:$0xff]  }
   0x3   :  { %232 = vmatprep.subr.bf16.mxu0 %v264_v3  ;;  %v257_v21 = vld [vmem:[%s336_s3 + $0x10] sm:$0xff]   ;;  %v258_v22 = vld [vmem:[%s336_s3 + $0x8] sm:$0xff]   ;;  %v259_v23 = vld [vmem:[%s336_s3] sm:$0xff]  }
   0x4   :  { %25 = vadd.xlane.f32.xlu0 %v214_v1  ;;  %vm35_vm0 = vcmp.lt.s32.totalorder %v34_v6, 32  ;;  %v197_v32 = vld [vmem:[%s337_s1] ss:$0 sm:$0xff] }
   0x5   :  { %v198_v36 = vld [vmem:[%s338_s2] ss:$0 sm:$0xff] }
   0x6   :  { %233 = vmatpush3.bf16.msra.mxu0 %v253_v17  ;;  %v199_v42 = vld [vmem:[%s339_s4] ss:$0 sm:$0xff] }
   0x7   :  { %234 = vmatprep.subr.bf16.mxu0 %v264_v3 }
   0x8   :  { %27 = vadd.xlane.f32.xlu0 %v215_v2 }
   0xa   :  { %235 = vmatpush3.bf16.msra.mxu0 %v254_v18 }
   0xb   :  { %236 = vmatprep.subr.bf16.mxu0 %v264_v3 }
   0xe   :  { %237 = vmatpush3.bf16.msra.mxu0 %v255_v19 }
   0xf   :  { %238 = vmatprep.subr.bf16.mxu0 %v264_v3 }
  0x12   :  { %239 = vmatpush3.bf16.msra.mxu0 %v256_v20 }
  0x13   :  { %240 = vmatprep.subr.bf16.mxu0 %v264_v3 }
  0x16   :  { %241 = vmatpush3.bf16.msra.mxu0 %v257_v21 }
  0x17   :  { %242 = vmatprep.subr.bf16.mxu0 %v264_v3 }
  0x1a   :  { %243 = vmatpush3.bf16.msra.mxu0 %v258_v22 }
  0x1b   :  { %244 = vmatprep.subr.bf16.mxu0 %v264_v3 }
  0x1e   :  { %245 = vmatpush3.bf16.msra.mxu0 %v259_v23 }
  0x8d   :  { %v26_v7 = vpop.xlane.xlu0 %25 }
  0x8e   :  { %v29_v8 = vmul.f32 0.03125, %v26_v7 }
  0x90   :  { %v31_v9 = vsub.f32 %v214_v1, %v29_v8 }
  0x91   :  { %v28_v10 = vpop.xlane.xlu0 %27 }
  0x92   :  { %v30_v11 = vmul.f32 0.03125, %v28_v10  ;;  %v36_v12 = vsel %vm35_vm0, %v31_v9, 0.0 }
  0x93   :  { %v38_v13 = vmul.f32 %v36_v12, %v36_v12 }
  0x94   :  { %v32_v14 = vsub.f32 %v215_v2, %v30_v11 }
  0x95   :  { %40 = vadd.xlane.f32.xlu1 %v38_v13 }
  0x96   :  { %v37_v15 = vsel %vm35_vm0, %v32_v14, 0.0 }
  0x97   :  { %v39_v16 = vmul.f32 %v37_v15, %v37_v15 }
  0x99   :  { %42 = vadd.xlane.f32.xlu1 %v39_v16 }
 0x11e   :  { %v41_v24 = vpop.xlane.xlu1 %40 }
 0x11f   :  { %v44_v25 = vmul.f32 0.03125, %v41_v24 }
 0x121   :  { %v46_v26 = vadd.f32 1e-05, %v44_v25 }
 0x122   :  { %v43_v27 = vpop.xlane.xlu1 %42 }
 0x123   :  { %260 = vrsqrt.f32 %v46_v26  ;;  %v45_v28 = vmul.f32 0.03125, %v43_v27 }
 0x125   :  { %v47_v29 = vadd.f32 1e-05, %v45_v28 }
 0x127   :  { %262 = vrsqrt.f32 %v47_v29 }
 0x130   :  { %v261_v30 = vpop.eup %260 }
 0x131   :  { %v50_v31 = vmul.f32 %v261_v30, %v36_v12 }
 0x133   :  { %v59_v35 = vmul.f32 %v197_v32, %v50_v31 }
 0x134   :  { %v263_v33 = vpop.eup %262 }
 0x135   :  { %v51_v34 = vmul.f32 %v263_v33, %v37_v15  ;;  %v68_v38 = vadd.f32 %v198_v36, %v59_v35 }
 0x137   :  { %v60_v37 = vmul.f32 %v197_v32, %v51_v34 }
 0x139   :  { %v69_v39 = vadd.f32 %v198_v36, %v60_v37 }
 0x13b   :  { %v70_v40 = vpack.c.bf16 %v69_v39, %v68_v38 }
 0x13d   :  { %247 = vmatmul.mubr.bf16.vlgmr.msra.gmra.mxu0 %v70_v40 }
 0x1fd   :  { %v176_v41 = vpop.f32.mrf.mxu0 }
 0x1fe   :  { %v177_v45 = vadd.f32 %v199_v42, %v176_v41 }
 0x1ff   :  { %v248_v43 = vpop.f32.mrf.mxu0 }
 0x201   :  { %v179_v44 = vpop.f32.mrf.mxu0 }
 0x202   :  { %v180_v46 = vadd.f32 %v199_v42, %v179_v44 }
 0x203   :  { %v249_v47 = vpop.f32.mrf.mxu0 }
 0x204   :  { %v219_v48 = vpack.c.bf16 %v180_v46, %v177_v45 }
 0x206   :  { %220 = vst [vmem:[%s340_s5] sm:$0xff] %v219_v48  }

// kernel: custom_clip_forward.28
= control target key start
LH: loop header
LB: loop body
LE: loop exit
PB: predicated region body
PF: predicated region fallthrough
CT: control target
= control target key end

     0   :  { %s359_s6 = smov 0   ;;  %s380_s0 = inlined_call_operand.vmem [shape: bf16[8,3,5,8], index: 0, kind: input, shape index: {}]   ;;  %s381_s1 = inlined_call_operand.vmem [shape: bf16[8,5,8], index: 1, kind: output, shape index: {}]  }
   0x1 LB: > { %s293_s7 = sadd.s32 4294967295, %s344_s6   ;;  %p297_p0 = scmp.ge.s32.totalorder %s344_s6, 1  ;;  %s344_s6 = sphi %s359_s6, %s11_s6  }
   0x2   : > { %p87_p1 = scmp.lt.s32.totalorder %s344_s6, 9 }
   0x4   : > { %p88_p2 = pnand %p297_p0, %p87_p1 }
   0x5   : > { %p106_p3 = scmp.lt.s32.totalorder (!%p88_p2), %s293_s7, 7 }
   0x6   : > { %91 = sbr.rel (%p88_p2) target bundleno = 732 (0x2dc), region = 24 }
   0xb   : > { %v346_v0 = vmov 0.0   ;;  %vm347_vm0 = vmmov 0   ;;  %s383_s7 = smov (!%p106_p3, %s293_s7), 7  ;;  %vm121_vm1 = vcmask 64512   ;;  %vm169_vm2 = vcmask 36864  }
   0xc   : > { %310 = vmatprep.subr.bf16.mxu0 %v346_v0  ;;  %312 = vmatprep.mubr.msk.bf16.mxu0 %vm347_vm0, %v346_v0  ;;  %s322_s8 = smul.u32 12, %s383_s7  ;;  %vm186_vm3 = vcmask 1041408   ;;  %vm187_vm4 = vcmask 1042432   ;;  %v348_v16 = vmov 65535   ;;  %vm182_vm5 = vcmask 39936   ;;  %s299_s12 = sshll.u32 %s383_s7, 2 }
   0xd   : > { %316 = vmatprep.subr.bf16.mxu1 %v346_v0  ;;  %318 = vmatprep.mubr.msk.bf16.mxu1 %vm347_vm0, %v346_v0  ;;  %v188_v17 = vsel %vm186_vm3, 4294967295, %v348_v16  ;;  %s114_s15 = scalar_lea.vmem %s381_s1, %s299_s12  ;;  %vm234_vm6 = vcmask 59392   ;;  %vm235_vm7 = vsmask.f32 2304 }
   0xe   : > { %s110_s11 = scalar_lea.vmem %s380_s0, %s322_s8  ;;  %v189_v18 = vsel %vm187_vm4, %v188_v17, 0  ;;  %vm236_vm8 = vmand %vm234_vm6, %vm235_vm7  ;;  %v237_v25 = vld [vmem:[%s114_s15] sm:$0x7] }
   0xf   : > { %v300_v1 = vld [vmem:[%s110_s11 + $0x4] sm:$0x7]  ;;  %v116_v3 = vld [vmem:[%s110_s11] sm:$0x7]  ;;  %v301_v15 = vld [vmem:[%s110_s11 + $0x8] sm:$0x7] }
  0x10   : > { %v126_v2 = vsel %vm121_vm1, %v300_v1, 0  ;;  %v191_v19 = vand.u32 %v301_v15, %v189_v18 }
  0x11   : > { %311 = vmatpush3.bf16.xpose.msra.mxu0 %v126_v2 }
  0x12   : > { %317 = vmatpush3.bf16.msra.mxu1 %v191_v19 }
  0x18   : > { %313 = vmatmul.mubr.msk.bf16.vlgmr.msra.gmra.mxu0 %vm121_vm1, %v116_v3 }
  0xd8   : > { %v162_v4 = vpop.f32.mrf.mxu0 }
  0xd9   : > { %v168_v5 = vmul.f32 0.35355338, %v162_v4 }
  0xda   : > { %v314_v6 = vpop.f32.mrf.mxu0 }
  0xdb   : > { %v170_v7 = vsel %vm169_vm2, %v168_v5, -inf }
  0xdc   : > { %171 = vmax.xlane.f32.xlu0 %v170_v7  ;;  %v165_v8 = vpop.f32.mrf.mxu0 }
  0xde   : > { %v315_v9 = vpop.f32.mrf.mxu0 }
 0x165   : > { %v172_v10 = vpop.xlane.xlu0 %171 }
 0x166   : > { %v173_v11 = vsub.f32 %v168_v5, %v172_v10 }
 0x168   : > { %v174_v12 = vmul.f32 1.442695, %v173_v11 }
 0x16a   : > { %334 = vpow2.f32 %v174_v12 }
 0x177   : > { %v335_v13 = vpop.eup %334 }
 0x178   : > { %v176_v14 = vsel %vm169_vm2, %v335_v13, 0.0 }
 0x179   : > { %177 = vadd.xlane.f32.xlu0 %v176_v14 }
 0x202   : > { %v178_v20 = vpop.xlane.xlu0 %177 }
 0x203   : > { %336 = vrcp.f32 %v178_v20 }
 0x210   : > { %v337_v21 = vpop.eup %336 }
 0x211   : > { %v180_v22 = vmul.f32 %v337_v21, %v335_v13 }
 0x213   : > { %v181_v23 = vpack.c.bf16 %v180_v22, %v180_v22 }
 0x215   : > { %319 = vmatmul.mubr.msk.bf16.vlgmr.msra.gmra.mxu1 %vm182_vm5, %v181_v23 }
 0x2d5   : > { %v227_v24 = vpop.f32.mrf.mxu1 }
 0x2d6   : > { %v233_v26 = vpack.c.bf16 %v227_v24, %v227_v24 }
 0x2d7   : > { %v320_v27 = vpop.f32.mrf.mxu1 }
 0x2d8   : > { %v238_v28 = vsel %vm236_vm8, %v233_v26, %v237_v25 }
 0x2d9   : > { %239 = vst [vmem:[%s114_s15] sm:$0x7] %v238_v28  ;;  %v230_v29 = vpop.f32.mrf.mxu1 }
 0x2db   : > { %v321_v30 = vpop.f32.mrf.mxu1 }
 0x2dc PF: > { %s11_s6 = sadd.s32 1, %s344_s6  }
 0x2dd   : > { %p8_p4 = scmp.ge.s32.totalorder %s11_s6, 10  }
 0x2df   :  { %10 = sbr.rel (!%p8_p4) target bundleno = 1 (0x1), region = 56 }

// kernel: custom_clip_forward.29
= control target key start
LH: loop header
LB: loop body
LE: loop exit
PB: predicated region body
PF: predicated region fallthrough
CT: control target
= control target key end

     0   :  { %v221_v0 = vmov 0.0   ;;  %vm222_vm0 = vmmov 0   ;;  %s284_s1 = inlined_call_operand.vmem [shape: bf16[128,128], index: 1, kind: input, shape index: {}]   ;;  %s285_s0 = inlined_call_operand.vmem [shape: bf16[16,128], index: 0, kind: input, shape index: {}]   ;;  %s286_s2 = inlined_call_operand.vmem [shape: f32[1,128], index: 2, kind: input, shape index: {}]   ;;  %s287_s3 = inlined_call_operand.vmem [shape: bf16[16,128], index: 3, kind: input, shape index: {}]   ;;  %s288_s4 = inlined_call_operand.vmem [shape: bf16[16,128], index: 4, kind: output, shape index: {}]  }
   0x1   :  { %190 = vmatprep.subr.bf16.mxu0 %v221_v0  ;;  %v212_v1 = vld [vmem:[%s284_s1 + $0x38] sm:$0xff]   ;;  %206 = vmatprep.mubr.msk.bf16.mxu0 %vm222_vm0, %v221_v0  ;;  %v213_v2 = vld [vmem:[%s284_s1 + $0x30] sm:$0xff]   ;;  %v214_v3 = vld [vmem:[%s284_s1 + $0x28] sm:$0xff]  }
   0x2   :  { %191 = vmatpush3.bf16.msra.mxu0 %v212_v1  ;;  %v215_v4 = vld [vmem:[%s284_s1 + $0x20] sm:$0xff]   ;;  %v216_v5 = vld [vmem:[%s284_s1 + $0x18] sm:$0xff]   ;;  %v217_v6 = vld [vmem:[%s284_s1 + $0x10] sm:$0xff]  }
   0x3   :  { %192 = vmatprep.subr.bf16.mxu0 %v221_v0  ;;  %v218_v7 = vld [vmem:[%s284_s1 + $0x8] sm:$0xff]   ;;  %v219_v8 = vld [vmem:[%s284_s1] sm:$0xff]  }
   0x4   :  { %v220_v9 = vld [vmem:[%s285_s0] sm:$0xff]  }
   0x5   :  { %v158_v10 = vld [vmem:[%s286_s2] ss:$0 sm:$0xff] }
   0x6   :  { %193 = vmatpush3.bf16.msra.mxu0 %v213_v2  ;;  %v173_v12 = vld [vmem:[%s287_s3] sm:$0xff]  }
   0x7   :  { %194 = vmatprep.subr.bf16.mxu0 %v221_v0  ;;  %v174_v15 = vunpack.c.l.bf16 %v173_v12  ;;  %v175_v16 = vunpack.c.h.bf16 %v173_v12 }
   0xa   :  { %195 = vmatpush3.bf16.msra.mxu0 %v214_v3 }
   0xb   :  { %196 = vmatprep.subr.bf16.mxu0 %v221_v0 }
   0xe   :  { %197 = vmatpush3.bf16.msra.mxu0 %v215_v4 }
   0xf   :  { %198 = vmatprep.subr.bf16.mxu0 %v221_v0 }
  0x12   :  { %199 = vmatpush3.bf16.msra.mxu0 %v216_v5 }
  0x13   :  { %200 = vmatprep.subr.bf16.mxu0 %v221_v0 }
  0x16   :  { %201 = vmatpush3.bf16.msra.mxu0 %v217_v6 }
  0x17   :  { %202 = vmatprep.subr.bf16.mxu0 %v221_v0 }
  0x1a   :  { %203 = vmatpush3.bf16.msra.mxu0 %v218_v7 }
  0x1b   :  { %204 = vmatprep.subr.bf16.mxu0 %v221_v0 }
  0x1e   :  { %205 = vmatpush3.bf16.msra.mxu0 %v219_v8 }
  0x21   :  { %207 = vmatmul.mubr.bf16.vlgmr.msra.gmra.mxu0 %v220_v9 }
  0xe1   :  { %v131_v11 = vpop.f32.mrf.mxu0 }
  0xe2   :  { %v132_v14 = vadd.f32 %v158_v10, %v131_v11 }
  0xe3   :  { %v208_v13 = vpop.f32.mrf.mxu0 }
  0xe4   :  { %v142_v20 = vadd.f32 %v174_v15, %v132_v14 }
  0xe5   :  { %v134_v17 = vpop.f32.mrf.mxu0 }
  0xe6   :  { %v135_v18 = vadd.f32 %v158_v10, %v134_v17 }
  0xe7   :  { %v209_v19 = vpop.f32.mrf.mxu0 }
  0xe8   :  { %v143_v21 = vadd.f32 %v175_v16, %v135_v18 }
  0xea   :  { %v179_v22 = vpack.c.bf16 %v143_v21, %v142_v20 }
  0xec   :  { %180 = vst [vmem:[%s288_s4] sm:$0xff] %v179_v22  }

// kernel: custom_clip_forward.30
= control target key start
LH: loop header
LB: loop body
LE: loop exit
PB: predicated region body
PF: predicated region fallthrough
CT: control target
= control target key end

     0   :  { %v290_v3 = vmov 0.0   ;;  %v33_v5 = vlaneseq  ;;  %vm291_vm1 = vmmov 0   ;;  %s361_s0 = inlined_call_operand.vmem [shape: bf16[16,128], index: 0, kind: input, shape index: {}]   ;;  %s362_s3 = inlined_call_operand.vmem [shape: bf16[128,128], index: 3, kind: input, shape index: {}]   ;;  %s363_s1 = inlined_call_operand.vmem [shape: f32[1,128], index: 1, kind: input, shape index: {}]   ;;  %s364_s2 = inlined_call_operand.vmem [shape: f32[1,128], index: 2, kind: input, shape index: {}]   ;;  %s365_s4 = inlined_call_operand.vmem [shape: f32[1,128], index: 4, kind: input, shape index: {}]   ;;  %s366_s5 = inlined_call_operand.vmem [shape: bf16[16,128], index: 5, kind: output, shape index: {}]  }
   0x1   :  { %v231_v0 = vld [vmem:[%s361_s0] sm:$0xff]   ;;  %248 = vmatprep.subr.bf16.mxu0 %v290_v3  ;;  %v270_v4 = vld [vmem:[%s362_s3 + $0x38] sm:$0xff]   ;;  %v271_v17 = vld [vmem:[%s362_s3 + $0x30] sm:$0xff]   ;;  %264 = vmatprep.mubr.msk.bf16.mxu0 %vm291_vm1, %v290_v3 }
   0x2   :  { %v232_v1 = vunpack.c.l.bf16 %v231_v0  ;;  %v233_v2 = vunpack.c.h.bf16 %v231_v0  ;;  %249 = vmatpush3.bf16.msra.mxu0 %v270_v4  ;;  %v34_v6 = vand.u32 127, %v33_v5  ;;  %v272_v18 = vld [vmem:[%s362_s3 + $0x28] sm:$0xff]   ;;  %v273_v19 = vld [vmem:[%s362_s3 + $0x20] sm:$0xff]   ;;  %v274_v20 = vld [vmem:[%s362_s3 + $0x18] sm:$0xff]  }
   0x3   :  { %250 = vmatprep.subr.bf16.mxu0 %v290_v3  ;;  %v275_v21 = vld [vmem:[%s362_s3 + $0x10] sm:$0xff]   ;;  %v276_v22 = vld [vmem:[%s362_s3 + $0x8] sm:$0xff]   ;;  %v277_v23 = vld [vmem:[%s362_s3] sm:$0xff]  }
   0x4   :  { %25 = vadd.xlane.f32.xlu0 %v232_v1  ;;  %vm35_vm0 = vcmp.lt.s32.totalorder %v34_v6, 32  ;;  %v213_v32 = vld [vmem:[%s363_s1] ss:$0 sm:$0xff] }
   0x5   :  { %v214_v36 = vld [vmem:[%s364_s2] ss:$0 sm:$0xff] }
   0x6   :  { %251 = vmatpush3.bf16.msra.mxu0 %v271_v17  ;;  %v215_v41 = vld [vmem:[%s365_s4] ss:$0 sm:$0xff] }
   0x7   :  { %252 = vmatprep.subr.bf16.mxu0 %v290_v3 }
   0x8   :  { %27 = vadd.xlane.f32.xlu0 %v233_v2 }
   0xa   :  { %253 = vmatpush3.bf16.msra.mxu0 %v272_v18 }
   0xb   :  { %254 = vmatprep.subr.bf16.mxu0 %v290_v3 }
   0xe   :  { %255 = vmatpush3.bf16.msra.mxu0 %v273_v19 }
   0xf   :  { %256 = vmatprep.subr.bf16.mxu0 %v290_v3 }
  0x12   :  { %257 = vmatpush3.bf16.msra.mxu0 %v274_v20 }
  0x13   :  { %258 = vmatprep.subr.bf16.mxu0 %v290_v3 }
  0x16   :  { %259 = vmatpush3.bf16.msra.mxu0 %v275_v21 }
  0x17   :  { %260 = vmatprep.subr.bf16.mxu0 %v290_v3 }
  0x1a   :  { %261 = vmatpush3.bf16.msra.mxu0 %v276_v22 }
  0x1b   :  { %262 = vmatprep.subr.bf16.mxu0 %v290_v3 }
  0x1e   :  { %263 = vmatpush3.bf16.msra.mxu0 %v277_v23 }
  0x8d   :  { %v26_v7 = vpop.xlane.xlu0 %25 }
  0x8e   :  { %v29_v8 = vmul.f32 0.03125, %v26_v7 }
  0x90   :  { %v31_v9 = vsub.f32 %v232_v1, %v29_v8 }
  0x91   :  { %v28_v10 = vpop.xlane.xlu0 %27 }
  0x92   :  { %v30_v11 = vmul.f32 0.03125, %v28_v10  ;;  %v36_v12 = vsel %vm35_vm0, %v31_v9, 0.0 }
  0x93   :  { %v38_v13 = vmul.f32 %v36_v12, %v36_v12 }
  0x94   :  { %v32_v14 = vsub.f32 %v233_v2, %v30_v11 }
  0x95   :  { %40 = vadd.xlane.f32.xlu1 %v38_v13 }
  0x96   :  { %v37_v15 = vsel %vm35_vm0, %v32_v14, 0.0 }
  0x97   :  { %v39_v16 = vmul.f32 %v37_v15, %v37_v15 }
  0x99   :  { %42 = vadd.xlane.f32.xlu1 %v39_v16 }
 0x11e   :  { %v41_v24 = vpop.xlane.xlu1 %40 }
 0x11f   :  { %v44_v25 = vmul.f32 0.03125, %v41_v24 }
 0x121   :  { %v46_v26 = vadd.f32 1e-05, %v44_v25 }
 0x122   :  { %v43_v27 = vpop.xlane.xlu1 %42 }
 0x123   :  { %278 = vrsqrt.f32 %v46_v26  ;;  %v45_v28 = vmul.f32 0.03125, %v43_v27 }
 0x125   :  { %v47_v29 = vadd.f32 1e-05, %v45_v28 }
 0x127   :  { %280 = vrsqrt.f32 %v47_v29 }
 0x130   :  { %v279_v30 = vpop.eup %278 }
 0x131   :  { %v50_v31 = vmul.f32 %v279_v30, %v36_v12 }
 0x133   :  { %v59_v35 = vmul.f32 %v213_v32, %v50_v31 }
 0x134   :  { %v281_v33 = vpop.eup %280 }
 0x135   :  { %v51_v34 = vmul.f32 %v281_v33, %v37_v15  ;;  %v68_v38 = vadd.f32 %v214_v36, %v59_v35 }
 0x137   :  { %v60_v37 = vmul.f32 %v213_v32, %v51_v34 }
 0x139   :  { %v69_v39 = vadd.f32 %v214_v36, %v60_v37 }
 0x13b   :  { %v70_v40 = vpack.c.bf16 %v69_v39, %v68_v38 }
 0x13d   :  { %265 = vmatmul.mubr.bf16.vlgmr.msra.gmra.mxu0 %v70_v40 }
 0x1fd   :  { %v176_v42 = vpop.f32.mrf.mxu0 }
 0x1fe   :  { %v177_v43 = vadd.f32 %v215_v41, %v176_v42 }
 0x1ff   :  { %v266_v44 = vpop.f32.mrf.mxu0 }
 0x200   :  { %v224_v45 = vmul.f32 -1.702, %v177_v43 }
 0x201   :  { %v179_v46 = vpop.f32.mrf.mxu0 }
 0x202   :  { %v187_v47 = vmul.f32 1.442695, %v224_v45  ;;  %v180_v48 = vadd.f32 %v215_v41, %v179_v46 }
 0x203   :  { %v267_v49 = vpop.f32.mrf.mxu0 }
 0x204   :  { %282 = vpow2.f32 %v187_v47  ;;  %v225_v50 = vmul.f32 -1.702, %v180_v48 }
 0x206   :  { %v189_v51 = vmul.f32 1.442695, %v225_v50 }
 0x208   :  { %284 = vpow2.f32 %v189_v51 }
 0x211   :  { %v283_v52 = vpop.eup %282 }
 0x212   :  { %v191_v53 = vadd.f32 1.0, %v283_v52 }
 0x214   :  { %286 = vrcp.f32 %v191_v53 }
 0x215   :  { %v285_v54 = vpop.eup %284 }
 0x216   :  { %v192_v55 = vadd.f32 1.0, %v285_v54 }
 0x218   :  { %288 = vrcp.f32 %v192_v55 }
 0x221   :  { %v287_v56 = vpop.eup %286 }
 0x222   :  { %v197_v58 = vmul.f32 %v287_v56, %v177_v43 }
 0x225   :  { %v289_v57 = vpop.eup %288 }
 0x226   :  { %v198_v59 = vmul.f32 %v289_v57, %v180_v48 }
 0x228   :  { %v237_v60 = vpack.c.bf16 %v198_v59, %v197_v58 }
 0x22a   :  { %238 = vst [vmem:[%s366_s5] sm:$0xff] %v237_v60  }

// kernel: custom_clip_forward.49
= control target key start
LH: loop header
LB: loop body
LE: loop exit
PB: predicated region body
PF: predicated region fallthrough
CT: control target
= control target key end

     0   :  { %12 = vsyncpa [#allocation4], 0  ;;  %vm34_vm0 = vcmask 519168   ;;  %s326_s0 = inlined_call_operand.vmem [shape: f32[2,64], index: 0, kind: input, shape index: {}]   ;;  %s327_s1 = inlined_call_operand.vmem [shape: f32[4,64], index: 1, kind: input, shape index: {}]   ;;  %s328_s2 = inlined_call_operand.vmem [shape: f32[4,64], index: 2, kind: input, shape index: {}]   ;;  %s329_s3 = inlined_call_operand.<no memory space> [shape: f32[1], index: 3, kind: input, shape index: {}]   ;;  %s330_s4 = inlined_call_operand.hbm [shape: f32[2,4], index: 4, kind: output, shape index: {0}]   ;;  %s331_s5 = inlined_call_operand.hbm [shape: f32[1,1], index: 5, kind: output, shape index: {1}]  }
   0x1   :  { %v24_v0 = vld [vmem:[%s328_s2] sm:$0xf] }
   0x2   :  { %v23_v1 = vld [vmem:[%s327_s1] sm:$0xf]  ;;  %v41_v2 = vmul.f32 %v24_v0, %v24_v0 }
   0x3   :  { %v33_v3 = vmul.f32 %v23_v1, %v23_v1  ;;  %v22_v4 = vld [vmem:[%s326_s0] sm:$0x3] }
   0x4   :  { %13 = vsyncpa [#allocation6], 0  ;;  %v25_v5 = vmul.f32 %v22_v4, %v22_v4  ;;  %vm26_vm1 = vcmask 517120   ;;  %v42_v6 = vsel %vm34_vm0, %v41_v2, 0.0  ;;  %v269_v9 = vmov 0.0   ;;  %s271_s0 = smov [#allocation5]  }
   0x5   :  { %v35_v7 = vsel %vm34_vm0, %v33_v3, 0.0  ;;  %43 = vadd.xlane.f32.xlu1 %v42_v6  ;;  %204 = vmatprep.subr.mxu0 %v269_v9  ;;  %vm270_vm2 = vmmov 0   ;;  %vm49_vm3 = vcmask 523264   ;;  %vm160_vm8 = vcmask 1043456   ;;  %s188_s1 = sshll.u32 %s271_s0, 4  ;;  %s272_s25 = smov [#allocation3]   ;;  %s189_s1 = int_to_ptr.vmem [resolvable:$true] %s188_s1 }
   0x6   :  { %36 = vadd.xlane.f32.xlu0 %v35_v7  ;;  %v27_v8 = vsel %vm26_vm1, %v25_v5, 0.0  ;;  %206 = vmatprep.mubr.msk.f32.mxu0 %vm270_vm2, %v269_v9  ;;  %v126_v53 = vstv %s329_s3  ;;  %s178_s26 = sshll.u32 %s272_s25, 4  ;;  %vm170_vm9 = vcmask 0   ;;  %vm128_vm10 = vcmask 25600   ;;  %s225_s27 = scalar_lea.vmem %s189_s1, 16  ;;  %s179_s26 = int_to_ptr.vmem [resolvable:$true] %s178_s26 }
   0x7   :  { %p226_p0 = scmp.ne.s32.totalorder %s189_s1, %s225_s27  ;;  %s229_s28 = scalar_lea.vmem %s189_s1, 32 }
   0x8   :  { %p230_p1 = scmp.lt.s32.totalorder %s189_s1, %s189_s1  ;;  %p231_p2 = scmp.lt.s32.totalorder %s229_s28, %s225_s27 }
   0xa   :  { %28 = vadd.xlane.f32.xlu0 %v27_v8  ;;  %p232_p3 = por %p231_p2, %p230_p1 }
   0xc   :  { %p233_p4 = pnand %p232_p3, %p226_p0 }
  0x8e   :  { %v44_v10 = vpop.xlane.xlu1 %43 }
  0x8f   :  { %v37_v11 = vpop.xlane.xlu0 %36  ;;  %v45_v12 = vadd.f32 1e-12, %v44_v10 }
  0x90   :  { %v38_v13 = vadd.f32 1e-12, %v37_v11 }
  0x91   :  { %213 = vrsqrt.f32 %v45_v12 }
  0x92   :  { %215 = vrsqrt.f32 %v38_v13 }
  0x93   :  { %v29_v14 = vpop.xlane.xlu0 %28 }
  0x94   :  { %v30_v15 = vadd.f32 1e-12, %v29_v14 }
  0x96   :  { %217 = vrsqrt.f32 %v30_v15 }
  0x9e   :  { %v214_v16 = vpop.eup %213 }
  0x9f   :  { %v216_v17 = vpop.eup %215  ;;  %v47_v18 = vmul.f32 %v214_v16, %v24_v0 }
  0xa0   :  { %v40_v19 = vmul.f32 %v216_v17, %v23_v1 }
  0xa1   :  { %v145_v20 = vmul.f32 %v47_v18, %v47_v18 }
  0xa2   :  { %205 = vmatpush3.xpose.msk.msra.mxu0 %vm49_vm3, %v40_v19  ;;  %v134_v22 = vmul.f32 %v40_v19, %v40_v19  ;;  %v130_v26 = vmul.f32 %v47_v18, %v40_v19 }
  0xa3   :  { %v218_v21 = vpop.eup %217  ;;  %v146_v23 = vsel %vm34_vm0, %v145_v20, 0.0 }
  0xa4   :  { %v32_v24 = vmul.f32 %v218_v21, %v22_v4  ;;  %v135_v25 = vsel %vm34_vm0, %v134_v22, 0.0  ;;  %147 = vadd.xlane.f32.xlu0 %v146_v23  ;;  %v131_v27 = vsel %vm34_vm0, %v130_v26, 0.0 }
  0xa5   :  { %136 = vadd.xlane.f32.xlu1 %v135_v25 }
  0xa6   :  { %207 = vmatmul.mubr.msk.f32.vlgmr.msra.gmra.mxu0 %vm49_vm3, %v32_v24 }
  0xa9   :  { %132 = vadd.xlane.f32.xlu1 %v131_v27 }
 0x12d   :  { %v148_v28 = vpop.xlane.xlu0 %147 }
 0x12e   :  { %v137_v29 = vpop.xlane.xlu1 %136  ;;  %219 = vrsqrt.f32 %v148_v28  ;;  %vm151_vm4 = vcmp.eq.f32.partialorder %v148_v28, inf  ;;  %v154_v34 = vand.u32 2147483648, %v148_v28  ;;  %vm153_vm6 = vcmp.eq.f32.partialorder %v148_v28, 0.0 }
 0x12f   :  { %221 = vrsqrt.f32 %v137_v29  ;;  %vm140_vm5 = vcmp.eq.f32.partialorder %v137_v29, inf  ;;  %v143_v35 = vand.u32 2147483648, %v137_v29  ;;  %vm142_vm7 = vcmp.eq.f32.partialorder %v137_v29, 0.0 }
 0x132   :  { %v133_v43 = vpop.xlane.xlu1 %132 }
 0x13b   :  { %v220_v30 = vpop.eup %219 }
 0x13c   :  { %v222_v31 = vpop.eup %221  ;;  %v150_v32 = vmul.f32 %v220_v30, %v148_v28 }
 0x13d   :  { %v139_v33 = vmul.f32 %v222_v31, %v137_v29 }
 0x13e   :  { %v152_v36 = vsel %vm151_vm4, %v148_v28, %v150_v32 }
 0x13f   :  { %v141_v37 = vsel %vm140_vm5, %v137_v29, %v139_v33  ;;  %v155_v38 = vsel %vm153_vm6, %v154_v34, %v152_v36 }
 0x140   :  { %v144_v39 = vsel %vm142_vm7, %v143_v35, %v141_v37 }
 0x141   :  { %v156_v40 = vmul.f32 %v155_v38, %v144_v39 }
 0x143   :  { %v157_v41 = vmax.f32 %v156_v40, 1e-07 }
 0x145   :  { %223 = vrcp.f32 %v157_v41 }
 0x152   :  { %v224_v42 = vpop.eup %223 }
 0x153   :  { %v159_v44 = vmul.f32 %v224_v42, %v133_v43 }
 0x155   :  { %v161_v45 = vsel %vm160_vm8, %v159_v44, 0.0 }
 0x156   :  { %v162_v46 = vrot.slane %v161_v45, 4 }
 0x158   :  { %v163_v47 = vadd.f32 %v162_v46, %v161_v45 }
 0x15a   :  { %v164_v48 = vrot.slane %v163_v47, 2 }
 0x15c   :  { %v165_v49 = vadd.f32 %v164_v48, %v163_v47 }
 0x15e   :  { %v166_v50 = vrot.slane %v165_v49, 1 }
 0x160   :  { %v167_v51 = vadd.f32 %v166_v50, %v165_v49 }
 0x162   :  { %v168_v52 = vmul.f32 0.25, %v167_v51 }
 0x164   :  { %v169_v54 = vsub.f32 1.0, %v168_v52 }
 0x166   :  { %v122_v55 = vpop.f32.mrf.mxu0  ;;  %171 = vst.msk [vmem:[#allocation5] sm:$0x1] %vm170_vm9, %v169_v54 }
 0x167   :  { %v127_v56 = vmul.f32 %v126_v53, %v122_v55 }
 0x168   :  { %v208_v57 = vpop.f32.mrf.mxu0 }
 0x169   :  { %236 = shalt.err (!%p233_p4)
}
 0x16a   :  { %191 = dma.vmem_to_hbm [thread:$0]  %s189_s1, 16, %s331_s5, [#allocation6]   ;;  %129 = vst.msk [vmem:[#allocation3] sm:$0x3] %vm128_vm10, %v127_v56 }
 0x16b   :  { %s245_s30 = scalar_lea.vmem %s179_s26, 32  ;;  %p250_p6 = scmp.lt.s32.totalorder %s179_s26, %s179_s26 }
 0x16c   :  { %p246_p5 = scmp.ne.s32.totalorder %s179_s26, %s245_s30  ;;  %p251_p7 = scmp.lt.s32.totalorder %s245_s30, %s245_s30 }
 0x16e   :  { %p252_p8 = por %p251_p7, %p250_p6 }
 0x170   :  { %p253_p9 = pnand %p252_p8, %p246_p5 }
 0x172   :  { %256 = shalt.err (!%p253_p9)
}
 0x173   :  { %181 = dma.vmem_to_hbm [thread:$0]  %s179_s26, 32, %s330_s4, [#allocation4]  }
 0x174   :  { %265 = dma.done.wait [#allocation4], 32  }
 0x175   :  { %266 = vsyncadd [#allocation4], 4294967264 }
 0x176   :  { %267 = dma.done.wait [#allocation6], 16  }
 0x177   :  { %268 = vsyncadd [#allocation6], 4294967280 }
 0x178   :  { %198 = vsyncpa [#allocation4], 1 }
 0x179   :  { %199 = vsyncpa [#allocation6], 1 }

</bundles_post_ra>
